<compile_context>
chip_gen: v5e
topology: v5e:2x2
jax: 0.10.0
libtpu: 0.0.40
codegen_flags: <defaults>
</compile_context>

<pallas_src>
import functools

import jax
import jax.numpy as jnp
from jax.experimental import pallas as pl
from jax.experimental.pallas import tpu as pltpu


def hinge_tree_kernel(x_ref, sel_ref, thr_ref, w_ref, o_ref):
    # x_ref   : [TB, C_in]            f32 batch tile
    # sel_ref : [1, C_in, N*Tp]       bf16 one-hot selection (node-major columns)
    # thr_ref : [1, 1, N*Tp]          f32 thresholds, same column order as sel
    # w_ref   : [1, L, Tp]            f32 leaf weights for this tree tile
    # o_ref   : [TB, Tp]              f32 output tile
    x = x_ref[...]
    sel = sel_ref[0].astype(jnp.float32)       # 0/1 exact in bf16 -> exact in f32
    thr = thr_ref[0]                           # [1, N*Tp]
    w = w_ref[0]                               # [L, Tp]

    t_tile = o_ref.shape[1]
    num_leaves = w.shape[0]
    depth = num_leaves.bit_length() - 1        # static python int

    # One fused MXU pass: gather every internal node's feature for every tree
    # in the tile, then subtract all thresholds in a single vector op.
    g = jnp.dot(x, sel, preferred_element_type=jnp.float32)   # [TB, N*Tp]
    m_all = g - thr                                           # [TB, N*Tp]

    def node_margin(v):  # static lane-aligned slice of an already-loaded value
        return m_all[:, v * t_tile:(v + 1) * t_tile]          # [TB, Tp]

    # --- Traverse the complete binary tree with bit-driven select trees. -----
    m = node_margin(0)
    minabs = jnp.abs(m)
    bits = [m > 0]                             # bits[d] = decision at level d
    for d in range(1, depth):
        first = 2 ** d - 1                     # first node index of level d
        cand = [node_margin(first + i) for i in range(2 ** d)]
        # bit_{d-1} picks within adjacent pairs; bit_0 is the most significant.
        for k in range(d - 1, -1, -1):
            b = bits[k]
            cand = [jnp.where(b, cand[2 * i + 1], cand[2 * i])
                    for i in range(len(cand) // 2)]
        m = cand[0]
        minabs = jnp.minimum(minabs, jnp.abs(m))
        bits.append(m > 0)

    # --- Leaf-weight pick: log2(L) select tree, no integer key. --------------
    cand = [w[l:l + 1, :] for l in range(num_leaves)]          # each [1, Tp]
    for k in range(depth - 1, -1, -1):
        b = bits[k]
        cand = [jnp.where(b, cand[2 * i + 1], cand[2 * i])
                for i in range(len(cand) // 2)]
    selw = cand[0]                                             # [TB, Tp]

    o_ref[...] = (selw * minabs).astype(o_ref.dtype)


@functools.partial(jax.jit, static_argnames=("block_batch", "block_trees"))
def random_hinge_tree_forward(x, thresholds, ordinals, weights,
                              *, block_batch=256, block_trees=128):
    """x: [B, C_in] f32; thresholds/ordinals: [T, 2**D - 1]; weights: [T, 2**D].
    Returns [B, T] f32."""
    batch, in_channels = x.shape
    out_channels, n_nodes = thresholds.shape
    num_leaves = weights.shape[1]
    depth = num_leaves.bit_length() - 1
    assert num_leaves == 2 ** depth and n_nodes == num_leaves - 1
    assert block_batch % 8 == 0 and block_trees % 128 == 0

    bb = block_batch
    t_tile = block_trees
    nb = pl.cdiv(batch, bb)
    nt = pl.cdiv(out_channels, t_tile)
    b_pad = nb * bb
    t_pad = nt * t_tile

    # --- Parameter / input layout glue (plain JAX; cheap, shapes are tiny). ---
    if b_pad != batch:
        x = jnp.pad(x, ((0, b_pad - batch), (0, 0)))
    x = x.astype(jnp.float32)

    ord_p = jnp.pad(ordinals, ((0, t_pad - out_channels), (0, 0)))
    thr_p = jnp.pad(thresholds.astype(jnp.float32),
                    ((0, t_pad - out_channels), (0, 0)))
    w_p = jnp.pad(weights.astype(jnp.float32),
                  ((0, t_pad - out_channels), (0, 0)))

    # One-hot selection, bf16 (exact for 0/1), columns ordered (tree tile j,
    # node v, tree-within-tile) so each tile's N*Tp columns are contiguous.
    sel = jax.nn.one_hot(ord_p, in_channels, dtype=jnp.bfloat16)  # [Tp_tot,N,C]
    sel = sel.reshape(nt, t_tile, n_nodes, in_channels)
    sel = jnp.transpose(sel, (0, 3, 2, 1))                        # [nt,C,N,tt]
    sel = sel.reshape(nt, in_channels, n_nodes * t_tile)

    thr3 = jnp.transpose(thr_p.reshape(nt, t_tile, n_nodes), (0, 2, 1))
    thr3 = thr3.reshape(nt, 1, n_nodes * t_tile)                  # [nt,1,N*tt]

    w3 = jnp.transpose(w_p.reshape(nt, t_tile, num_leaves), (0, 2, 1))
    # [nt, L, tt]

    out = pl.pallas_call(
        hinge_tree_kernel,
        out_shape=jax.ShapeDtypeStruct((b_pad, t_pad), jnp.float32),
        grid=(nb, nt),
        in_specs=[
            pl.BlockSpec((bb, in_channels), lambda i, j: (i, 0)),
            pl.BlockSpec((1, in_channels, n_nodes * t_tile), lambda i, j: (j, 0, 0)),
            pl.BlockSpec((1, 1, n_nodes * t_tile), lambda i, j: (j, 0, 0)),
            pl.BlockSpec((1, num_leaves, t_tile), lambda i, j: (j, 0, 0)),
        ],
        out_specs=pl.BlockSpec((bb, t_tile), lambda i, j: (i, j)),
        compiler_params=pltpu.CompilerParams(
            dimension_semantics=("parallel", "parallel"),
            vmem_limit_bytes=64 * 1024 * 1024),
    )(x, sel, thr3, w3)

    return out[:batch, :out_channels]


def reference_forward(x, thresholds, ordinals, weights):
    """Pure-JAX reference (gather-based tree traversal), same semantics."""
    batch = x.shape[0]
    out_channels, num_leaves = weights.shape
    depth = num_leaves.bit_length() - 1
    t_idx = jnp.arange(out_channels)[None, :]
    b_idx = jnp.arange(batch)[:, None]
    node = jnp.zeros((batch, out_channels), jnp.int32)
    minabs = jnp.full((batch, out_channels), jnp.inf, jnp.float32)
    for _ in range(depth):
        feat = ordinals[t_idx, node]
        thr = thresholds[t_idx, node]
        margin = x[b_idx, feat] - thr
        minabs = jnp.minimum(minabs, jnp.abs(margin))
        node = 2 * node + 1 + (margin > 0).astype(jnp.int32)
    leaf = node - (num_leaves - 1)
    return weights[t_idx, leaf] * minabs


if __name__ == "__main__":
    # Small shapes consistent with the module's __init__ (2D input case).
    batch = 512          # 2 batch tiles of 256 rows -> exercises the grid
    in_channels = 32
    out_channels = 16
    depth = 4
    n_nodes = 2 ** depth - 1
    num_leaves = 2 ** depth

    key0 = jax.random.PRNGKey(0)
    kx, kthr, kord, kw = jax.random.split(key0, 4)

    # Deterministic parameter init mirroring the PyTorch __init__ ('random').
    thresholds = 6.0 * jax.random.uniform(
        kthr, (out_channels, n_nodes), dtype=jnp.float32) - 3.0
    ordinals = jax.random.randint(
        kord, (out_channels, n_nodes), 0, in_channels, dtype=jnp.int32)
    weights = jax.random.normal(kw, (out_channels, num_leaves), dtype=jnp.float32)
    x = jax.random.normal(kx, (batch, in_channels), dtype=jnp.float32)

    out = random_hinge_tree_forward(x, thresholds, ordinals, weights,
                                    block_batch=256, block_trees=128)
    out = jax.block_until_ready(out)

    ref = jax.block_until_ready(
        reference_forward(x, thresholds, ordinals, weights))

    assert out.shape == (batch, out_channels)
    assert jnp.allclose(out, ref, rtol=1e-5, atol=1e-5), "mismatch vs reference"
    print("KERNEL_OK")
</pallas_src>

<mosaic_0001>
module attributes {stable_mosaic.version = 11 : i64} {
  func.func @hinge_tree_kernel(%arg0: i32, %arg1: i32, %arg2: memref<256x32xf32, #tpu.memory_space<vmem>>, %arg3: memref<1x32x1920xbf16, #tpu.memory_space<vmem>>, %arg4: memref<1x1x1920xf32, #tpu.memory_space<vmem>>, %arg5: memref<1x16x128xf32, #tpu.memory_space<vmem>>, %arg6: memref<256x128xf32, #tpu.memory_space<vmem>>) attributes {dimension_semantics = [#tpu.dimension_semantics<parallel>, #tpu.dimension_semantics<parallel>], iteration_bounds = array<i64: 2, 1>, scalar_prefetch = 0 : i64, scratch_operands = 0 : i64, tpu.core_type = #tpu.core_type<tc>, window_params = [{transform_indices = @transform_0, window_bounds = array<i64: 256, 32>}, {transform_indices = @transform_1, window_bounds = array<i64: 1, 32, 1920>}, {transform_indices = @transform_2, window_bounds = array<i64: 1, 1, 1920>}, {transform_indices = @transform_3, window_bounds = array<i64: 1, 16, 128>}, {transform_indices = @transform_4, window_bounds = array<i64: 256, 128>}]} {
    %c0 = arith.constant 0 : index
    %c0_0 = arith.constant 0 : index
    %0 = vector.load %arg2[%c0, %c0_0] : memref<256x32xf32, #tpu.memory_space<vmem>>, vector<256x32xf32>
    %c0_1 = arith.constant 0 : index
    %c0_2 = arith.constant 0 : index
    %c0_3 = arith.constant 0 : index
    %1 = vector.load %arg3[%c0_1, %c0_2, %c0_3] : memref<1x32x1920xbf16, #tpu.memory_space<vmem>>, vector<1x32x1920xbf16>
    %2 = vector.shape_cast %1 : vector<1x32x1920xbf16> to vector<32x1920xbf16>
    %3 = arith.extf %2 : vector<32x1920xbf16> to vector<32x1920xf32>
    %c0_4 = arith.constant 0 : index
    %c0_5 = arith.constant 0 : index
    %c0_6 = arith.constant 0 : index
    %4 = vector.load %arg4[%c0_4, %c0_5, %c0_6] : memref<1x1x1920xf32, #tpu.memory_space<vmem>>, vector<1x1x1920xf32>
    %5 = vector.shape_cast %4 : vector<1x1x1920xf32> to vector<1x1920xf32>
    %c0_7 = arith.constant 0 : index
    %c0_8 = arith.constant 0 : index
    %c0_9 = arith.constant 0 : index
    %6 = vector.load %arg5[%c0_7, %c0_8, %c0_9] : memref<1x16x128xf32, #tpu.memory_space<vmem>>, vector<1x16x128xf32>
    %7 = vector.shape_cast %6 : vector<1x16x128xf32> to vector<16x128xf32>
    %cst = arith.constant dense<0.000000e+00> : vector<256x1920xf32>
    %8 = tpu.matmul %0, %3, %cst {dimension_numbers = #tpu.dot_dimension_numbers<[1], [0], [0], [1], [0, 0, 1, 1], [], []>} : vector<256x32xf32>, vector<32x1920xf32>, vector<256x1920xf32> -> vector<256x1920xf32>
    %9 = vector.broadcast %5 : vector<1x1920xf32> to vector<256x1920xf32>
    %10 = arith.subf %8, %9 : vector<256x1920xf32>
    %11 = vector.extract_strided_slice %10 {offsets = [0, 0], sizes = [256, 128], strides = [1, 1]} : vector<256x1920xf32> to vector<256x128xf32>
    %12 = math.absf %11 : vector<256x128xf32>
    %cst_10 = arith.constant 0.000000e+00 : f32
    %13 = vector.broadcast %cst_10 : f32 to vector<256x128xf32>
    %14 = arith.cmpf ogt, %11, %13 : vector<256x128xf32>
    %15 = vector.extract_strided_slice %10 {offsets = [0, 128], sizes = [256, 128], strides = [1, 1]} : vector<256x1920xf32> to vector<256x128xf32>
    %16 = vector.extract_strided_slice %10 {offsets = [0, 256], sizes = [256, 128], strides = [1, 1]} : vector<256x1920xf32> to vector<256x128xf32>
    %17 = arith.select %14, %16, %15 : vector<256x128xi1>, vector<256x128xf32>
    %18 = math.absf %17 : vector<256x128xf32>
    %19 = arith.minimumf %12, %18 : vector<256x128xf32>
    %cst_11 = arith.constant 0.000000e+00 : f32
    %20 = vector.broadcast %cst_11 : f32 to vector<256x128xf32>
    %21 = arith.cmpf ogt, %17, %20 : vector<256x128xf32>
    %22 = vector.extract_strided_slice %10 {offsets = [0, 384], sizes = [256, 128], strides = [1, 1]} : vector<256x1920xf32> to vector<256x128xf32>
    %23 = vector.extract_strided_slice %10 {offsets = [0, 512], sizes = [256, 128], strides = [1, 1]} : vector<256x1920xf32> to vector<256x128xf32>
    %24 = vector.extract_strided_slice %10 {offsets = [0, 640], sizes = [256, 128], strides = [1, 1]} : vector<256x1920xf32> to vector<256x128xf32>
    %25 = vector.extract_strided_slice %10 {offsets = [0, 768], sizes = [256, 128], strides = [1, 1]} : vector<256x1920xf32> to vector<256x128xf32>
    %26 = arith.select %21, %23, %22 : vector<256x128xi1>, vector<256x128xf32>
    %27 = arith.select %21, %25, %24 : vector<256x128xi1>, vector<256x128xf32>
    %28 = arith.select %14, %27, %26 : vector<256x128xi1>, vector<256x128xf32>
    %29 = math.absf %28 : vector<256x128xf32>
    %30 = arith.minimumf %19, %29 : vector<256x128xf32>
    %cst_12 = arith.constant 0.000000e+00 : f32
    %31 = vector.broadcast %cst_12 : f32 to vector<256x128xf32>
    %32 = arith.cmpf ogt, %28, %31 : vector<256x128xf32>
    %33 = vector.extract_strided_slice %10 {offsets = [0, 896], sizes = [256, 128], strides = [1, 1]} : vector<256x1920xf32> to vector<256x128xf32>
    %34 = vector.extract_strided_slice %10 {offsets = [0, 1024], sizes = [256, 128], strides = [1, 1]} : vector<256x1920xf32> to vector<256x128xf32>
    %35 = vector.extract_strided_slice %10 {offsets = [0, 1152], sizes = [256, 128], strides = [1, 1]} : vector<256x1920xf32> to vector<256x128xf32>
    %36 = vector.extract_strided_slice %10 {offsets = [0, 1280], sizes = [256, 128], strides = [1, 1]} : vector<256x1920xf32> to vector<256x128xf32>
    %37 = vector.extract_strided_slice %10 {offsets = [0, 1408], sizes = [256, 128], strides = [1, 1]} : vector<256x1920xf32> to vector<256x128xf32>
    %38 = vector.extract_strided_slice %10 {offsets = [0, 1536], sizes = [256, 128], strides = [1, 1]} : vector<256x1920xf32> to vector<256x128xf32>
    %39 = vector.extract_strided_slice %10 {offsets = [0, 1664], sizes = [256, 128], strides = [1, 1]} : vector<256x1920xf32> to vector<256x128xf32>
    %40 = vector.extract_strided_slice %10 {offsets = [0, 1792], sizes = [256, 128], strides = [1, 1]} : vector<256x1920xf32> to vector<256x128xf32>
    %41 = arith.select %32, %34, %33 : vector<256x128xi1>, vector<256x128xf32>
    %42 = arith.select %32, %36, %35 : vector<256x128xi1>, vector<256x128xf32>
    %43 = arith.select %32, %38, %37 : vector<256x128xi1>, vector<256x128xf32>
    %44 = arith.select %32, %40, %39 : vector<256x128xi1>, vector<256x128xf32>
    %45 = arith.select %21, %42, %41 : vector<256x128xi1>, vector<256x128xf32>
    %46 = arith.select %21, %44, %43 : vector<256x128xi1>, vector<256x128xf32>
    %47 = arith.select %14, %46, %45 : vector<256x128xi1>, vector<256x128xf32>
    %48 = math.absf %47 : vector<256x128xf32>
    %49 = arith.minimumf %30, %48 : vector<256x128xf32>
    %cst_13 = arith.constant 0.000000e+00 : f32
    %50 = vector.broadcast %cst_13 : f32 to vector<256x128xf32>
    %51 = arith.cmpf ogt, %47, %50 : vector<256x128xf32>
    %52 = vector.extract_strided_slice %7 {offsets = [0, 0], sizes = [1, 128], strides = [1, 1]} : vector<16x128xf32> to vector<1x128xf32>
    %53 = vector.extract_strided_slice %7 {offsets = [1, 0], sizes = [1, 128], strides = [1, 1]} : vector<16x128xf32> to vector<1x128xf32>
    %54 = vector.extract_strided_slice %7 {offsets = [2, 0], sizes = [1, 128], strides = [1, 1]} : vector<16x128xf32> to vector<1x128xf32>
    %55 = vector.extract_strided_slice %7 {offsets = [3, 0], sizes = [1, 128], strides = [1, 1]} : vector<16x128xf32> to vector<1x128xf32>
    %56 = vector.extract_strided_slice %7 {offsets = [4, 0], sizes = [1, 128], strides = [1, 1]} : vector<16x128xf32> to vector<1x128xf32>
    %57 = vector.extract_strided_slice %7 {offsets = [5, 0], sizes = [1, 128], strides = [1, 1]} : vector<16x128xf32> to vector<1x128xf32>
    %58 = vector.extract_strided_slice %7 {offsets = [6, 0], sizes = [1, 128], strides = [1, 1]} : vector<16x128xf32> to vector<1x128xf32>
    %59 = vector.extract_strided_slice %7 {offsets = [7, 0], sizes = [1, 128], strides = [1, 1]} : vector<16x128xf32> to vector<1x128xf32>
    %60 = vector.extract_strided_slice %7 {offsets = [8, 0], sizes = [1, 128], strides = [1, 1]} : vector<16x128xf32> to vector<1x128xf32>
    %61 = vector.extract_strided_slice %7 {offsets = [9, 0], sizes = [1, 128], strides = [1, 1]} : vector<16x128xf32> to vector<1x128xf32>
    %62 = vector.extract_strided_slice %7 {offsets = [10, 0], sizes = [1, 128], strides = [1, 1]} : vector<16x128xf32> to vector<1x128xf32>
    %63 = vector.extract_strided_slice %7 {offsets = [11, 0], sizes = [1, 128], strides = [1, 1]} : vector<16x128xf32> to vector<1x128xf32>
    %64 = vector.extract_strided_slice %7 {offsets = [12, 0], sizes = [1, 128], strides = [1, 1]} : vector<16x128xf32> to vector<1x128xf32>
    %65 = vector.extract_strided_slice %7 {offsets = [13, 0], sizes = [1, 128], strides = [1, 1]} : vector<16x128xf32> to vector<1x128xf32>
    %66 = vector.extract_strided_slice %7 {offsets = [14, 0], sizes = [1, 128], strides = [1, 1]} : vector<16x128xf32> to vector<1x128xf32>
    %67 = vector.extract_strided_slice %7 {offsets = [15, 0], sizes = [1, 128], strides = [1, 1]} : vector<16x128xf32> to vector<1x128xf32>
    %68 = vector.shape_cast %53 : vector<1x128xf32> to vector<1x128xf32>
    %69 = vector.broadcast %68 : vector<1x128xf32> to vector<256x128xf32>
    %70 = vector.shape_cast %52 : vector<1x128xf32> to vector<1x128xf32>
    %71 = vector.broadcast %70 : vector<1x128xf32> to vector<256x128xf32>
    %72 = arith.select %51, %69, %71 : vector<256x128xi1>, vector<256x128xf32>
    %73 = vector.shape_cast %55 : vector<1x128xf32> to vector<1x128xf32>
    %74 = vector.broadcast %73 : vector<1x128xf32> to vector<256x128xf32>
    %75 = vector.shape_cast %54 : vector<1x128xf32> to vector<1x128xf32>
    %76 = vector.broadcast %75 : vector<1x128xf32> to vector<256x128xf32>
    %77 = arith.select %51, %74, %76 : vector<256x128xi1>, vector<256x128xf32>
    %78 = vector.shape_cast %57 : vector<1x128xf32> to vector<1x128xf32>
    %79 = vector.broadcast %78 : vector<1x128xf32> to vector<256x128xf32>
    %80 = vector.shape_cast %56 : vector<1x128xf32> to vector<1x128xf32>
    %81 = vector.broadcast %80 : vector<1x128xf32> to vector<256x128xf32>
    %82 = arith.select %51, %79, %81 : vector<256x128xi1>, vector<256x128xf32>
    %83 = vector.shape_cast %59 : vector<1x128xf32> to vector<1x128xf32>
    %84 = vector.broadcast %83 : vector<1x128xf32> to vector<256x128xf32>
    %85 = vector.shape_cast %58 : vector<1x128xf32> to vector<1x128xf32>
    %86 = vector.broadcast %85 : vector<1x128xf32> to vector<256x128xf32>
    %87 = arith.select %51, %84, %86 : vector<256x128xi1>, vector<256x128xf32>
    %88 = vector.shape_cast %61 : vector<1x128xf32> to vector<1x128xf32>
    %89 = vector.broadcast %88 : vector<1x128xf32> to vector<256x128xf32>
    %90 = vector.shape_cast %60 : vector<1x128xf32> to vector<1x128xf32>
    %91 = vector.broadcast %90 : vector<1x128xf32> to vector<256x128xf32>
    %92 = arith.select %51, %89, %91 : vector<256x128xi1>, vector<256x128xf32>
    %93 = vector.shape_cast %63 : vector<1x128xf32> to vector<1x128xf32>
    %94 = vector.broadcast %93 : vector<1x128xf32> to vector<256x128xf32>
    %95 = vector.shape_cast %62 : vector<1x128xf32> to vector<1x128xf32>
    %96 = vector.broadcast %95 : vector<1x128xf32> to vector<256x128xf32>
    %97 = arith.select %51, %94, %96 : vector<256x128xi1>, vector<256x128xf32>
    %98 = vector.shape_cast %65 : vector<1x128xf32> to vector<1x128xf32>
    %99 = vector.broadcast %98 : vector<1x128xf32> to vector<256x128xf32>
    %100 = vector.shape_cast %64 : vector<1x128xf32> to vector<1x128xf32>
    %101 = vector.broadcast %100 : vector<1x128xf32> to vector<256x128xf32>
    %102 = arith.select %51, %99, %101 : vector<256x128xi1>, vector<256x128xf32>
    %103 = vector.shape_cast %67 : vector<1x128xf32> to vector<1x128xf32>
    %104 = vector.broadcast %103 : vector<1x128xf32> to vector<256x128xf32>
    %105 = vector.shape_cast %66 : vector<1x128xf32> to vector<1x128xf32>
    %106 = vector.broadcast %105 : vector<1x128xf32> to vector<256x128xf32>
    %107 = arith.select %51, %104, %106 : vector<256x128xi1>, vector<256x128xf32>
    %108 = arith.select %32, %77, %72 : vector<256x128xi1>, vector<256x128xf32>
    %109 = arith.select %32, %87, %82 : vector<256x128xi1>, vector<256x128xf32>
    %110 = arith.select %32, %97, %92 : vector<256x128xi1>, vector<256x128xf32>
    %111 = arith.select %32, %107, %102 : vector<256x128xi1>, vector<256x128xf32>
    %112 = arith.select %21, %109, %108 : vector<256x128xi1>, vector<256x128xf32>
    %113 = arith.select %21, %111, %110 : vector<256x128xi1>, vector<256x128xf32>
    %114 = arith.select %14, %113, %112 : vector<256x128xi1>, vector<256x128xf32>
    %115 = arith.mulf %114, %49 : vector<256x128xf32>
    %c0_14 = arith.constant 0 : index
    %c0_15 = arith.constant 0 : index
    %116 = vector.load %arg6[%c0_14, %c0_15] : memref<256x128xf32, #tpu.memory_space<vmem>>, vector<256x128xf32>
    tpu.vector_store %arg6[%c0_14, %c0_15], %115 {strides = array<i32>} : memref<256x128xf32, #tpu.memory_space<vmem>>, vector<256x128xf32>,
    return
  }
  func.func @transform_0(%arg0: i32, %arg1: i32) -> (i32, i32) {
    %c0_i32 = arith.constant 0 : i32
    %c0_i32_0 = arith.constant 0 : i32
    return %arg0, %c0_i32 : i32, i32
  }
  func.func @transform_1(%arg0: i32, %arg1: i32) -> (i32, i32, i32) {
    %c0_i32 = arith.constant 0 : i32
    %c0_i32_0 = arith.constant 0 : i32
    %c0_i32_1 = arith.constant 0 : i32
    return %arg1, %c0_i32, %c0_i32_0 : i32, i32, i32
  }
  func.func @transform_2(%arg0: i32, %arg1: i32) -> (i32, i32, i32) {
    %c0_i32 = arith.constant 0 : i32
    %c0_i32_0 = arith.constant 0 : i32
    %c0_i32_1 = arith.constant 0 : i32
    return %arg1, %c0_i32, %c0_i32_0 : i32, i32, i32
  }
  func.func @transform_3(%arg0: i32, %arg1: i32) -> (i32, i32, i32) {
    %c0_i32 = arith.constant 0 : i32
    %c0_i32_0 = arith.constant 0 : i32
    %c0_i32_1 = arith.constant 0 : i32
    return %arg1, %c0_i32, %c0_i32_0 : i32, i32, i32
  }
  func.func @transform_4(%arg0: i32, %arg1: i32) -> (i32, i32) {
    %c0_i32 = arith.constant 0 : i32
    return %arg0, %arg1 : i32, i32
  }
}

</mosaic_0001>

<bundles_post_ra>
// kernel: random_hinge_tree_forward.1
= control target key start
LH: loop header
LB: loop body
LE: loop exit
PB: predicated region body
PF: predicated region fallthrough
CT: control target
= control target key end

     0   :  { %s4751_s15 = smov 0   ;;  %s4753_s16 = smov 0   ;;  %s8903_s0 = inlined_call_operand.vmem [shape: f32[512,32], index: 0, kind: input, shape index: {}]   ;;  %s8904_s1 = inlined_call_operand.vmem [shape: bf16[1,32,1920], index: 1, kind: input, shape index: {}]   ;;  %s8905_s2 = inlined_call_operand.vmem [shape: f32[1,1,1920], index: 2, kind: input, shape index: {}]   ;;  %s8906_s3 = inlined_call_operand.vmem [shape: f32[1,16,128], index: 3, kind: input, shape index: {}]   ;;  %s8907_s4 = inlined_call_operand.vmem [shape: f32[512,128], index: 4, kind: output, shape index: {}]  }
   0x1   :  { %s4755_s17 = smov 0  }
   0x2 LB: > { %s26_s18 = sadd.s32 1, %s4720_s16  ;;  %p4101_p0 = scmp.ge.s32.totalorder %s4724_s17, 1  ;;  %s4724_s17 = sphi %s4755_s17, %s14_s17   ;;  %s4720_s16 = sphi %s4753_s16, %s9840_s16   ;;  %s4716_s15 = sphi %s4751_s15, %s9839_s15  }
   0x3   : > { %p28_p1 = scmp.ge.s32.totalorder %s26_s18, 2  ;;  %p206_p2 = scmp.lt.s32.totalorder %s4724_s17, 3 }
   0x5   : > { %s9842_s18 = smov (%p28_p1, %s26_s18), 0  ;;  %p207_p3 = pnand %p4101_p0, %p206_p2 }
   0x7   : > { %210 = sbr.rel (%p207_p3) target bundleno = 1129 (0x469), region = 36 }
   0xc   : > { %v334_v0 = vld [vmem:[%s8904_s1 + $0xb4] sm:$0xff]  ;;  %v4777_v1 = vld [vmem:[%s8904_s1 + $0xbc] sm:$0xff]  ;;  %s4102_s25 = sshll.u32 %s4716_s15, 5  ;;  %v4795_v8 = vld [vmem:[%s8904_s1 + $0x44] sm:$0xff]  ;;  %vm406_vm0 = vcmask 261120  }
   0xd   : > { %v326_v2 = vld [vmem:[%s8904_s1 + $0x78] sm:$0xff]  ;;  %v387_v3 = vunpack.c.l.bf16 %v334_v0  ;;  %v389_v4 = vunpack.c.l.bf16 %v4777_v1  ;;  %v4787_v6 = vld [vmem:[%s8904_s1 + $0x80] sm:$0xff]  ;;  %p250_p4 = scmp.lt.s32.totalorder %s4102_s25, 63  ;;  %v4804_v11 = vld [vmem:[%s8904_s1 + $0x8] sm:$0xff]  ;;  %v359_v13 = vunpack.c.l.bf16 %v4795_v8  ;;  %v388_v14 = vunpack.c.h.bf16 %v334_v0 }
   0xe   : > { %v372_v5 = vunpack.c.l.bf16 %v326_v2  ;;  %v318_v7 = vld [vmem:[%s8904_s1 + $0x3c] sm:$0xff]  ;;  %v374_v9 = vunpack.c.l.bf16 %v4787_v6  ;;  %v4812_v15 = vld [vmem:[%s8904_s1 + $0xcc] sm:$0xff]  ;;  %v373_v16 = vunpack.c.h.bf16 %v326_v2  ;;  %v344_v18 = vunpack.c.l.bf16 %v4804_v11  ;;  %v336_v22 = vld [vmem:[%s8904_s1 + $0xc4] sm:$0xff] }
   0xf   : > { %v310_v10 = vld [vmem:[%s8904_s1] sm:$0xff]  ;;  %4588 = vmatpush.msra.mxu3 %v387_v3  ;;  %741 = vmatpush.msra.mxu2 %v389_v4  ;;  %v357_v12 = vunpack.c.l.bf16 %v318_v7  ;;  %s9844_s25 = smov (!%p250_p4, %s4102_s25), 63  ;;  %v393_v21 = vunpack.c.l.bf16 %v4812_v15  ;;  %v358_v23 = vunpack.c.h.bf16 %v318_v7  ;;  %v391_v25 = vunpack.c.l.bf16 %v336_v22  ;;  %v4868_v31 = vld [vmem:[%s8904_s1 + $0x90] sm:$0xff]  ;;  %v328_v35 = vld [vmem:[%s8904_s1 + $0x88] sm:$0xff] }
  0x10   : > { %515 = vmatpush.msra.mxu0 %v387_v3  ;;  %v342_v17 = vunpack.c.l.bf16 %v310_v10  ;;  %s4103_s12 = sshll.u32 %s9844_s25, 3  ;;  %628 = vmatpush.msra.mxu1 %v388_v14  ;;  %v343_v24 = vunpack.c.h.bf16 %v310_v10  ;;  %v392_v26 = vunpack.c.h.bf16 %v336_v22  ;;  %v378_v32 = vunpack.c.l.bf16 %v4868_v31  ;;  %v4960_v49 = vld [vmem:[%s8904_s1 + $0x54] sm:$0xff]  ;;  %v320_v53 = vld [vmem:[%s8904_s1 + $0x4c] sm:$0xff] }
  0x11   : > { %4589 = vmatpush.msra.mxu3 %v372_v5  ;;  %742 = vmatpush.msra.mxu2 %v374_v9  ;;  %s4821_s15 = scalar_lea.vmem %s8903_s0, %s4103_s12  ;;  %v376_v36 = vunpack.c.l.bf16 %v328_v35  ;;  %v377_v37 = vunpack.c.h.bf16 %v328_v35  ;;  %v390_v46 = vunpack.c.h.bf16 %v4777_v1  ;;  %v375_v48 = vunpack.c.h.bf16 %v4787_v6  ;;  %v313_v62 = vld [vmem:[%s8904_s1 + $0x18] sm:$0xff]  ;;  %v312_v1 = vld [vmem:[%s8904_s1 + $0x10] sm:$0xff]  ;;  %s7428_s28 = scalar_lea.vmem %s8907_s4, %s4103_s12 }
  0x12   : > { %516 = vmatpush.msra.mxu0 %v372_v5  ;;  %v4824_v19 = vld [vmem:[%s4821_s15 + $0xc0] sm:$0xff]  ;;  %629 = vmatpush.msra.mxu1 %v373_v16  ;;  %v4842_v27 = vld [vmem:[%s4821_s15 + $0xc8] sm:$0xff]  ;;  %v4856_v29 = vld [vmem:[%s4821_s15 + $0xd0] sm:$0xff]  ;;  %v363_v50 = vunpack.c.l.bf16 %v4960_v49  ;;  %v360_v51 = vunpack.c.h.bf16 %v4795_v8  ;;  %v345_v54 = vunpack.c.h.bf16 %v4804_v11  ;;  %v361_v55 = vunpack.c.l.bf16 %v320_v53 }
  0x13   : > { %4590 = vmatpush.msra.mxu3 %v357_v12  ;;  %743 = vmatpush.msra.mxu2 %v359_v13  ;;  %v4827_v20 = vld [vmem:[%s4821_s15] sm:$0xff]  ;;  %v4845_v28 = vld [vmem:[%s4821_s15 + $0x8] sm:$0xff]  ;;  %v4859_v30 = vld [vmem:[%s4821_s15 + $0x10] sm:$0xff]  ;;  %v362_v56 = vunpack.c.h.bf16 %v320_v53  ;;  %v348_v63 = vunpack.c.l.bf16 %v313_v62  ;;  %v346_v2 = vunpack.c.l.bf16 %v312_v1  ;;  %v347_v3 = vunpack.c.h.bf16 %v312_v1 }
  0x14   : > { %517 = vmatpush.msra.mxu0 %v357_v12  ;;  %630 = vmatpush.msra.mxu1 %v358_v23  ;;  %v4876_v33 = vld [vmem:[%s4821_s15 + $0xd8] sm:$0xff]  ;;  %v4893_v38 = vld [vmem:[%s4821_s15 + $0xe0] sm:$0xff]  ;;  %v4907_v40 = vld [vmem:[%s4821_s15 + $0xe8] sm:$0xff]  ;;  %v379_v6 = vunpack.c.h.bf16 %v4868_v31  ;;  %v364_v8 = vunpack.c.h.bf16 %v4960_v49  ;;  %v349_v12 = vunpack.c.h.bf16 %v313_v62 }
  0x15   : > { %4591 = vmatpush.msra.mxu3 %v342_v17  ;;  %744 = vmatpush.msra.mxu2 %v344_v18  ;;  %v4879_v34 = vld [vmem:[%s4821_s15 + $0x18] sm:$0xff]  ;;  %v4896_v39 = vld [vmem:[%s4821_s15 + $0x20] sm:$0xff]  ;;  %v4910_v41 = vld [vmem:[%s4821_s15 + $0x28] sm:$0xff] }
  0x16   : > { %4130 = vmatmul.msk.f32.vlgmr.msra.gmra.mxu3 %vm406_vm0, %v4824_v19  ;;  %4170 = vmatmul.msk.f32.vlgmr.msra.gmra.mxu2 %vm406_vm0, %v4827_v20  ;;  %v4921_v42 = vld [vmem:[%s4821_s15 + $0xf0] sm:$0xff]  ;;  %v4935_v44 = vld [vmem:[%s4821_s15 + $0xf8] sm:$0xff]  ;;  %v4950_v47 = vld [vmem:[%s4821_s15 + $0x40] sm:$0xff] }
  0x17   : > { %4592 = vmatpush.msrb.mxu3 %v388_v14  ;;  %1193 = vmatpush.msrb.mxu2 %v393_v21  ;;  %v4924_v43 = vld [vmem:[%s4821_s15 + $0x30] sm:$0xff]  ;;  %v4938_v45 = vld [vmem:[%s4821_s15 + $0x38] sm:$0xff]  ;;  %v4969_v52 = vld [vmem:[%s4821_s15 + $0x48] sm:$0xff] }
  0x18   : > { %518 = vmatpush.msra.mxu0 %v342_v17  ;;  %631 = vmatpush.msra.mxu1 %v343_v24  ;;  %v4984_v57 = vld [vmem:[%s4821_s15 + $0x50] sm:$0xff]  ;;  %v4995_v58 = vld [vmem:[%s4821_s15 + $0x58] sm:$0xff]  ;;  %v5006_v59 = vld [vmem:[%s4821_s15 + $0x60] sm:$0xff] }
  0x19   : > { %4106 = vmatmul.msk.f32.vlgmr.msra.gmra.mxu0 %vm406_vm0, %v4827_v20  ;;  %4593 = vmatpush.msrb.mxu3 %v373_v16  ;;  %v5017_v60 = vld [vmem:[%s4821_s15 + $0x68] sm:$0xff]  ;;  %v5028_v61 = vld [vmem:[%s4821_s15 + $0x70] sm:$0xff]  ;;  %v5042_v0 = vld [vmem:[%s4821_s15 + $0x78] sm:$0xff] }
  0x1a   : > { %967 = vmatpush.msrb.mxu0 %v391_v25  ;;  %4138 = vmatmul.msk.f32.vlgmr.msra.gmra.mxu1 %vm406_vm0, %v4827_v20  ;;  %v5057_v5 = vld [vmem:[%s4821_s15 + $0x80] sm:$0xff]  ;;  %v338_v49 = vld [vmem:[%s8904_s1 + $0xd4] sm:$0xff] }
  0x1b   : > { %4594 = vmatpush.msrb.mxu3 %v358_v23  ;;  %1080 = vmatpush.msrb.mxu1 %v392_v26  ;;  %v5135_v31 = vld [vmem:[%s4821_s15 + $0xa0] sm:$0xff]  ;;  %v396_v53 = vunpack.c.h.bf16 %v338_v49 }
  0x1c   : > { %1194 = vmatpush.msrb.mxu2 %v378_v32  ;;  %968 = vmatpush.msrb.mxu0 %v376_v36 }
  0x1d   : > { %4595 = vmatpush.msrb.mxu3 %v343_v24  ;;  %1081 = vmatpush.msrb.mxu1 %v377_v37  ;;  %v5116_v24 = vld [vmem:[%s4821_s15 + $0x98] sm:$0xff] }
  0x1e   : > { %4131 = vmatmul.msk.f32.gmra.mxu3 %vm406_vm0, %v4842_v27  ;;  %4171 = vmatmul.msk.f32.gmra.mxu2 %vm406_vm0, %v4845_v28 }
  0x1f   : > { %4596 = vmatpush.msra.mxu3 %v389_v4  ;;  %1195 = vmatpush.msrb.mxu2 %v363_v50  ;;  %v394_v4 = vunpack.c.h.bf16 %v4812_v15 }
  0x20   : > { %969 = vmatpush.msrb.mxu0 %v361_v55  ;;  %1082 = vmatpush.msrb.mxu1 %v362_v56 }
  0x21   : > { %4107 = vmatmul.msk.f32.gmra.mxu0 %vm406_vm0, %v4845_v28  ;;  %4597 = vmatpush.msra.mxu3 %v374_v9 }
  0x22   : > { %4139 = vmatmul.msk.f32.gmra.mxu1 %vm406_vm0, %v4845_v28  ;;  %1196 = vmatpush.msrb.mxu2 %v348_v63 }
  0x23   : > { %4598 = vmatpush.msra.mxu3 %v359_v13  ;;  %970 = vmatpush.msrb.mxu0 %v346_v2  ;;  %v5078_v13 = vld [vmem:[%s4821_s15 + $0x88] sm:$0xff]  ;;  %v5198_v2 = vld [vmem:[%s4821_s15 + $0xb8] sm:$0xff] }
  0x24   : > { %1083 = vmatpush.msrb.mxu1 %v347_v3  ;;  %9163 = vst [vmem:[#allocation2_spill] sm:$0xff] %v5198_v2 }
  0x25   : > { %4599 = vmatpush.msra.mxu3 %v344_v18  ;;  %v5097_v18 = vld [vmem:[%s4821_s15 + $0x90] sm:$0xff] }
  0x26   : > { %4132 = vmatmul.msk.f32.gmra.mxu3 %vm406_vm0, %v4856_v29  ;;  %4172 = vmatmul.msk.f32.gmra.mxu2 %vm406_vm0, %v4859_v30 }
  0x27   : > { %1532 = vmatpush.msra.mxu1 %v396_v53 }
  0x29   : > { %4108 = vmatmul.msk.f32.gmra.mxu0 %vm406_vm0, %v4859_v30 }
  0x2a   : > { %4140 = vmatmul.msk.f32.gmra.mxu1 %vm406_vm0, %v4859_v30 }
  0x2e   : > { %4133 = vmatmul.msk.f32.gmra.mxu3 %vm406_vm0, %v4876_v33  ;;  %4173 = vmatmul.msk.f32.gmra.mxu2 %vm406_vm0, %v4879_v34 }
  0x31   : > { %4109 = vmatmul.msk.f32.gmra.mxu0 %vm406_vm0, %v4879_v34 }
  0x32   : > { %4141 = vmatmul.msk.f32.gmra.mxu1 %vm406_vm0, %v4879_v34 }
  0x36   : > { %4134 = vmatmul.msk.f32.gmra.mxu3 %vm406_vm0, %v4893_v38  ;;  %4174 = vmatmul.msk.f32.gmra.mxu2 %vm406_vm0, %v4896_v39 }
  0x39   : > { %4110 = vmatmul.msk.f32.gmra.mxu0 %vm406_vm0, %v4896_v39 }
  0x3a   : > { %4142 = vmatmul.msk.f32.gmra.mxu1 %vm406_vm0, %v4896_v39 }
  0x3e   : > { %4135 = vmatmul.msk.f32.gmra.mxu3 %vm406_vm0, %v4907_v40  ;;  %4175 = vmatmul.msk.f32.gmra.mxu2 %vm406_vm0, %v4910_v41 }
  0x41   : > { %4111 = vmatmul.msk.f32.gmra.mxu0 %vm406_vm0, %v4910_v41 }
  0x42   : > { %4143 = vmatmul.msk.f32.gmra.mxu1 %vm406_vm0, %v4910_v41 }
  0x46   : > { %4136 = vmatmul.msk.f32.gmra.mxu3 %vm406_vm0, %v4921_v42  ;;  %4176 = vmatmul.msk.f32.gmra.mxu2 %vm406_vm0, %v4924_v43 }
  0x49   : > { %4112 = vmatmul.msk.f32.gmra.mxu0 %vm406_vm0, %v4924_v43 }
  0x4a   : > { %4144 = vmatmul.msk.f32.gmra.mxu1 %vm406_vm0, %v4924_v43 }
  0x4e   : > { %4137 = vmatmul.msk.f32.gmra.mxu3 %vm406_vm0, %v4935_v44  ;;  %4177 = vmatmul.msk.f32.gmra.mxu2 %vm406_vm0, %v4938_v45 }
  0x51   : > { %4113 = vmatmul.msk.f32.gmra.mxu0 %vm406_vm0, %v4938_v45 }
  0x52   : > { %4145 = vmatmul.msk.f32.gmra.mxu1 %vm406_vm0, %v4938_v45 }
  0x56   : > { %4162 = vmatmul.msk.f32.vlgmr.msrb.gmra.mxu3 %vm406_vm0, %v4824_v19  ;;  %4178 = vmatmul.msk.f32.gmra.mxu2 %vm406_vm0, %v4950_v47 }
  0x57   : > { %854 = vmatpush.msrb.mxu3 %v390_v46 }
  0x59   : > { %4114 = vmatmul.msk.f32.gmra.mxu0 %vm406_vm0, %v4950_v47  ;;  %855 = vmatpush.msrb.mxu3 %v375_v48 }
  0x5a   : > { %4146 = vmatmul.msk.f32.gmra.mxu1 %vm406_vm0, %v4950_v47 }
  0x5b   : > { %856 = vmatpush.msrb.mxu3 %v360_v51  ;;  %v395_v51 = vunpack.c.l.bf16 %v338_v49 }
  0x5d   : > { %857 = vmatpush.msrb.mxu3 %v345_v54  ;;  %1419 = vmatpush.msra.mxu0 %v395_v51 }
  0x5e   : > { %4163 = vmatmul.msk.f32.gmra.mxu3 %vm406_vm0, %v4842_v27  ;;  %4179 = vmatmul.msk.f32.gmra.mxu2 %vm406_vm0, %v4969_v52 }
  0x61   : > { %4115 = vmatmul.msk.f32.gmra.mxu0 %vm406_vm0, %v4969_v52 }
  0x62   : > { %4147 = vmatmul.msk.f32.gmra.mxu1 %vm406_vm0, %v4969_v52 }
  0x66   : > { %4164 = vmatmul.msk.f32.gmra.mxu3 %vm406_vm0, %v4856_v29  ;;  %4180 = vmatmul.msk.f32.gmra.mxu2 %vm406_vm0, %v4984_v57 }
  0x69   : > { %4116 = vmatmul.msk.f32.gmra.mxu0 %vm406_vm0, %v4984_v57 }
  0x6a   : > { %4148 = vmatmul.msk.f32.gmra.mxu1 %vm406_vm0, %v4984_v57 }
  0x6e   : > { %4165 = vmatmul.msk.f32.gmra.mxu3 %vm406_vm0, %v4876_v33  ;;  %4181 = vmatmul.msk.f32.gmra.mxu2 %vm406_vm0, %v4995_v58 }
  0x71   : > { %4117 = vmatmul.msk.f32.gmra.mxu0 %vm406_vm0, %v4995_v58 }
  0x72   : > { %4149 = vmatmul.msk.f32.gmra.mxu1 %vm406_vm0, %v4995_v58 }
  0x76   : > { %4166 = vmatmul.msk.f32.gmra.mxu3 %vm406_vm0, %v4893_v38  ;;  %4182 = vmatmul.msk.f32.gmra.mxu2 %vm406_vm0, %v5006_v59 }
  0x79   : > { %4118 = vmatmul.msk.f32.gmra.mxu0 %vm406_vm0, %v5006_v59 }
  0x7a   : > { %4150 = vmatmul.msk.f32.gmra.mxu1 %vm406_vm0, %v5006_v59 }
  0x7e   : > { %4167 = vmatmul.msk.f32.gmra.mxu3 %vm406_vm0, %v4907_v40  ;;  %4183 = vmatmul.msk.f32.gmra.mxu2 %vm406_vm0, %v5017_v60 }
  0x81   : > { %4119 = vmatmul.msk.f32.gmra.mxu0 %vm406_vm0, %v5017_v60 }
  0x82   : > { %4151 = vmatmul.msk.f32.gmra.mxu1 %vm406_vm0, %v5017_v60 }
  0x86   : > { %4168 = vmatmul.msk.f32.gmra.mxu3 %vm406_vm0, %v4921_v42  ;;  %4184 = vmatmul.msk.f32.gmra.mxu2 %vm406_vm0, %v5028_v61 }
  0x89   : > { %4120 = vmatmul.msk.f32.gmra.mxu0 %vm406_vm0, %v5028_v61 }
  0x8a   : > { %4152 = vmatmul.msk.f32.gmra.mxu1 %vm406_vm0, %v5028_v61 }
  0x8e   : > { %4169 = vmatmul.msk.f32.gmra.mxu3 %vm406_vm0, %v4935_v44  ;;  %4185 = vmatmul.msk.f32.gmra.mxu2 %vm406_vm0, %v5042_v0 }
  0x91   : > { %4121 = vmatmul.msk.f32.gmra.mxu0 %vm406_vm0, %v5042_v0 }
  0x92   : > { %4153 = vmatmul.msk.f32.gmra.mxu1 %vm406_vm0, %v5042_v0 }
  0x96   : > { %4186 = vmatmul.msk.f32.gmra.mxu2 %vm406_vm0, %v5057_v5  ;;  %4194 = vmatmul.msk.f32.vlgmr.msra.gmra.mxu3 %vm406_vm0, %v4824_v19  ;;  %v5064_v7 = vpop.f32.mrf.mxu0 }
  0x97   : > { %1306 = vmatpush.msra.mxu3 %v394_v4  ;;  %v5067_v9 = vpop.f32.mrf.mxu1 }
  0x99   : > { %v5069_v10 = vpop.f32.mrf.mxu3  ;;  %v5071_v11 = vpop.f32.mrf.mxu2  ;;  %4122 = vmatmul.msk.f32.gmra.mxu0 %vm406_vm0, %v5057_v5  ;;  %1307 = vmatpush.msra.mxu3 %v379_v6 }
  0x9a   : > { %4154 = vmatmul.msk.f32.gmra.mxu1 %vm406_vm0, %v5057_v5 }
  0x9b   : > { %1308 = vmatpush.msra.mxu3 %v364_v8 }
  0x9d   : > { %1309 = vmatpush.msra.mxu3 %v349_v12 }
  0x9e   : > { %4187 = vmatmul.msk.f32.gmra.mxu2 %vm406_vm0, %v5078_v13  ;;  %4195 = vmatmul.msk.f32.gmra.mxu3 %vm406_vm0, %v4842_v27  ;;  %v5084_v14 = vpop.f32.mrf.mxu0 }
  0x9f   : > { %v5086_v15 = vpop.f32.mrf.mxu1 }
  0xa1   : > { %v5088_v16 = vpop.f32.mrf.mxu3  ;;  %v5090_v17 = vpop.f32.mrf.mxu2  ;;  %4123 = vmatmul.msk.f32.gmra.mxu0 %vm406_vm0, %v5078_v13 }
  0xa2   : > { %4155 = vmatmul.msk.f32.gmra.mxu1 %vm406_vm0, %v5078_v13 }
  0xa6   : > { %4188 = vmatmul.msk.f32.gmra.mxu2 %vm406_vm0, %v5097_v18  ;;  %4196 = vmatmul.msk.f32.gmra.mxu3 %vm406_vm0, %v4856_v29  ;;  %v5103_v19 = vpop.f32.mrf.mxu0 }
  0xa7   : > { %v5105_v21 = vpop.f32.mrf.mxu1 }
  0xa9   : > { %v5107_v22 = vpop.f32.mrf.mxu3  ;;  %v5109_v23 = vpop.f32.mrf.mxu2  ;;  %4124 = vmatmul.msk.f32.gmra.mxu0 %vm406_vm0, %v5097_v18 }
  0xaa   : > { %4156 = vmatmul.msk.f32.gmra.mxu1 %vm406_vm0, %v5097_v18 }
  0xae   : > { %4189 = vmatmul.msk.f32.gmra.mxu2 %vm406_vm0, %v5116_v24  ;;  %4197 = vmatmul.msk.f32.gmra.mxu3 %vm406_vm0, %v4876_v33  ;;  %v5122_v25 = vpop.f32.mrf.mxu0  ;;  %v339_v33 = vld [vmem:[%s8904_s1 + $0xdc] sm:$0xff] }
  0xaf   : > { %v5124_v26 = vpop.f32.mrf.mxu1  ;;  %v397_v36 = vunpack.c.l.bf16 %v339_v33 }
  0xb1   : > { %v5126_v27 = vpop.f32.mrf.mxu3  ;;  %v5128_v29 = vpop.f32.mrf.mxu2  ;;  %4125 = vmatmul.msk.f32.gmra.mxu0 %vm406_vm0, %v5116_v24  ;;  %1645 = vmatpush.msra.mxu2 %v397_v36 }
  0xb2   : > { %4157 = vmatmul.msk.f32.gmra.mxu1 %vm406_vm0, %v5116_v24 }
  0xb6   : > { %4190 = vmatmul.msk.f32.gmra.mxu2 %vm406_vm0, %v5135_v31  ;;  %4198 = vmatmul.msk.f32.gmra.mxu3 %vm406_vm0, %v4893_v38  ;;  %v5141_v32 = vpop.f32.mrf.mxu0  ;;  %v5157_v38 = vld [vmem:[%s4821_s15 + $0xa8] sm:$0xff] }
  0xb7   : > { %v5146_v35 = vpop.f32.mrf.mxu1 }
  0xb9   : > { %v5148_v37 = vpop.f32.mrf.mxu3  ;;  %v5150_v46 = vpop.f32.mrf.mxu2  ;;  %4126 = vmatmul.msk.f32.gmra.mxu0 %vm406_vm0, %v5135_v31 }
  0xba   : > { %4158 = vmatmul.msk.f32.gmra.mxu1 %vm406_vm0, %v5135_v31 }
  0xbe   : > { %4191 = vmatmul.msk.f32.gmra.mxu2 %vm406_vm0, %v5157_v38  ;;  %4199 = vmatmul.msk.f32.gmra.mxu3 %vm406_vm0, %v4907_v40  ;;  %v5163_v48 = vpop.f32.mrf.mxu0  ;;  %v5179_v40 = vld [vmem:[%s4821_s15 + $0xb0] sm:$0xff] }
  0xbf   : > { %v5168_v50 = vpop.f32.mrf.mxu1 }
  0xc1   : > { %v5170_v54 = vpop.f32.mrf.mxu3  ;;  %v5172_v55 = vpop.f32.mrf.mxu2  ;;  %4127 = vmatmul.msk.f32.gmra.mxu0 %vm406_vm0, %v5157_v38 }
  0xc2   : > { %4159 = vmatmul.msk.f32.gmra.mxu1 %vm406_vm0, %v5157_v38 }
  0xc6   : > { %4192 = vmatmul.msk.f32.gmra.mxu2 %vm406_vm0, %v5179_v40  ;;  %4200 = vmatmul.msk.f32.gmra.mxu3 %vm406_vm0, %v4921_v42  ;;  %v5185_v56 = vpop.f32.mrf.mxu0 }
  0xc7   : > { %v5187_v62 = vpop.f32.mrf.mxu1 }
  0xc9   : > { %v5189_v63 = vpop.f32.mrf.mxu3  ;;  %v5191_v1 = vpop.f32.mrf.mxu2  ;;  %4128 = vmatmul.msk.f32.gmra.mxu0 %vm406_vm0, %v5179_v40 }
  0xca   : > { %4160 = vmatmul.msk.f32.gmra.mxu1 %vm406_vm0, %v5179_v40 }
  0xce   : > { %4193 = vmatmul.msk.f32.gmra.mxu2 %vm406_vm0, %v5198_v2  ;;  %4201 = vmatmul.msk.f32.gmra.mxu3 %vm406_vm0, %v4935_v44  ;;  %v5204_v42 = vpop.f32.mrf.mxu0 }
  0xcf   : > { %v5206_v3 = vpop.f32.mrf.mxu1 }
  0xd0   : > { %9164 = vst [vmem:[#allocation3_spill] sm:$0xff] %v5206_v3 }
  0xd1   : > { %v5208_v4 = vpop.f32.mrf.mxu3  ;;  %v5210_v6 = vpop.f32.mrf.mxu2  ;;  %4129 = vmatmul.msk.f32.gmra.mxu0 %vm406_vm0, %v5198_v2 }
  0xd2   : > { %9165 = vst [vmem:[#allocation4_spill] sm:$0xff] %v5210_v6  ;;  %4161 = vmatmul.msk.f32.gmra.mxu1 %vm406_vm0, %v5198_v2 }
  0xd6   : > { %4202 = vmatmul.msk.f32.vlgmr.msrb.gmra.mxu3 %vm406_vm0, %v4827_v20  ;;  %4298 = vmatmul.msk.f32.vlgmr.msrb.gmra.mxu2 %vm406_vm0, %v4827_v20  ;;  %v5220_v44 = vpop.f32.mrf.mxu0 }
  0xd7   : > { %9166 = vst [vmem:[#allocation5_spill] sm:$0xff] %v5220_v44  ;;  %v5222_v8 = vpop.f32.mrf.mxu1 }
  0xd8   : > { %9167 = vst [vmem:[#allocation6_spill] sm:$0xff] %v5222_v8 }
  0xd9   : > { %v5224_v12 = vpop.f32.mrf.mxu3  ;;  %v5226_v33 = vpop.f32.mrf.mxu2  ;;  %4234 = vmatmul.msk.f32.vlgmr.msrb.gmra.mxu0 %vm406_vm0, %v4827_v20 }
  0xda   : > { %9168 = vst [vmem:[#allocation7_spill] sm:$0xff] %v5226_v33  ;;  %4266 = vmatmul.msk.f32.vlgmr.msrb.gmra.mxu1 %vm406_vm0, %v4827_v20 }
  0xde   : > { %4203 = vmatmul.msk.f32.gmra.mxu3 %vm406_vm0, %v4845_v28  ;;  %4299 = vmatmul.msk.f32.gmra.mxu2 %vm406_vm0, %v4845_v28  ;;  %v5236_v36 = vpop.f32.mrf.mxu0 }
  0xdf   : > { %9169 = vst [vmem:[#allocation8_spill] sm:$0xff] %v5236_v36  ;;  %v5238_v49 = vpop.f32.mrf.mxu1 }
  0xe0   : > { %9170 = vst [vmem:[#allocation9_spill] sm:$0xff] %v5238_v49 }
  0xe1   : > { %v5240_v51 = vpop.f32.mrf.mxu3  ;;  %v5242_v53 = vpop.f32.mrf.mxu2  ;;  %4235 = vmatmul.msk.f32.gmra.mxu0 %vm406_vm0, %v4845_v28 }
  0xe2   : > { %9171 = vst [vmem:[#allocation10_spill] sm:$0xff] %v5242_v53  ;;  %4267 = vmatmul.msk.f32.gmra.mxu1 %vm406_vm0, %v4845_v28 }
  0xe6   : > { %4204 = vmatmul.msk.f32.gmra.mxu3 %vm406_vm0, %v4859_v30  ;;  %4300 = vmatmul.msk.f32.gmra.mxu2 %vm406_vm0, %v4859_v30  ;;  %v5252_v20 = vpop.f32.mrf.mxu0 }
  0xe7   : > { %9172 = vst [vmem:[#allocation11_spill] sm:$0xff] %v5252_v20  ;;  %v5254_v36 = vpop.f32.mrf.mxu1 }
  0xe8   : > { %9173 = vst [vmem:[#allocation12_spill] sm:$0xff] %v5254_v36 }
  0xe9   : > { %v5256_v49 = vpop.f32.mrf.mxu3  ;;  %v5258_v33 = vpop.f32.mrf.mxu2  ;;  %4236 = vmatmul.msk.f32.gmra.mxu0 %vm406_vm0, %v4859_v30 }
  0xea   : > { %9174 = vst [vmem:[#allocation13_spill] sm:$0xff] %v5258_v33  ;;  %4268 = vmatmul.msk.f32.gmra.mxu1 %vm406_vm0, %v4859_v30 }
  0xee   : > { %4205 = vmatmul.msk.f32.gmra.mxu3 %vm406_vm0, %v4879_v34  ;;  %4301 = vmatmul.msk.f32.gmra.mxu2 %vm406_vm0, %v4879_v34  ;;  %v5268_v28 = vpop.f32.mrf.mxu0 }
  0xef   : > { %9175 = vst [vmem:[#allocation14_spill] sm:$0xff] %v5268_v28  ;;  %v5270_v20 = vpop.f32.mrf.mxu1 }
  0xf0   : > { %9176 = vst [vmem:[#allocation15_spill] sm:$0xff] %v5270_v20  ;;  %v331_v20 = vld [vmem:[%s8904_s1 + $0xa0] sm:$0xff] }
  0xf1   : > { %v5272_v36 = vpop.f32.mrf.mxu3  ;;  %v5274_v53 = vpop.f32.mrf.mxu2  ;;  %4237 = vmatmul.msk.f32.gmra.mxu0 %vm406_vm0, %v4879_v34 }
  0xf2   : > { %9177 = vst [vmem:[#allocation16_spill] sm:$0xff] %v5274_v53  ;;  %4269 = vmatmul.msk.f32.gmra.mxu1 %vm406_vm0, %v4879_v34  ;;  %v382_v53 = vunpack.c.l.bf16 %v331_v20  ;;  %v330_v20 = vld [vmem:[%s8904_s1 + $0x98] sm:$0xff] }
  0xf4   : > { %1646 = vmatpush.msra.mxu2 %v382_v53 }
  0xf6   : > { %4206 = vmatmul.msk.f32.gmra.mxu3 %vm406_vm0, %v4896_v39  ;;  %4302 = vmatmul.msk.f32.gmra.mxu2 %vm406_vm0, %v4896_v39  ;;  %v5284_v30 = vpop.f32.mrf.mxu0 }
  0xf7   : > { %9178 = vst [vmem:[#allocation17_spill] sm:$0xff] %v5284_v30  ;;  %v5289_v28 = vpop.f32.mrf.mxu1  ;;  %v381_v30 = vunpack.c.h.bf16 %v330_v20 }
  0xf8   : > { %9179 = vst [vmem:[#allocation18_spill] sm:$0xff] %v5289_v28  ;;  %v380_v28 = vunpack.c.l.bf16 %v330_v20 }
  0xf9   : > { %v5291_v33 = vpop.f32.mrf.mxu3  ;;  %v5293_v8 = vpop.f32.mrf.mxu2  ;;  %4238 = vmatmul.msk.f32.gmra.mxu0 %vm406_vm0, %v4896_v39  ;;  %1533 = vmatpush.msra.mxu1 %v381_v30 }
  0xfa   : > { %9180 = vst [vmem:[#allocation19_spill] sm:$0xff] %v5293_v8  ;;  %4270 = vmatmul.msk.f32.gmra.mxu1 %vm406_vm0, %v4896_v39  ;;  %1420 = vmatpush.msra.mxu0 %v380_v28  ;;  %v5343_v28 = vld [vmem:[%s8905_s2] sm:$0xff] }
  0xfe   : > { %4207 = vmatmul.msk.f32.gmra.mxu3 %vm406_vm0, %v4910_v41  ;;  %4303 = vmatmul.msk.f32.gmra.mxu2 %vm406_vm0, %v4910_v41  ;;  %v5303_v34 = vpop.f32.mrf.mxu0 }
  0xff   : > { %9181 = vst [vmem:[#allocation20_spill] sm:$0xff] %v5303_v34  ;;  %v5308_v8 = vpop.f32.mrf.mxu1 }
 0x100   : > { %9182 = vst [vmem:[#allocation21_spill] sm:$0xff] %v5308_v8 }
 0x101   : > { %v5310_v53 = vpop.f32.mrf.mxu3  ;;  %v5312_v44 = vpop.f32.mrf.mxu2  ;;  %4239 = vmatmul.msk.f32.gmra.mxu0 %vm406_vm0, %v4910_v41 }
 0x102   : > { %9183 = vst [vmem:[#allocation22_spill] sm:$0xff] %v5312_v44  ;;  %4271 = vmatmul.msk.f32.gmra.mxu1 %vm406_vm0, %v4910_v41 }
 0x106   : > { %4208 = vmatmul.msk.f32.gmra.mxu3 %vm406_vm0, %v4924_v43  ;;  %4304 = vmatmul.msk.f32.gmra.mxu2 %vm406_vm0, %v4924_v43  ;;  %v5322_v39 = vpop.f32.mrf.mxu0 }
 0x107   : > { %9184 = vst [vmem:[#allocation23_spill] sm:$0xff] %v5322_v39  ;;  %v5324_v20 = vpop.f32.mrf.mxu1  ;;  %v5372_v39 = vperm.slane %v5343_v28, 2 }
 0x108   : > { %9185 = vst [vmem:[#allocation24_spill] sm:$0xff] %v5324_v20 }
 0x109   : > { %v5326_v8 = vpop.f32.mrf.mxu3  ;;  %v5328_v44 = vpop.f32.mrf.mxu2  ;;  %4240 = vmatmul.msk.f32.gmra.mxu0 %vm406_vm0, %v4924_v43 }
 0x10a   : > { %9186 = vst [vmem:[#allocation25_spill] sm:$0xff] %v5328_v44  ;;  %4272 = vmatmul.msk.f32.gmra.mxu1 %vm406_vm0, %v4924_v43  ;;  %v5354_v43 = vperm.slane %v5343_v28, 0 }
 0x10e   : > { %4209 = vmatmul.msk.f32.gmra.mxu3 %vm406_vm0, %v4938_v45  ;;  %4305 = vmatmul.msk.f32.gmra.mxu2 %vm406_vm0, %v4938_v45  ;;  %v5338_v41 = vpop.f32.mrf.mxu0 }
 0x10f   : > { %9187 = vst [vmem:[#allocation26_spill] sm:$0xff] %v5338_v41  ;;  %v5345_v30 = vpop.f32.mrf.mxu1  ;;  %v5369_v41 = vperm.slane %v5343_v28, 1 }
 0x110   : > { %9188 = vst [vmem:[#allocation27_spill] sm:$0xff] %v5345_v30 }
 0x111   : > { %v5347_v44 = vpop.f32.mrf.mxu3  ;;  %v5349_v20 = vpop.f32.mrf.mxu2  ;;  %4241 = vmatmul.msk.f32.gmra.mxu0 %vm406_vm0, %v4938_v45 }
 0x112   : > { %9189 = vst [vmem:[#allocation28_spill] sm:$0xff] %v5349_v20  ;;  %4273 = vmatmul.msk.f32.gmra.mxu1 %vm406_vm0, %v4938_v45  ;;  %v5366_v20 = vsub.f32 %v5069_v10, %v5354_v43 }
 0x114   : > { %9191 = vst [vmem:[#allocation30_spill] sm:$0xff] %v5366_v20  ;;  %vm9040_vm1 = vcmp.gt.f32.partialorder %v5366_v20, 0.0 }
 0x116   : > { %4210 = vmatmul.msk.f32.gmra.mxu3 %vm406_vm0, %v4950_v47  ;;  %4306 = vmatmul.msk.f32.gmra.mxu2 %vm406_vm0, %v4950_v47  ;;  %v5362_v30 = vpop.f32.mrf.mxu0 }
 0x117   : > { %9190 = vst [vmem:[#allocation29_spill] sm:$0xff] %v5362_v30  ;;  %v5374_v34 = vpop.f32.mrf.mxu1  ;;  %v2591_v30 = vsub.f32 %v5224_v12, %v5369_v41  ;;  %v5400_v12 = vsub.f32 %v5088_v16, %v5354_v43 }
 0x118   : > { %9192 = vst [vmem:[#allocation31_spill] sm:$0xff] %v5374_v34 }
 0x119   : > { %v5376_v45 = vpop.f32.mrf.mxu2  ;;  %v818_v2 = vpop.f32.mrf.mxu3  ;;  %4242 = vmatmul.msk.f32.gmra.mxu0 %vm406_vm0, %v4950_v47  ;;  %9195 = vst [vmem:[#allocation34_spill] sm:$0xff] %v5400_v12  ;;  %vm9045_vm2 = vcmp.gt.f32.partialorder %v5400_v12, 0.0 }
 0x11a   : > { %9193 = vst [vmem:[#allocation32_spill] sm:$0xff] %v5376_v45  ;;  %v2592_v10 = vsub.f32 %v818_v2, %v5372_v39  ;;  %4274 = vmatmul.msk.f32.gmra.mxu1 %vm406_vm0, %v4950_v47  ;;  %v2734_v45 = vand.u32 2147483647, %v5366_v20 }
 0x11c   : > { %v5388_v6 = vsel %vm9040_vm1, %v2592_v10, %v2591_v30 }
 0x11d   : > { %9194 = vst [vmem:[#allocation33_spill] sm:$0xff] %v5388_v6  ;;  %v2830_v34 = vand.u32 2147483647, %v5388_v6  ;;  %v2606_v6 = vsub.f32 %v5240_v51, %v5369_v41 }
 0x11e   : > { %4211 = vmatmul.msk.f32.gmra.mxu3 %vm406_vm0, %v4969_v52  ;;  %4307 = vmatmul.msk.f32.gmra.mxu2 %vm406_vm0, %v4969_v52  ;;  %v5396_v2 = vpop.f32.mrf.mxu0 }
 0x11f   : > { %v5402_v47 = vmin.f32 %v2734_v45, %v2830_v34  ;;  %v5404_v30 = vpop.f32.mrf.mxu1  ;;  %v2735_v34 = vand.u32 2147483647, %v5400_v12 }
 0x121   : > { %9196 = vst [vmem:[#allocation35_spill] sm:$0xff] %v5402_v47  ;;  %v5406_v10 = vpop.f32.mrf.mxu2  ;;  %v821_v20 = vpop.f32.mrf.mxu3  ;;  %4243 = vmatmul.msk.f32.gmra.mxu0 %vm406_vm0, %v4969_v52 }
 0x122   : > { %v2607_v3 = vsub.f32 %v821_v20, %v5372_v39  ;;  %4275 = vmatmul.msk.f32.gmra.mxu1 %vm406_vm0, %v4969_v52  ;;  %v5430_v20 = vsub.f32 %v5107_v22, %v5354_v43 }
 0x124   : > { %v5418_v16 = vsel %vm9045_vm2, %v2607_v3, %v2606_v6  ;;  %9198 = vst [vmem:[#allocation37_spill] sm:$0xff] %v5430_v20  ;;  %vm9050_vm3 = vcmp.gt.f32.partialorder %v5430_v20, 0.0 }
 0x125   : > { %9197 = vst [vmem:[#allocation36_spill] sm:$0xff] %v5418_v16  ;;  %v2831_v45 = vand.u32 2147483647, %v5418_v16  ;;  %v2621_v16 = vsub.f32 %v5256_v49, %v5369_v41 }
 0x126   : > { %4212 = vmatmul.msk.f32.gmra.mxu3 %vm406_vm0, %v4984_v57  ;;  %4308 = vmatmul.msk.f32.gmra.mxu2 %vm406_vm0, %v4984_v57  ;;  %v5426_v51 = vpop.f32.mrf.mxu0 }
 0x127   : > { %v5432_v52 = vmin.f32 %v2735_v34, %v2831_v45  ;;  %v5434_v3 = vpop.f32.mrf.mxu1  ;;  %v2736_v34 = vand.u32 2147483647, %v5430_v20 }
 0x129   : > { %9199 = vst [vmem:[#allocation38_spill] sm:$0xff] %v5432_v52  ;;  %v5436_v6 = vpop.f32.mrf.mxu2  ;;  %v824_v12 = vpop.f32.mrf.mxu3  ;;  %4244 = vmatmul.msk.f32.gmra.mxu0 %vm406_vm0, %v4984_v57 }
 0x12a   : > { %v2622_v47 = vsub.f32 %v824_v12, %v5372_v39  ;;  %4276 = vmatmul.msk.f32.gmra.mxu1 %vm406_vm0, %v4984_v57  ;;  %v5460_v12 = vsub.f32 %v5126_v27, %v5354_v43 }
 0x12c   : > { %v5448_v22 = vsel %vm9050_vm3, %v2622_v47, %v2621_v16  ;;  %9201 = vst [vmem:[#allocation40_spill] sm:$0xff] %v5460_v12  ;;  %vm9054_vm4 = vcmp.gt.f32.partialorder %v5460_v12, 0.0 }
 0x12d   : > { %9200 = vst [vmem:[#allocation39_spill] sm:$0xff] %v5448_v22  ;;  %v2832_v45 = vand.u32 2147483647, %v5448_v22  ;;  %v2636_v22 = vsub.f32 %v5272_v36, %v5369_v41 }
 0x12e   : > { %4213 = vmatmul.msk.f32.gmra.mxu3 %vm406_vm0, %v4995_v58  ;;  %4309 = vmatmul.msk.f32.gmra.mxu2 %vm406_vm0, %v4995_v58  ;;  %v5456_v49 = vpop.f32.mrf.mxu0 }
 0x12f   : > { %v5462_v57 = vmin.f32 %v2736_v34, %v2832_v45  ;;  %v5464_v47 = vpop.f32.mrf.mxu1  ;;  %v2737_v34 = vand.u32 2147483647, %v5460_v12 }
 0x131   : > { %9202 = vst [vmem:[#allocation41_spill] sm:$0xff] %v5462_v57  ;;  %v5466_v16 = vpop.f32.mrf.mxu2  ;;  %v827_v20 = vpop.f32.mrf.mxu3  ;;  %4245 = vmatmul.msk.f32.gmra.mxu0 %vm406_vm0, %v4995_v58 }
 0x132   : > { %v2637_v52 = vsub.f32 %v827_v20, %v5372_v39  ;;  %4277 = vmatmul.msk.f32.gmra.mxu1 %vm406_vm0, %v4995_v58  ;;  %v5490_v20 = vsub.f32 %v5148_v37, %v5354_v43 }
 0x134   : > { %v5478_v27 = vsel %vm9054_vm4, %v2637_v52, %v2636_v22  ;;  %9205 = vst [vmem:[#allocation44_spill] sm:$0xff] %v5490_v20  ;;  %v323_v52 = vld [vmem:[%s8904_s1 + $0x64] sm:$0xff]  ;;  %vm9061_vm5 = vcmp.gt.f32.partialorder %v5490_v20, 0.0 }
 0x135   : > { %9203 = vst [vmem:[#allocation42_spill] sm:$0xff] %v5478_v27  ;;  %v2833_v45 = vand.u32 2147483647, %v5478_v27  ;;  %v367_v12 = vunpack.c.l.bf16 %v323_v52 }
 0x136   : > { %4214 = vmatmul.msk.f32.gmra.mxu3 %vm406_vm0, %v5006_v59  ;;  %4310 = vmatmul.msk.f32.gmra.mxu2 %vm406_vm0, %v5006_v59  ;;  %v5486_v36 = vpop.f32.mrf.mxu0 }
 0x137   : > { %9204 = vst [vmem:[#allocation43_spill] sm:$0xff] %v5486_v36  ;;  %v5492_v58 = vmin.f32 %v2737_v34, %v2833_v45  ;;  %v5497_v22 = vpop.f32.mrf.mxu1  ;;  %v2651_v36 = vsub.f32 %v5291_v33, %v5369_v41  ;;  %1647 = vmatpush.msra.mxu2 %v367_v12  ;;  %v2738_v45 = vand.u32 2147483647, %v5490_v20  ;;  %v5523_v12 = vsub.f32 %v5170_v54, %v5354_v43 }
 0x139   : > { %9206 = vst [vmem:[#allocation45_spill] sm:$0xff] %v5492_v58  ;;  %v5499_v27 = vpop.f32.mrf.mxu2  ;;  %v830_v57 = vpop.f32.mrf.mxu3  ;;  %4246 = vmatmul.msk.f32.gmra.mxu0 %vm406_vm0, %v5006_v59  ;;  %v2666_v58 = vsub.f32 %v5310_v53, %v5369_v41  ;;  %vm9062_vm6 = vcmp.gt.f32.partialorder %v5523_v12, 0.0 }
 0x13a   : > { %v2652_v37 = vsub.f32 %v830_v57, %v5372_v39  ;;  %4278 = vmatmul.msk.f32.gmra.mxu1 %vm406_vm0, %v5006_v59  ;;  %9208 = vst [vmem:[#allocation47_spill] sm:$0xff] %v5523_v12 }
 0x13c   : > { %v5511_v34 = vsel %vm9061_vm5, %v2652_v37, %v2651_v36  ;;  %v322_v36 = vld [vmem:[%s8904_s1 + $0x5c] sm:$0xff] }
 0x13d   : > { %9207 = vst [vmem:[#allocation46_spill] sm:$0xff] %v5511_v34  ;;  %v2834_v52 = vand.u32 2147483647, %v5511_v34  ;;  %v365_v34 = vunpack.c.l.bf16 %v322_v36 }
 0x13e   : > { %4215 = vmatmul.msk.f32.gmra.mxu3 %vm406_vm0, %v5017_v60  ;;  %4311 = vmatmul.msk.f32.gmra.mxu2 %vm406_vm0, %v5017_v60  ;;  %v5519_v33 = vpop.f32.mrf.mxu0 }
 0x13f   : > { %v5525_v59 = vmin.f32 %v2738_v45, %v2834_v52  ;;  %v5527_v57 = vpop.f32.mrf.mxu1  ;;  %v366_v45 = vunpack.c.h.bf16 %v322_v36  ;;  %1421 = vmatpush.msra.mxu0 %v365_v34 }
 0x141   : > { %9209 = vst [vmem:[#allocation48_spill] sm:$0xff] %v5525_v59  ;;  %v5532_v37 = vpop.f32.mrf.mxu2  ;;  %v833_v20 = vpop.f32.mrf.mxu3  ;;  %4247 = vmatmul.msk.f32.gmra.mxu0 %vm406_vm0, %v5017_v60  ;;  %1534 = vmatpush.msra.mxu1 %v366_v45  ;;  %v2739_v59 = vand.u32 2147483647, %v5523_v12 }
 0x142   : > { %9210 = vst [vmem:[#allocation49_spill] sm:$0xff] %v5532_v37  ;;  %v2667_v54 = vsub.f32 %v833_v20, %v5372_v39  ;;  %4279 = vmatmul.msk.f32.gmra.mxu1 %vm406_vm0, %v5017_v60  ;;  %v5556_v60 = vsub.f32 %v5189_v63, %v5354_v43 }
 0x144   : > { %v5544_v52 = vsel %vm9062_vm6, %v2667_v54, %v2666_v58  ;;  %9212 = vst [vmem:[#allocation51_spill] sm:$0xff] %v5556_v60  ;;  %v2681_v54 = vsub.f32 %v5326_v8, %v5369_v41  ;;  %vm9065_vm7 = vcmp.gt.f32.partialorder %v5556_v60, 0.0 }
 0x145   : > { %9211 = vst [vmem:[#allocation50_spill] sm:$0xff] %v5544_v52  ;;  %v2835_v37 = vand.u32 2147483647, %v5544_v52 }
 0x146   : > { %4216 = vmatmul.msk.f32.gmra.mxu3 %vm406_vm0, %v5028_v61  ;;  %4312 = vmatmul.msk.f32.gmra.mxu2 %vm406_vm0, %v5028_v61  ;;  %v5552_v53 = vpop.f32.mrf.mxu0 }
 0x147   : > { %v5558_v20 = vmin.f32 %v2739_v59, %v2835_v37  ;;  %v5560_v58 = vpop.f32.mrf.mxu1  ;;  %v2740_v59 = vand.u32 2147483647, %v5556_v60 }
 0x149   : > { %9213 = vst [vmem:[#allocation52_spill] sm:$0xff] %v5558_v20  ;;  %v5562_v34 = vpop.f32.mrf.mxu2  ;;  %v836_v36 = vpop.f32.mrf.mxu3  ;;  %4248 = vmatmul.msk.f32.gmra.mxu0 %vm406_vm0, %v5028_v61  ;;  %v2696_v20 = vsub.f32 %v5347_v44, %v5369_v41  ;;  %v5616_v44 = vperm.slane %v5343_v28, 4 }
 0x14a   : > { %v2682_v45 = vsub.f32 %v836_v36, %v5372_v39  ;;  %4280 = vmatmul.msk.f32.gmra.mxu1 %vm406_vm0, %v5028_v61  ;;  %v5586_v36 = vsub.f32 %v5208_v4, %v5354_v43 }
 0x14c   : > { %v5574_v63 = vsel %vm9065_vm7, %v2682_v45, %v2681_v54  ;;  %9216 = vst [vmem:[#allocation55_spill] sm:$0xff] %v5586_v36  ;;  %v5592_v54 = vsub.f32 %v5064_v7, %v5354_v43  ;;  %v2232_v7 = vsub.f32 %v5071_v11, %v5372_v39  ;;  %vm9067_vm8 = vcmp.gt.f32.partialorder %v5586_v36, 0.0 }
 0x14d   : > { %9214 = vst [vmem:[#allocation53_spill] sm:$0xff] %v5574_v63  ;;  %v2836_v37 = vand.u32 2147483647, %v5574_v63  ;;  %v5621_v11 = vperm.slane %v5343_v28, 5 }
 0x14e   : > { %4217 = vmatmul.msk.f32.gmra.mxu3 %vm406_vm0, %v5042_v0  ;;  %4313 = vmatmul.msk.f32.gmra.mxu2 %vm406_vm0, %v5042_v0  ;;  %v5582_v8 = vpop.f32.mrf.mxu0  ;;  %9218 = vst [vmem:[#allocation57_spill] sm:$0xff] %v5592_v54  ;;  %vm8945_vm9 = vcmp.gt.f32.partialorder %v5592_v54, 0.0 }
 0x14f   : > { %9215 = vst [vmem:[#allocation54_spill] sm:$0xff] %v5582_v8  ;;  %v5588_v61 = vmin.f32 %v2740_v59, %v2836_v37  ;;  %v5594_v45 = vpop.f32.mrf.mxu1  ;;  %v2231_v59 = vsub.f32 %v5067_v9, %v5369_v41 }
 0x150   : > { %9219 = vst [vmem:[#allocation58_spill] sm:$0xff] %v5594_v45 }
 0x151   : > { %9217 = vst [vmem:[#allocation56_spill] sm:$0xff] %v5588_v61  ;;  %v5596_v60 = vpop.f32.mrf.mxu2  ;;  %v839_v63 = vpop.f32.mrf.mxu3  ;;  %4249 = vmatmul.msk.f32.gmra.mxu0 %vm406_vm0, %v5042_v0  ;;  %v5641_v61 = vsub.f32 %v5084_v14, %v5354_v43  ;;  %v2246_v14 = vsub.f32 %v5086_v15, %v5369_v41 }
 0x152   : > { %9220 = vst [vmem:[#allocation59_spill] sm:$0xff] %v5596_v60  ;;  %v2697_v4 = vsub.f32 %v839_v63, %v5372_v39  ;;  %4281 = vmatmul.msk.f32.gmra.mxu1 %vm406_vm0, %v5042_v0  ;;  %v2741_v63 = vand.u32 2147483647, %v5586_v36  ;;  %v5628_v0 = vperm.slane %v5343_v28, 3  ;;  %v5635_v36 = vsel %vm8945_vm9, %v2232_v7, %v2231_v59 }
 0x153   : > { %9222 = vst [vmem:[#allocation61_spill] sm:$0xff] %v5641_v61  ;;  %v2806_v59 = vand.u32 2147483647, %v5635_v36  ;;  %vm9068_vm10 = vcmp.gt.f32.partialorder %v5635_v36, 0.0  ;;  %vm8943_vm11 = vcmp.gt.f32.partialorder %v5641_v61, 0.0 }
 0x154   : > { %v5613_v37 = vsel %vm9067_vm8, %v2697_v4, %v2696_v20  ;;  %v5631_v4 = vperm.slane %v5343_v28, 6  ;;  %v2710_v28 = vand.u32 2147483647, %v5592_v54 }
 0x155   : > { %9221 = vst [vmem:[#allocation60_spill] sm:$0xff] %v5613_v37  ;;  %v2837_v9 = vand.u32 2147483647, %v5613_v37 }
 0x156   : > { %4218 = vmatmul.msk.f32.gmra.mxu3 %vm406_vm0, %v5057_v5  ;;  %4314 = vmatmul.msk.f32.gmra.mxu2 %vm406_vm0, %v5057_v5  ;;  %v972_v20 = vpop.f32.mrf.mxu0 }
 0x157   : > { %v5637_v37 = vmin.f32 %v2741_v63, %v2837_v9  ;;  %v2234_v12 = vsub.f32 %v972_v20, %v5616_v44  ;;  %v1085_v52 = vpop.f32.mrf.mxu1  ;;  %v2838_v20 = vmin.f32 %v2710_v28, %v2806_v59 }
 0x158   : > { %v2235_v45 = vsub.f32 %v1085_v52, %v5621_v11  ;;  %v2247_v52 = vsub.f32 %v5090_v17, %v5372_v39 }
 0x159   : > { %v859_v60 = vpop.f32.mrf.mxu3  ;;  %v1198_v8 = vpop.f32.mrf.mxu2  ;;  %4250 = vmatmul.msk.f32.gmra.mxu0 %vm406_vm0, %v5057_v5 }
 0x15a   : > { %v2233_v7 = vsub.f32 %v859_v60, %v5628_v0  ;;  %v2236_v63 = vsub.f32 %v1198_v8, %v5631_v4  ;;  %4282 = vmatmul.msk.f32.gmra.mxu1 %vm406_vm0, %v5057_v5  ;;  %v5674_v17 = vsel %vm8943_vm11, %v2247_v52, %v2246_v14 }
 0x15b   : > { %v2807_v14 = vand.u32 2147483647, %v5674_v17  ;;  %vm9069_vm12 = vcmp.gt.f32.partialorder %v5674_v17, 0.0 }
 0x15c   : > { %v2902_v9 = vsel %vm9068_vm10, %v2234_v12, %v2233_v7  ;;  %v2934_v60 = vsel %vm9068_vm10, %v2236_v63, %v2235_v45  ;;  %v5678_v12 = vsub.f32 %v5103_v19, %v5354_v43 }
 0x15d   : > { %v5665_v8 = vsel %vm8945_vm9, %v2934_v60, %v2902_v9  ;;  %v2711_v60 = vand.u32 2147483647, %v5641_v61 }
 0x15e   : > { %v2998_v15 = vand.u32 2147483647, %v5665_v8  ;;  %4219 = vmatmul.msk.f32.gmra.mxu3 %vm406_vm0, %v5078_v13  ;;  %4315 = vmatmul.msk.f32.gmra.mxu2 %vm406_vm0, %v5078_v13  ;;  %v975_v5 = vpop.f32.mrf.mxu0  ;;  %9223 = vst [vmem:[#allocation62_spill] sm:$0xff] %v5678_v12  ;;  %vm8942_vm13 = vcmp.gt.f32.partialorder %v5678_v12, 0.0 }
 0x15f   : > { %v2249_v28 = vsub.f32 %v975_v5, %v5616_v44  ;;  %v1088_v59 = vpop.f32.mrf.mxu1 }
 0x160   : > { %v5680_v45 = vmin.f32 %v2838_v20, %v2998_v15  ;;  %v2250_v63 = vsub.f32 %v1088_v59, %v5621_v11  ;;  %v2261_v20 = vsub.f32 %v5105_v21, %v5369_v41  ;;  %v2262_v15 = vsub.f32 %v5109_v23, %v5372_v39 }
 0x161   : > { %v862_v7 = vpop.f32.mrf.mxu3  ;;  %v1201_v9 = vpop.f32.mrf.mxu2  ;;  %4251 = vmatmul.msk.f32.gmra.mxu0 %vm406_vm0, %v5078_v13 }
 0x162   : > { %9224 = vst [vmem:[#allocation63_spill] sm:$0xff] %v5680_v45  ;;  %v2248_v52 = vsub.f32 %v862_v7, %v5628_v0  ;;  %v2251_v19 = vsub.f32 %v1201_v9, %v5631_v4  ;;  %4283 = vmatmul.msk.f32.gmra.mxu1 %vm406_vm0, %v5078_v13  ;;  %v2839_v9 = vmin.f32 %v2711_v60, %v2807_v14  ;;  %v4627_v45 = vld [vmem:[%s4821_s15 + $0xd8] sm:$0xff] }
 0x163   : > { %v5713_v23 = vsel %vm8942_vm13, %v2262_v15, %v2261_v20 }
 0x164   : > { %v2903_v5 = vsel %vm9069_vm12, %v2249_v28, %v2248_v52  ;;  %v2935_v59 = vsel %vm9069_vm12, %v2251_v19, %v2250_v63  ;;  %v5717_v28 = vsub.f32 %v5122_v25, %v5354_v43  ;;  %v2808_v20 = vand.u32 2147483647, %v5713_v23 }
 0x165   : > { %v5704_v7 = vsel %vm8943_vm11, %v2935_v59, %v2903_v5  ;;  %v2712_v59 = vand.u32 2147483647, %v5678_v12  ;;  %vm9070_vm14 = vcmp.gt.f32.partialorder %v5713_v23, 0.0 }
 0x166   : > { %v2999_v21 = vand.u32 2147483647, %v5704_v7  ;;  %4220 = vmatmul.msk.f32.gmra.mxu3 %vm406_vm0, %v5097_v18  ;;  %4316 = vmatmul.msk.f32.gmra.mxu2 %vm406_vm0, %v5097_v18  ;;  %v978_v13 = vpop.f32.mrf.mxu0  ;;  %9225 = vst [vmem:[#allocation64_spill] sm:$0xff] %v5717_v28  ;;  %vm8944_vm15 = vcmp.gt.f32.partialorder %v5717_v28, 0.0 }
 0x167   : > { %v2264_v60 = vsub.f32 %v978_v13, %v5616_v44  ;;  %v1091_v14 = vpop.f32.mrf.mxu1 }
 0x168   : > { %v5719_v63 = vmin.f32 %v2839_v9, %v2999_v21  ;;  %v2265_v19 = vsub.f32 %v1091_v14, %v5621_v11  ;;  %v2276_v9 = vsub.f32 %v5124_v26, %v5369_v41  ;;  %v2277_v21 = vsub.f32 %v5128_v29, %v5372_v39 }
 0x169   : > { %v865_v52 = vpop.f32.mrf.mxu3  ;;  %v1204_v5 = vpop.f32.mrf.mxu2  ;;  %4252 = vmatmul.msk.f32.gmra.mxu0 %vm406_vm0, %v5097_v18 }
 0x16a   : > { %9226 = vst [vmem:[#allocation65_spill] sm:$0xff] %v5719_v63  ;;  %v2263_v15 = vsub.f32 %v865_v52, %v5628_v0  ;;  %v2266_v25 = vsub.f32 %v1204_v5, %v5631_v4  ;;  %4284 = vmatmul.msk.f32.gmra.mxu1 %vm406_vm0, %v5097_v18  ;;  %v2840_v5 = vmin.f32 %v2712_v59, %v2808_v20  ;;  %v4626_v63 = vld [vmem:[%s4821_s15 + $0xd0] sm:$0xff] }
 0x16b   : > { %v5752_v29 = vsel %vm8944_vm15, %v2277_v21, %v2276_v9 }
 0x16c   : > { %v2904_v13 = vsel %vm9070_vm14, %v2264_v60, %v2263_v15  ;;  %v2936_v14 = vsel %vm9070_vm14, %v2266_v25, %v2265_v19  ;;  %9227 = vst [vmem:[#allocation66_spill] sm:$0xff] %v5752_v29  ;;  %v5756_v60 = vsub.f32 %v5141_v32, %v5354_v43  ;;  %v2809_v9 = vand.u32 2147483647, %v5752_v29 }
 0x16d   : > { %v5743_v52 = vsel %vm8942_vm13, %v2936_v14, %v2904_v13  ;;  %v2713_v14 = vand.u32 2147483647, %v5717_v28  ;;  %vm9073_vm13 = vcmp.gt.f32.partialorder %v5752_v29, 0.0 }
 0x16e   : > { %v3000_v26 = vand.u32 2147483647, %v5743_v52  ;;  %4221 = vmatmul.msk.f32.gmra.mxu3 %vm406_vm0, %v5116_v24  ;;  %4317 = vmatmul.msk.f32.gmra.mxu2 %vm406_vm0, %v5116_v24  ;;  %v981_v18 = vpop.f32.mrf.mxu0  ;;  %9228 = vst [vmem:[#allocation67_spill] sm:$0xff] %v5756_v60  ;;  %vm8946_vm11 = vcmp.gt.f32.partialorder %v5756_v60, 0.0 }
 0x16f   : > { %v2279_v59 = vsub.f32 %v981_v18, %v5616_v44  ;;  %v1094_v20 = vpop.f32.mrf.mxu1 }
 0x170   : > { %v5758_v19 = vmin.f32 %v2840_v5, %v3000_v26  ;;  %v2280_v25 = vsub.f32 %v1094_v20, %v5621_v11  ;;  %v2291_v5 = vsub.f32 %v5146_v35, %v5369_v41  ;;  %v2292_v26 = vsub.f32 %v5150_v46, %v5372_v39 }
 0x171   : > { %v868_v15 = vpop.f32.mrf.mxu3  ;;  %v1207_v13 = vpop.f32.mrf.mxu2  ;;  %4253 = vmatmul.msk.f32.gmra.mxu0 %vm406_vm0, %v5116_v24 }
 0x172   : > { %9229 = vst [vmem:[#allocation68_spill] sm:$0xff] %v5758_v19  ;;  %v2278_v21 = vsub.f32 %v868_v15, %v5628_v0  ;;  %v2281_v32 = vsub.f32 %v1207_v13, %v5631_v4  ;;  %4285 = vmatmul.msk.f32.gmra.mxu1 %vm406_vm0, %v5116_v24  ;;  %v2841_v13 = vmin.f32 %v2713_v14, %v2809_v9  ;;  %v4625_v19 = vld [vmem:[%s4821_s15 + $0xc8] sm:$0xff] }
 0x173   : > { %v5791_v46 = vsel %vm8946_vm11, %v2292_v26, %v2291_v5 }
 0x174   : > { %v2905_v18 = vsel %vm9073_vm13, %v2279_v59, %v2278_v21  ;;  %v2937_v20 = vsel %vm9073_vm13, %v2281_v32, %v2280_v25  ;;  %v5795_v59 = vsub.f32 %v5163_v48, %v5354_v43  ;;  %v315_v21 = vld [vmem:[%s8904_s1 + $0x28] sm:$0xff]  ;;  %v2714_v48 = vand.u32 2147483647, %v5756_v60  ;;  %v4624_v60 = vld [vmem:[%s4821_s15 + $0xc0] sm:$0xff] }
 0x175   : > { %v5782_v15 = vsel %vm8944_vm15, %v2937_v20, %v2905_v18  ;;  %v352_v5 = vunpack.c.l.bf16 %v315_v21  ;;  %v2810_v26 = vand.u32 2147483647, %v5791_v46  ;;  %vm8947_vm15 = vcmp.gt.f32.partialorder %v5791_v46, 0.0 }
 0x176   : > { %v3001_v35 = vand.u32 2147483647, %v5782_v15  ;;  %4222 = vmatmul.msk.f32.gmra.mxu3 %vm406_vm0, %v5135_v31  ;;  %4318 = vmatmul.msk.f32.gmra.mxu2 %vm406_vm0, %v5135_v31  ;;  %v984_v24 = vpop.f32.mrf.mxu0  ;;  %9230 = vst [vmem:[#allocation69_spill] sm:$0xff] %v5795_v59  ;;  %vm8948_vm9 = vcmp.gt.f32.partialorder %v5795_v59, 0.0 }
 0x177   : > { %v2294_v14 = vsub.f32 %v984_v24, %v5616_v44  ;;  %v1097_v9 = vpop.f32.mrf.mxu1  ;;  %v2306_v24 = vsub.f32 %v5168_v50, %v5369_v41  ;;  %1648 = vmatpush.msra.mxu2 %v352_v5  ;;  %v2842_v50 = vmin.f32 %v2714_v48, %v2810_v26  ;;  %v314_v26 = vld [vmem:[%s8904_s1 + $0x20] sm:$0xff] }
 0x178   : > { %v5797_v25 = vmin.f32 %v2841_v13, %v3001_v35  ;;  %v2295_v18 = vsub.f32 %v1097_v9, %v5621_v11  ;;  %v2307_v9 = vsub.f32 %v5172_v55, %v5372_v39 }
 0x179   : > { %v871_v32 = vpop.f32.mrf.mxu3  ;;  %v1210_v20 = vpop.f32.mrf.mxu2  ;;  %4254 = vmatmul.msk.f32.gmra.mxu0 %vm406_vm0, %v5135_v31 }
 0x17a   : > { %9231 = vst [vmem:[#allocation70_spill] sm:$0xff] %v5797_v25  ;;  %v2293_v13 = vsub.f32 %v871_v32, %v5628_v0  ;;  %v2296_v35 = vsub.f32 %v1210_v20, %v5631_v4  ;;  %4286 = vmatmul.msk.f32.gmra.mxu1 %vm406_vm0, %v5135_v31  ;;  %v5833_v55 = vsel %vm8948_vm9, %v2307_v9, %v2306_v24  ;;  %v350_v24 = vunpack.c.l.bf16 %v314_v26 }
 0x17b   : > { %v351_v9 = vunpack.c.h.bf16 %v314_v26 }
 0x17c   : > { %v2906_v21 = vsel %vm8947_vm15, %v2294_v14, %v2293_v13  ;;  %v2938_v32 = vsel %vm8947_vm15, %v2296_v35, %v2295_v18  ;;  %v5837_v14 = vsub.f32 %v5185_v56, %v5354_v43  ;;  %v2715_v56 = vand.u32 2147483647, %v5795_v59  ;;  %1422 = vmatpush.msra.mxu0 %v350_v24  ;;  %v9238_v59 = vld [vmem:[#allocation2_spill] sm:$0xff] }
 0x17d   : > { %v5824_v20 = vsel %vm8946_vm11, %v2938_v32, %v2906_v21  ;;  %vm8949_vm11 = vcmp.gt.f32.partialorder %v5833_v55, 0.0  ;;  %1535 = vmatpush.msra.mxu1 %v351_v9 }
 0x17e   : > { %v3002_v25 = vand.u32 2147483647, %v5824_v20  ;;  %4223 = vmatmul.msk.f32.gmra.mxu3 %vm406_vm0, %v5157_v38  ;;  %4319 = vmatmul.msk.f32.gmra.mxu2 %vm406_vm0, %v5157_v38  ;;  %v987_v31 = vpop.f32.mrf.mxu0  ;;  %9232 = vst [vmem:[#allocation71_spill] sm:$0xff] %v5837_v14  ;;  %vm8952_vm15 = vcmp.gt.f32.partialorder %v5837_v14, 0.0 }
 0x17f   : > { %v2309_v5 = vsub.f32 %v987_v31, %v5616_v44  ;;  %v1100_v48 = vpop.f32.mrf.mxu1  ;;  %v2321_v31 = vsub.f32 %v5187_v62, %v5369_v41 }
 0x180   : > { %v5839_v18 = vmin.f32 %v2842_v50, %v3002_v25  ;;  %v2310_v35 = vsub.f32 %v1100_v48, %v5621_v11  ;;  %v2811_v25 = vand.u32 2147483647, %v5833_v55  ;;  %v2322_v48 = vsub.f32 %v5191_v1, %v5372_v39 }
 0x181   : > { %v874_v13 = vpop.f32.mrf.mxu3  ;;  %v1213_v21 = vpop.f32.mrf.mxu2  ;;  %4255 = vmatmul.msk.f32.gmra.mxu0 %vm406_vm0, %v5157_v38 }
 0x182   : > { %9233 = vst [vmem:[#allocation72_spill] sm:$0xff] %v5839_v18  ;;  %v2308_v32 = vsub.f32 %v874_v13, %v5628_v0  ;;  %v2311_v50 = vsub.f32 %v1213_v21, %v5631_v4  ;;  %4287 = vmatmul.msk.f32.gmra.mxu1 %vm406_vm0, %v5157_v38  ;;  %v2843_v62 = vmin.f32 %v2715_v56, %v2811_v25 }
 0x184   : > { %v2907_v26 = vsel %vm8949_vm11, %v2309_v5, %v2308_v32  ;;  %v2939_v13 = vsel %vm8949_vm11, %v2311_v50, %v2310_v35  ;;  %v5875_v5 = vsel %vm8952_vm15, %v2322_v48, %v2321_v31  ;;  %v5879_v35 = vsub.f32 %v5204_v42, %v5354_v43 }
 0x185   : > { %v5866_v21 = vsel %vm8948_vm9, %v2939_v13, %v2907_v26  ;;  %v2716_v26 = vand.u32 2147483647, %v5837_v14  ;;  %v2812_v31 = vand.u32 2147483647, %v5875_v5  ;;  %vm8953_vm9 = vcmp.gt.f32.partialorder %v5875_v5, 0.0  ;;  %v9236_v13 = vld [vmem:[#allocation3_spill] sm:$0xff] }
 0x186   : > { %v3003_v1 = vand.u32 2147483647, %v5866_v21  ;;  %4224 = vmatmul.msk.f32.gmra.mxu3 %vm406_vm0, %v5179_v40  ;;  %4320 = vmatmul.msk.f32.gmra.mxu2 %vm406_vm0, %v5179_v40  ;;  %v990_v38 = vpop.f32.mrf.mxu0  ;;  %9234 = vst [vmem:[#allocation73_spill] sm:$0xff] %v5879_v35  ;;  %vm8960_vm11 = vcmp.gt.f32.partialorder %v5879_v35, 0.0 }
 0x187   : > { %v2324_v9 = vsub.f32 %v990_v38, %v5616_v44  ;;  %v1103_v56 = vpop.f32.mrf.mxu1 }
 0x188   : > { %v5881_v24 = vmin.f32 %v2843_v62, %v3003_v1  ;;  %v2325_v32 = vsub.f32 %v1103_v56, %v5621_v11  ;;  %v2336_v62 = vsub.f32 %v9236_v13, %v5369_v41  ;;  %v9237_v1 = vld [vmem:[#allocation4_spill] sm:$0xff] }
 0x189   : > { %v877_v25 = vpop.f32.mrf.mxu3  ;;  %v1216_v50 = vpop.f32.mrf.mxu2  ;;  %4256 = vmatmul.msk.f32.gmra.mxu0 %vm406_vm0, %v5179_v40  ;;  %v2337_v38 = vsub.f32 %v9237_v1, %v5372_v39 }
 0x18a   : > { %9235 = vst [vmem:[#allocation74_spill] sm:$0xff] %v5881_v24  ;;  %v2323_v48 = vsub.f32 %v877_v25, %v5628_v0  ;;  %v2326_v42 = vsub.f32 %v1216_v50, %v5631_v4  ;;  %4288 = vmatmul.msk.f32.gmra.mxu1 %vm406_vm0, %v5179_v40  ;;  %v2844_v24 = vmin.f32 %v2716_v26, %v2812_v31 }
 0x18c   : > { %v2908_v56 = vsel %vm8953_vm9, %v2324_v9, %v2323_v48  ;;  %v2940_v25 = vsel %vm8953_vm9, %v2326_v42, %v2325_v32  ;;  %v5914_v9 = vsel %vm8960_vm11, %v2337_v38, %v2336_v62  ;;  %v9239_v32 = vld [vmem:[#allocation5_spill] sm:$0xff]  ;;  %v2717_v62 = vand.u32 2147483647, %v5879_v35 }
 0x18d   : > { %v5905_v50 = vsel %vm8952_vm15, %v2940_v25, %v2908_v56  ;;  %v5918_v48 = vsub.f32 %v9239_v32, %v5354_v43  ;;  %v2813_v38 = vand.u32 2147483647, %v5914_v9  ;;  %vm8961_vm15 = vcmp.gt.f32.partialorder %v5914_v9, 0.0 }
 0x18e   : > { %v3004_v13 = vand.u32 2147483647, %v5905_v50  ;;  %4225 = vmatmul.msk.f32.gmra.mxu3 %vm406_vm0, %v9238_v59  ;;  %4321 = vmatmul.msk.f32.gmra.mxu2 %vm406_vm0, %v9238_v59  ;;  %v993_v40 = vpop.f32.mrf.mxu0 }
 0x18f   : > { %9240 = vst [vmem:[#allocation3_spill] sm:$0xff] %v5918_v48  ;;  %v2339_v26 = vsub.f32 %v993_v40, %v5616_v44  ;;  %v1106_v31 = vpop.f32.mrf.mxu1  ;;  %vm8966_vm9 = vcmp.gt.f32.partialorder %v5918_v48, 0.0  ;;  %v2845_v18 = vmin.f32 %v2717_v62, %v2813_v38  ;;  %v2718_v35 = vand.u32 2147483647, %v5918_v48 }
 0x190   : > { %v5920_v42 = vmin.f32 %v2844_v24, %v3004_v13  ;;  %v2340_v56 = vsub.f32 %v1106_v31, %v5621_v11  ;;  %v9242_v13 = vld [vmem:[#allocation6_spill] sm:$0xff]  ;;  %v9243_v31 = vld [vmem:[#allocation7_spill] sm:$0xff] }
 0x191   : > { %v880_v1 = vpop.f32.mrf.mxu3  ;;  %v1219_v25 = vpop.f32.mrf.mxu2  ;;  %4257 = vmatmul.msk.f32.gmra.mxu0 %vm406_vm0, %v9238_v59  ;;  %v2351_v40 = vsub.f32 %v9242_v13, %v5369_v41 }
 0x192   : > { %9241 = vst [vmem:[#allocation4_spill] sm:$0xff] %v5920_v42  ;;  %v2338_v32 = vsub.f32 %v880_v1, %v5628_v0  ;;  %v2341_v24 = vsub.f32 %v1219_v25, %v5631_v4  ;;  %v2352_v42 = vsub.f32 %v9243_v31, %v5372_v39  ;;  %4289 = vmatmul.msk.f32.gmra.mxu1 %vm406_vm0, %v9238_v59 }
 0x194   : > { %v2909_v14 = vsel %vm8961_vm15, %v2339_v26, %v2338_v32  ;;  %v2941_v1 = vsel %vm8961_vm15, %v2341_v24, %v2340_v56  ;;  %v5952_v31 = vsel %vm8966_vm9, %v2352_v42, %v2351_v40  ;;  %v9244_v26 = vld [vmem:[#allocation8_spill] sm:$0xff] }
 0x195   : > { %v5944_v25 = vsel %vm8960_vm11, %v2941_v1, %v2909_v14  ;;  %v5956_v56 = vsub.f32 %v9244_v26, %v5354_v43  ;;  %v2814_v42 = vand.u32 2147483647, %v5952_v31  ;;  %vm8967_vm11 = vcmp.gt.f32.partialorder %v5952_v31, 0.0 }
 0x196   : > { %v3005_v13 = vand.u32 2147483647, %v5944_v25  ;;  %4226 = vmatmul.msk.f32.gmra.mxu3 %vm406_vm0, %v4624_v60  ;;  %4322 = vmatmul.msk.f32.gmra.mxu2 %vm406_vm0, %v4624_v60  ;;  %v996_v59 = vpop.f32.mrf.mxu0 }
 0x197   : > { %9245 = vst [vmem:[#allocation2_spill] sm:$0xff] %v5956_v56  ;;  %v2354_v14 = vsub.f32 %v996_v59, %v5616_v44  ;;  %v1109_v62 = vpop.f32.mrf.mxu1  ;;  %v9248_v59 = vld [vmem:[#allocation10_spill] sm:$0xff]  ;;  %vm8972_vm15 = vcmp.gt.f32.partialorder %v5956_v56, 0.0  ;;  %v2846_v28 = vmin.f32 %v2718_v35, %v2814_v42  ;;  %v2719_v48 = vand.u32 2147483647, %v5956_v56 }
 0x198   : > { %v5958_v32 = vmin.f32 %v2845_v18, %v3005_v13  ;;  %v2355_v24 = vsub.f32 %v1109_v62, %v5621_v11  ;;  %v9247_v18 = vld [vmem:[#allocation9_spill] sm:$0xff]  ;;  %v2367_v62 = vsub.f32 %v9248_v59, %v5372_v39 }
 0x199   : > { %v883_v38 = vpop.f32.mrf.mxu3  ;;  %v1222_v1 = vpop.f32.mrf.mxu2  ;;  %4258 = vmatmul.msk.f32.gmra.mxu0 %vm406_vm0, %v4624_v60  ;;  %v2366_v13 = vsub.f32 %v9247_v18, %v5369_v41 }
 0x19a   : > { %9246 = vst [vmem:[#allocation5_spill] sm:$0xff] %v5958_v32  ;;  %v2353_v40 = vsub.f32 %v883_v38, %v5628_v0  ;;  %v2356_v26 = vsub.f32 %v1222_v1, %v5631_v4  ;;  %4290 = vmatmul.msk.f32.gmra.mxu1 %vm406_vm0, %v4624_v60 }
 0x19b   : > { %v5988_v59 = vsel %vm8972_vm15, %v2367_v62, %v2366_v13 }
 0x19c   : > { %v2910_v32 = vsel %vm8967_vm11, %v2354_v14, %v2353_v40  ;;  %v2942_v38 = vsel %vm8967_vm11, %v2356_v26, %v2355_v24  ;;  %9249 = vst [vmem:[#allocation6_spill] sm:$0xff] %v5988_v59  ;;  %v9250_v14 = vld [vmem:[#allocation11_spill] sm:$0xff]  ;;  %v2815_v13 = vand.u32 2147483647, %v5988_v59 }
 0x19d   : > { %v5980_v1 = vsel %vm8966_vm9, %v2942_v38, %v2910_v32  ;;  %v5992_v24 = vsub.f32 %v9250_v14, %v5354_v43  ;;  %vm8973_vm9 = vcmp.gt.f32.partialorder %v5988_v59, 0.0 }
 0x19e   : > { %v3006_v18 = vand.u32 2147483647, %v5980_v1  ;;  %4227 = vmatmul.msk.f32.gmra.mxu3 %vm406_vm0, %v4625_v19  ;;  %4323 = vmatmul.msk.f32.gmra.mxu2 %vm406_vm0, %v4625_v19  ;;  %v999_v60 = vpop.f32.mrf.mxu0  ;;  %v2847_v12 = vmin.f32 %v2719_v48, %v2815_v13 }
 0x19f   : > { %9251 = vst [vmem:[#allocation7_spill] sm:$0xff] %v5992_v24  ;;  %v2369_v35 = vsub.f32 %v999_v60, %v5616_v44  ;;  %v1112_v32 = vpop.f32.mrf.mxu1  ;;  %v9254_v60 = vld [vmem:[#allocation13_spill] sm:$0xff]  ;;  %vm8978_vm11 = vcmp.gt.f32.partialorder %v5992_v24, 0.0  ;;  %v2720_v56 = vand.u32 2147483647, %v5992_v24 }
 0x1a0   : > { %v5994_v40 = vmin.f32 %v2846_v28, %v3006_v18  ;;  %v2370_v26 = vsub.f32 %v1112_v32, %v5621_v11  ;;  %v9253_v28 = vld [vmem:[#allocation12_spill] sm:$0xff]  ;;  %v2382_v32 = vsub.f32 %v9254_v60, %v5372_v39 }
 0x1a1   : > { %v886_v42 = vpop.f32.mrf.mxu3  ;;  %v1225_v38 = vpop.f32.mrf.mxu2  ;;  %4259 = vmatmul.msk.f32.gmra.mxu0 %vm406_vm0, %v4625_v19  ;;  %v2381_v18 = vsub.f32 %v9253_v28, %v5369_v41 }
 0x1a2   : > { %9252 = vst [vmem:[#allocation8_spill] sm:$0xff] %v5994_v40  ;;  %v2368_v62 = vsub.f32 %v886_v42, %v5628_v0  ;;  %v2371_v14 = vsub.f32 %v1225_v38, %v5631_v4  ;;  %4291 = vmatmul.msk.f32.gmra.mxu1 %vm406_vm0, %v4625_v19 }
 0x1a3   : > { %v6024_v60 = vsel %vm8978_vm11, %v2382_v32, %v2381_v18 }
 0x1a4   : > { %v2911_v40 = vsel %vm8973_vm9, %v2369_v35, %v2368_v62  ;;  %v2943_v42 = vsel %vm8973_vm9, %v2371_v14, %v2370_v26  ;;  %9256 = vst [vmem:[#allocation10_spill] sm:$0xff] %v6024_v60  ;;  %v9257_v35 = vld [vmem:[#allocation14_spill] sm:$0xff]  ;;  %v2816_v18 = vand.u32 2147483647, %v6024_v60 }
 0x1a5   : > { %v6016_v38 = vsel %vm8972_vm15, %v2943_v42, %v2911_v40  ;;  %v6028_v26 = vsub.f32 %v9257_v35, %v5354_v43  ;;  %vm8979_vm15 = vcmp.gt.f32.partialorder %v6024_v60, 0.0  ;;  %v4628_v60 = vld [vmem:[%s4821_s15 + $0xe0] sm:$0xff] }
 0x1a6   : > { %9255 = vst [vmem:[#allocation9_spill] sm:$0xff] %v6016_v38  ;;  %v3007_v28 = vand.u32 2147483647, %v6016_v38  ;;  %4228 = vmatmul.msk.f32.gmra.mxu3 %vm406_vm0, %v4626_v63  ;;  %4324 = vmatmul.msk.f32.gmra.mxu2 %vm406_vm0, %v4626_v63  ;;  %v1002_v19 = vpop.f32.mrf.mxu0  ;;  %v2848_v61 = vmin.f32 %v2720_v56, %v2816_v18 }
 0x1a7   : > { %9258 = vst [vmem:[#allocation11_spill] sm:$0xff] %v6028_v26  ;;  %v2384_v48 = vsub.f32 %v1002_v19, %v5616_v44  ;;  %v1115_v40 = vpop.f32.mrf.mxu1  ;;  %v9261_v19 = vld [vmem:[#allocation16_spill] sm:$0xff]  ;;  %vm8986_vm9 = vcmp.gt.f32.partialorder %v6028_v26, 0.0  ;;  %v2721_v24 = vand.u32 2147483647, %v6028_v26 }
 0x1a8   : > { %v6030_v62 = vmin.f32 %v2847_v12, %v3007_v28  ;;  %v2385_v14 = vsub.f32 %v1115_v40, %v5621_v11  ;;  %v9260_v12 = vld [vmem:[#allocation15_spill] sm:$0xff]  ;;  %v2397_v40 = vsub.f32 %v9261_v19, %v5372_v39 }
 0x1a9   : > { %v889_v13 = vpop.f32.mrf.mxu3  ;;  %v1228_v42 = vpop.f32.mrf.mxu2  ;;  %4260 = vmatmul.msk.f32.gmra.mxu0 %vm406_vm0, %v4626_v63  ;;  %v2396_v28 = vsub.f32 %v9260_v12, %v5369_v41 }
 0x1aa   : > { %9259 = vst [vmem:[#allocation12_spill] sm:$0xff] %v6030_v62  ;;  %v2383_v32 = vsub.f32 %v889_v13, %v5628_v0  ;;  %v2386_v35 = vsub.f32 %v1228_v42, %v5631_v4  ;;  %4292 = vmatmul.msk.f32.gmra.mxu1 %vm406_vm0, %v4626_v63 }
 0x1ab   : > { %v6060_v19 = vsel %vm8986_vm9, %v2397_v40, %v2396_v28 }
 0x1ac   : > { %v2912_v62 = vsel %vm8979_vm15, %v2384_v48, %v2383_v32  ;;  %v2944_v13 = vsel %vm8979_vm15, %v2386_v35, %v2385_v14  ;;  %9263 = vst [vmem:[#allocation14_spill] sm:$0xff] %v6060_v19  ;;  %v9264_v48 = vld [vmem:[#allocation17_spill] sm:$0xff]  ;;  %v2817_v28 = vand.u32 2147483647, %v6060_v19 }
 0x1ad   : > { %v6052_v42 = vsel %vm8978_vm11, %v2944_v13, %v2912_v62  ;;  %v6064_v14 = vsub.f32 %v9264_v48, %v5354_v43  ;;  %vm8991_vm11 = vcmp.gt.f32.partialorder %v6060_v19, 0.0 }
 0x1ae   : > { %9262 = vst [vmem:[#allocation13_spill] sm:$0xff] %v6052_v42  ;;  %v3008_v12 = vand.u32 2147483647, %v6052_v42  ;;  %4229 = vmatmul.msk.f32.gmra.mxu3 %vm406_vm0, %v4627_v45  ;;  %4325 = vmatmul.msk.f32.gmra.mxu2 %vm406_vm0, %v4627_v45  ;;  %v1005_v63 = vpop.f32.mrf.mxu0  ;;  %v2849_v54 = vmin.f32 %v2721_v24, %v2817_v28  ;;  %v4629_v28 = vld [vmem:[%s8904_s1 + $0xdc] sm:$0xff]  ;;  %v4630_v42 = vld [vmem:[%s4821_s15 + $0xe8] sm:$0xff] }
 0x1af   : > { %9265 = vst [vmem:[#allocation15_spill] sm:$0xff] %v6064_v14  ;;  %v2399_v56 = vsub.f32 %v1005_v63, %v5616_v44  ;;  %v1118_v62 = vpop.f32.mrf.mxu1  ;;  %v9268_v63 = vld [vmem:[#allocation19_spill] sm:$0xff]  ;;  %vm8994_vm15 = vcmp.gt.f32.partialorder %v6064_v14, 0.0 }
 0x1b0   : > { %v6066_v32 = vmin.f32 %v2848_v61, %v3008_v12  ;;  %v2400_v35 = vsub.f32 %v1118_v62, %v5621_v11  ;;  %v9267_v61 = vld [vmem:[#allocation18_spill] sm:$0xff]  ;;  %v2412_v62 = vsub.f32 %v9268_v63, %v5372_v39 }
 0x1b1   : > { %v892_v18 = vpop.f32.mrf.mxu3  ;;  %v1231_v13 = vpop.f32.mrf.mxu2  ;;  %4261 = vmatmul.msk.f32.gmra.mxu0 %vm406_vm0, %v4627_v45  ;;  %v2411_v12 = vsub.f32 %v9267_v61, %v5369_v41 }
 0x1b2   : > { %9266 = vst [vmem:[#allocation16_spill] sm:$0xff] %v6066_v32  ;;  %v2398_v40 = vsub.f32 %v892_v18, %v5628_v0  ;;  %v2401_v48 = vsub.f32 %v1231_v13, %v5631_v4  ;;  %4293 = vmatmul.msk.f32.gmra.mxu1 %vm406_vm0, %v4627_v45 }
 0x1b3   : > { %v6096_v63 = vsel %vm8994_vm15, %v2412_v62, %v2411_v12 }
 0x1b4   : > { %v2913_v32 = vsel %vm8991_vm11, %v2399_v56, %v2398_v40  ;;  %v2945_v18 = vsel %vm8991_vm11, %v2401_v48, %v2400_v35  ;;  %9270 = vst [vmem:[#allocation18_spill] sm:$0xff] %v6096_v63  ;;  %v9271_v56 = vld [vmem:[#allocation20_spill] sm:$0xff]  ;;  %v398_v48 = vunpack.c.h.bf16 %v4629_v28 }
 0x1b5   : > { %v6088_v13 = vsel %vm8986_vm9, %v2945_v18, %v2913_v32  ;;  %v6100_v35 = vsub.f32 %v9271_v56, %v5354_v43  ;;  %v341_v18 = vld [vmem:[%s8904_s1 + $0xec] sm:$0xf]  ;;  %vm8999_vm9 = vcmp.gt.f32.partialorder %v6096_v63, 0.0 }
 0x1b6   : > { %9269 = vst [vmem:[#allocation17_spill] sm:$0xff] %v6088_v13  ;;  %v3009_v61 = vand.u32 2147483647, %v6088_v13  ;;  %4230 = vmatmul.msk.f32.gmra.mxu3 %vm406_vm0, %v4628_v60  ;;  %4326 = vmatmul.msk.f32.gmra.mxu2 %vm406_vm0, %v4628_v60  ;;  %v1008_v45 = vpop.f32.mrf.mxu0 }
 0x1b7   : > { %9272 = vst [vmem:[#allocation19_spill] sm:$0xff] %v6100_v35  ;;  %v2414_v24 = vsub.f32 %v1008_v45, %v5616_v44  ;;  %v1121_v32 = vpop.f32.mrf.mxu1  ;;  %v2818_v45 = vand.u32 2147483647, %v6096_v63  ;;  %1758 = vmatpush.msrb.mxu3 %v398_v48  ;;  %vm9002_vm11 = vcmp.gt.f32.partialorder %v6100_v35, 0.0 }
 0x1b8   : > { %v6102_v40 = vmin.f32 %v2849_v54, %v3009_v61  ;;  %v2415_v62 = vsub.f32 %v1121_v32, %v5621_v11  ;;  %v401_v54 = vunpack.c.l.bf16 %v341_v18  ;;  %v2722_v61 = vand.u32 2147483647, %v6064_v14  ;;  %v9275_v32 = vld [vmem:[#allocation22_spill] sm:$0xff] }
 0x1b9   : > { %v895_v12 = vpop.f32.mrf.mxu3  ;;  %v1234_v26 = vpop.f32.mrf.mxu2  ;;  %4262 = vmatmul.msk.f32.gmra.mxu0 %vm406_vm0, %v4628_v60  ;;  %v2427_v13 = vsub.f32 %v9275_v32, %v5372_v39 }
 0x1ba   : > { %9273 = vst [vmem:[#allocation20_spill] sm:$0xff] %v6102_v40  ;;  %v2413_v56 = vsub.f32 %v895_v12, %v5628_v0  ;;  %v2416_v28 = vsub.f32 %v1234_v26, %v5631_v4  ;;  %v9274_v40 = vld [vmem:[#allocation21_spill] sm:$0xff]  ;;  %4294 = vmatmul.msk.f32.gmra.mxu1 %vm406_vm0, %v4628_v60  ;;  %2097 = vmatpush.msrb.mxu2 %v401_v54 }
 0x1bb   : > { %v2426_v19 = vsub.f32 %v9274_v40, %v5369_v41  ;;  %v2850_v12 = vmin.f32 %v2722_v61, %v2818_v45 }
 0x1bc   : > { %v2914_v18 = vsel %vm8999_vm9, %v2414_v24, %v2413_v56  ;;  %v2946_v26 = vsel %vm8999_vm9, %v2416_v28, %v2415_v62  ;;  %v9278_v24 = vld [vmem:[#allocation23_spill] sm:$0xff] }
 0x1bd   : > { %v6130_v48 = vsel %vm8994_vm15, %v2946_v26, %v2914_v18  ;;  %v6138_v54 = vsel %vm9002_vm11, %v2427_v13, %v2426_v19  ;;  %v6142_v62 = vsub.f32 %v9278_v24, %v5354_v43  ;;  %v340_v28 = vld [vmem:[%s8904_s1 + $0xe4] sm:$0xff]  ;;  %v2723_v24 = vand.u32 2147483647, %v6100_v35 }
 0x1be   : > { %9276 = vst [vmem:[#allocation21_spill] sm:$0xff] %v6130_v48  ;;  %v3010_v40 = vand.u32 2147483647, %v6130_v48  ;;  %4231 = vmatmul.msk.f32.gmra.mxu3 %vm406_vm0, %v4630_v42  ;;  %4327 = vmatmul.msk.f32.gmra.mxu2 %vm406_vm0, %v4630_v42  ;;  %v1011_v60 = vpop.f32.mrf.mxu0  ;;  %v399_v19 = vunpack.c.l.bf16 %v340_v28  ;;  %v400_v13 = vunpack.c.h.bf16 %v340_v28  ;;  %vm9003_vm15 = vcmp.gt.f32.partialorder %v6138_v54, 0.0 }
 0x1bf   : > { %9277 = vst [vmem:[#allocation22_spill] sm:$0xff] %v6138_v54  ;;  %v2429_v61 = vsub.f32 %v1011_v60, %v5616_v44  ;;  %v1124_v45 = vpop.f32.mrf.mxu1  ;;  %vm9010_vm9 = vcmp.gt.f32.partialorder %v6142_v62, 0.0 }
 0x1c0   : > { %9279 = vst [vmem:[#allocation23_spill] sm:$0xff] %v6142_v62  ;;  %v6144_v56 = vmin.f32 %v2850_v12, %v3010_v40  ;;  %v2430_v18 = vsub.f32 %v1124_v45, %v5621_v11  ;;  %v2819_v12 = vand.u32 2147483647, %v6138_v54  ;;  %v9282_v45 = vld [vmem:[#allocation25_spill] sm:$0xff]  ;;  %1871 = vmatpush.msrb.mxu0 %v399_v19  ;;  %1984 = vmatpush.msrb.mxu1 %v400_v13 }
 0x1c1   : > { %v898_v32 = vpop.f32.mrf.mxu3  ;;  %v1237_v26 = vpop.f32.mrf.mxu2  ;;  %4263 = vmatmul.msk.f32.gmra.mxu0 %vm406_vm0, %v4630_v42  ;;  %v2442_v63 = vsub.f32 %v9282_v45, %v5372_v39  ;;  %v4631_v45 = vld [vmem:[%s4821_s15 + $0xf0] sm:$0xff]  ;;  %v4632_v54 = vld [vmem:[%s4821_s15 + $0xf8] sm:$0xff] }
 0x1c2   : > { %9280 = vst [vmem:[#allocation75_spill] sm:$0xff] %v6144_v56  ;;  %v2428_v40 = vsub.f32 %v898_v32, %v5628_v0  ;;  %v2431_v60 = vsub.f32 %v1237_v26, %v5631_v4  ;;  %v9281_v56 = vld [vmem:[#allocation24_spill] sm:$0xff]  ;;  %4295 = vmatmul.msk.f32.gmra.mxu1 %vm406_vm0, %v4630_v42 }
 0x1c3   : > { %v2441_v14 = vsub.f32 %v9281_v56, %v5369_v41  ;;  %v2851_v56 = vmin.f32 %v2723_v24, %v2819_v12 }
 0x1c4   : > { %v2915_v28 = vsel %vm9003_vm15, %v2429_v61, %v2428_v40  ;;  %v2947_v32 = vsel %vm9003_vm15, %v2431_v60, %v2430_v18  ;;  %v9285_v18 = vld [vmem:[#allocation26_spill] sm:$0xff] }
 0x1c5   : > { %v6169_v26 = vsel %vm9002_vm11, %v2947_v32, %v2915_v28  ;;  %v6177_v61 = vsel %vm9010_vm9, %v2442_v63, %v2441_v14  ;;  %v6181_v19 = vsub.f32 %v9285_v18, %v5354_v43  ;;  %v2724_v32 = vand.u32 2147483647, %v6142_v62 }
 0x1c6   : > { %9283 = vst [vmem:[#allocation24_spill] sm:$0xff] %v6169_v26  ;;  %v3011_v48 = vand.u32 2147483647, %v6169_v26  ;;  %4232 = vmatmul.msk.f32.gmra.mxu3 %vm406_vm0, %v4631_v45  ;;  %4328 = vmatmul.msk.f32.gmra.mxu2 %vm406_vm0, %v4631_v45  ;;  %v1014_v42 = vpop.f32.mrf.mxu0  ;;  %v2820_v14 = vand.u32 2147483647, %v6177_v61  ;;  %vm9011_vm11 = vcmp.gt.f32.partialorder %v6177_v61, 0.0 }
 0x1c7   : > { %9284 = vst [vmem:[#allocation25_spill] sm:$0xff] %v6177_v61  ;;  %v2444_v24 = vsub.f32 %v1014_v42, %v5616_v44  ;;  %v1127_v12 = vpop.f32.mrf.mxu1  ;;  %v9289_v42 = vld [vmem:[#allocation28_spill] sm:$0xff]  ;;  %vm9016_vm15 = vcmp.gt.f32.partialorder %v6181_v19, 0.0  ;;  %v2725_v62 = vand.u32 2147483647, %v6181_v19 }
 0x1c8   : > { %9286 = vst [vmem:[#allocation26_spill] sm:$0xff] %v6181_v19  ;;  %v6183_v13 = vmin.f32 %v2851_v56, %v3011_v48  ;;  %v2445_v60 = vsub.f32 %v1127_v12, %v5621_v11  ;;  %v9288_v48 = vld [vmem:[#allocation27_spill] sm:$0xff]  ;;  %v2457_v12 = vsub.f32 %v9289_v42, %v5372_v39  ;;  %v2852_v35 = vmin.f32 %v2724_v32, %v2820_v14  ;;  %v4646_v19 = vld [vmem:[%s4821_s15 + $0x60] sm:$0xff] }
 0x1c9   : > { %v901_v40 = vpop.f32.mrf.mxu3  ;;  %v1240_v28 = vpop.f32.mrf.mxu2  ;;  %4264 = vmatmul.msk.f32.gmra.mxu0 %vm406_vm0, %v4631_v45  ;;  %v2456_v56 = vsub.f32 %v9288_v48, %v5369_v41 }
 0x1ca   : > { %9287 = vst [vmem:[#allocation76_spill] sm:$0xff] %v6183_v13  ;;  %v2443_v63 = vsub.f32 %v901_v40, %v5628_v0  ;;  %v2446_v18 = vsub.f32 %v1240_v28, %v5631_v4  ;;  %4296 = vmatmul.msk.f32.gmra.mxu1 %vm406_vm0, %v4631_v45 }
 0x1cb   : > { %v6213_v42 = vsel %vm9016_vm15, %v2457_v12, %v2456_v56 }
 0x1cc   : > { %v2916_v13 = vsel %vm9011_vm11, %v2444_v24, %v2443_v63  ;;  %v2948_v40 = vsel %vm9011_vm11, %v2446_v18, %v2445_v60  ;;  %9291 = vst [vmem:[#allocation28_spill] sm:$0xff] %v6213_v42  ;;  %v9292_v24 = vld [vmem:[#allocation29_spill] sm:$0xff]  ;;  %v2821_v56 = vand.u32 2147483647, %v6213_v42 }
 0x1cd   : > { %v6205_v28 = vsel %vm9010_vm9, %v2948_v40, %v2916_v13  ;;  %v6217_v60 = vsub.f32 %v9292_v24, %v5354_v43  ;;  %vm9017_vm9 = vcmp.gt.f32.partialorder %v6213_v42, 0.0 }
 0x1ce   : > { %9290 = vst [vmem:[#allocation27_spill] sm:$0xff] %v6205_v28  ;;  %v3012_v48 = vand.u32 2147483647, %v6205_v28  ;;  %4233 = vmatmul.msk.f32.gmra.mxu3 %vm406_vm0, %v4632_v54  ;;  %4329 = vmatmul.msk.f32.gmra.mxu2 %vm406_vm0, %v4632_v54  ;;  %v1017_v45 = vpop.f32.mrf.mxu0  ;;  %v2853_v61 = vmin.f32 %v2725_v62, %v2821_v56  ;;  %v4633_v28 = vld [vmem:[%s4821_s15] sm:$0xff] }
 0x1cf   : > { %9293 = vst [vmem:[#allocation29_spill] sm:$0xff] %v6217_v60  ;;  %v2459_v13 = vsub.f32 %v1017_v45, %v5616_v44  ;;  %v1130_v32 = vpop.f32.mrf.mxu1  ;;  %v9296_v45 = vld [vmem:[#allocation32_spill] sm:$0xff]  ;;  %vm9018_vm11 = vcmp.gt.f32.partialorder %v6217_v60, 0.0 }
 0x1d0   : > { %v6219_v63 = vmin.f32 %v2852_v35, %v3012_v48  ;;  %v2460_v18 = vsub.f32 %v1130_v32, %v5621_v11  ;;  %v9295_v35 = vld [vmem:[#allocation31_spill] sm:$0xff]  ;;  %v2472_v32 = vsub.f32 %v9296_v45, %v5372_v39 }
 0x1d1   : > { %v904_v14 = vpop.f32.mrf.mxu3  ;;  %v1243_v40 = vpop.f32.mrf.mxu2  ;;  %4265 = vmatmul.msk.f32.gmra.mxu0 %vm406_vm0, %v4632_v54  ;;  %v2471_v48 = vsub.f32 %v9295_v35, %v5369_v41 }
 0x1d2   : > { %9294 = vst [vmem:[#allocation77_spill] sm:$0xff] %v6219_v63  ;;  %v2458_v12 = vsub.f32 %v904_v14, %v5628_v0  ;;  %v2461_v24 = vsub.f32 %v1243_v40, %v5631_v4  ;;  %4297 = vmatmul.msk.f32.gmra.mxu1 %vm406_vm0, %v4632_v54 }
 0x1d3   : > { %v6249_v45 = vsel %vm9018_vm11, %v2472_v32, %v2471_v48 }
 0x1d4   : > { %v2917_v63 = vsel %vm9017_vm9, %v2459_v13, %v2458_v12  ;;  %v2949_v14 = vsel %vm9017_vm9, %v2461_v24, %v2460_v18  ;;  %9297 = vst [vmem:[#allocation31_spill] sm:$0xff] %v6249_v45  ;;  %v6253_v13 = vsub.f32 %v5396_v2, %v5354_v43  ;;  %v2822_v48 = vand.u32 2147483647, %v6249_v45 }
 0x1d5   : > { %v6241_v40 = vsel %vm9016_vm15, %v2949_v14, %v2917_v63  ;;  %v2726_v14 = vand.u32 2147483647, %v6217_v60  ;;  %vm9019_vm15 = vcmp.gt.f32.partialorder %v6249_v45, 0.0  ;;  %v9349_v60 = vld [vmem:[#allocation42_spill] sm:$0xff] }
 0x1d6   : > { %v3013_v35 = vand.u32 2147483647, %v6241_v40  ;;  %4330 = vmatmul.msk.f32.vlgmr.msra.gmra.mxu3 %vm406_vm0, %v4633_v28  ;;  %4426 = vmatmul.msk.f32.vlgmr.msra.gmra.mxu2 %vm406_vm0, %v4633_v28  ;;  %v1020_v54 = vpop.f32.mrf.mxu0  ;;  %9298 = vst [vmem:[#allocation32_spill] sm:$0xff] %v6253_v13  ;;  %vm9020_vm9 = vcmp.gt.f32.partialorder %v6253_v13, 0.0 }
 0x1d7   : > { %v2474_v62 = vsub.f32 %v1020_v54, %v5616_v44  ;;  %v1133_v63 = vpop.f32.mrf.mxu1 }
 0x1d8   : > { %v6255_v18 = vmin.f32 %v2853_v61, %v3013_v35  ;;  %v2475_v12 = vsub.f32 %v1133_v63, %v5621_v11  ;;  %v2486_v61 = vsub.f32 %v5404_v30, %v5369_v41  ;;  %v2487_v35 = vsub.f32 %v5406_v10, %v5372_v39 }
 0x1d9   : > { %v907_v56 = vpop.f32.mrf.mxu3  ;;  %v1246_v24 = vpop.f32.mrf.mxu2  ;;  %4362 = vmatmul.msk.f32.vlgmr.msra.gmra.mxu0 %vm406_vm0, %v4633_v28 }
 0x1da   : > { %9299 = vst [vmem:[#allocation78_spill] sm:$0xff] %v6255_v18  ;;  %v2473_v32 = vsub.f32 %v907_v56, %v5628_v0  ;;  %v2476_v2 = vsub.f32 %v1246_v24, %v5631_v4  ;;  %4394 = vmatmul.msk.f32.vlgmr.msra.gmra.mxu1 %vm406_vm0, %v4633_v28  ;;  %v2854_v24 = vmin.f32 %v2726_v14, %v2822_v48  ;;  %v4634_v18 = vld [vmem:[%s4821_s15 + $0x8] sm:$0xff] }
 0x1db   : > { %v6285_v28 = vsel %vm9020_vm9, %v2487_v35, %v2486_v61 }
 0x1dc   : > { %v2918_v54 = vsel %vm9019_vm15, %v2474_v62, %v2473_v32  ;;  %v2950_v63 = vsel %vm9019_vm15, %v2476_v2, %v2475_v12  ;;  %9301 = vst [vmem:[#allocation80_spill] sm:$0xff] %v6285_v28  ;;  %v6289_v62 = vsub.f32 %v5426_v51, %v5354_v43  ;;  %v2823_v61 = vand.u32 2147483647, %v6285_v28 }
 0x1dd   : > { %v6277_v56 = vsel %vm9018_vm11, %v2950_v63, %v2918_v54  ;;  %v2727_v63 = vand.u32 2147483647, %v6253_v13  ;;  %vm9021_vm11 = vcmp.gt.f32.partialorder %v6285_v28, 0.0  ;;  %v4639_v13 = vld [vmem:[%s4821_s15 + $0x28] sm:$0xff] }
 0x1de   : > { %9300 = vst [vmem:[#allocation79_spill] sm:$0xff] %v6277_v56  ;;  %v3014_v30 = vand.u32 2147483647, %v6277_v56  ;;  %4331 = vmatmul.msk.f32.gmra.mxu3 %vm406_vm0, %v4634_v18  ;;  %4427 = vmatmul.msk.f32.gmra.mxu2 %vm406_vm0, %v4634_v18  ;;  %v1023_v10 = vpop.f32.mrf.mxu0  ;;  %vm9024_vm15 = vcmp.gt.f32.partialorder %v6289_v62, 0.0 }
 0x1df   : > { %9302 = vst [vmem:[#allocation81_spill] sm:$0xff] %v6289_v62  ;;  %v2489_v14 = vsub.f32 %v1023_v10, %v5616_v44  ;;  %v1136_v48 = vpop.f32.mrf.mxu1 }
 0x1e0   : > { %v6291_v12 = vmin.f32 %v2854_v24, %v3014_v30  ;;  %v2490_v2 = vsub.f32 %v1136_v48, %v5621_v11  ;;  %v2501_v24 = vsub.f32 %v5434_v3, %v5369_v41  ;;  %v2502_v30 = vsub.f32 %v5436_v6, %v5372_v39 }
 0x1e1   : > { %v910_v32 = vpop.f32.mrf.mxu3  ;;  %v1249_v54 = vpop.f32.mrf.mxu2  ;;  %4363 = vmatmul.msk.f32.gmra.mxu0 %vm406_vm0, %v4634_v18 }
 0x1e2   : > { %9303 = vst [vmem:[#allocation82_spill] sm:$0xff] %v6291_v12  ;;  %v2488_v35 = vsub.f32 %v910_v32, %v5628_v0  ;;  %v2491_v51 = vsub.f32 %v1249_v54, %v5631_v4  ;;  %4395 = vmatmul.msk.f32.gmra.mxu1 %vm406_vm0, %v4634_v18  ;;  %v2855_v54 = vmin.f32 %v2727_v63, %v2823_v61  ;;  %v4635_v12 = vld [vmem:[%s4821_s15 + $0x10] sm:$0xff] }
 0x1e3   : > { %v6321_v18 = vsel %vm9024_vm15, %v2502_v30, %v2501_v24 }
 0x1e4   : > { %v2919_v10 = vsel %vm9021_vm11, %v2489_v14, %v2488_v35  ;;  %v2951_v48 = vsel %vm9021_vm11, %v2491_v51, %v2490_v2  ;;  %9305 = vst [vmem:[#allocation84_spill] sm:$0xff] %v6321_v18  ;;  %v6325_v14 = vsub.f32 %v5456_v49, %v5354_v43  ;;  %v2824_v24 = vand.u32 2147483647, %v6321_v18 }
 0x1e5   : > { %v6313_v32 = vsel %vm9020_vm9, %v2951_v48, %v2919_v10  ;;  %v2728_v48 = vand.u32 2147483647, %v6289_v62  ;;  %vm9025_vm9 = vcmp.gt.f32.partialorder %v6321_v18, 0.0 }
 0x1e6   : > { %9304 = vst [vmem:[#allocation83_spill] sm:$0xff] %v6313_v32  ;;  %v3015_v3 = vand.u32 2147483647, %v6313_v32  ;;  %4332 = vmatmul.msk.f32.gmra.mxu3 %vm406_vm0, %v4635_v12  ;;  %4428 = vmatmul.msk.f32.gmra.mxu2 %vm406_vm0, %v4635_v12  ;;  %v1026_v6 = vpop.f32.mrf.mxu0  ;;  %vm9026_vm11 = vcmp.gt.f32.partialorder %v6325_v14, 0.0  ;;  %v2729_v62 = vand.u32 2147483647, %v6325_v14 }
 0x1e7   : > { %9306 = vst [vmem:[#allocation85_spill] sm:$0xff] %v6325_v14  ;;  %v2504_v63 = vsub.f32 %v1026_v6, %v5616_v44  ;;  %v1139_v61 = vpop.f32.mrf.mxu1 }
 0x1e8   : > { %v6327_v2 = vmin.f32 %v2855_v54, %v3015_v3  ;;  %v2505_v51 = vsub.f32 %v1139_v61, %v5621_v11  ;;  %v2516_v54 = vsub.f32 %v5464_v47, %v5369_v41  ;;  %v2517_v3 = vsub.f32 %v5466_v16, %v5372_v39 }
 0x1e9   : > { %v913_v35 = vpop.f32.mrf.mxu3  ;;  %v1252_v10 = vpop.f32.mrf.mxu2  ;;  %4364 = vmatmul.msk.f32.gmra.mxu0 %vm406_vm0, %v4635_v12 }
 0x1ea   : > { %9307 = vst [vmem:[#allocation86_spill] sm:$0xff] %v6327_v2  ;;  %v2503_v30 = vsub.f32 %v913_v35, %v5628_v0  ;;  %v2506_v49 = vsub.f32 %v1252_v10, %v5631_v4  ;;  %4396 = vmatmul.msk.f32.gmra.mxu1 %vm406_vm0, %v4635_v12  ;;  %v2856_v10 = vmin.f32 %v2728_v48, %v2824_v24  ;;  %v4636_v2 = vld [vmem:[%s4821_s15 + $0x18] sm:$0xff] }
 0x1eb   : > { %v6357_v12 = vsel %vm9026_vm11, %v2517_v3, %v2516_v54 }
 0x1ec   : > { %v2920_v6 = vsel %vm9025_vm9, %v2504_v63, %v2503_v30  ;;  %v2952_v61 = vsel %vm9025_vm9, %v2506_v49, %v2505_v51  ;;  %9309 = vst [vmem:[#allocation88_spill] sm:$0xff] %v6357_v12  ;;  %v9310_v63 = vld [vmem:[#allocation43_spill] sm:$0xff]  ;;  %v2825_v54 = vand.u32 2147483647, %v6357_v12 }
 0x1ed   : > { %v6349_v35 = vsel %vm9024_vm15, %v2952_v61, %v2920_v6  ;;  %v6361_v51 = vsub.f32 %v9310_v63, %v5354_v43  ;;  %vm9029_vm15 = vcmp.gt.f32.partialorder %v6357_v12, 0.0 }
 0x1ee   : > { %9308 = vst [vmem:[#allocation87_spill] sm:$0xff] %v6349_v35  ;;  %v3016_v47 = vand.u32 2147483647, %v6349_v35  ;;  %4333 = vmatmul.msk.f32.gmra.mxu3 %vm406_vm0, %v4636_v2  ;;  %4429 = vmatmul.msk.f32.gmra.mxu2 %vm406_vm0, %v4636_v2  ;;  %v1029_v16 = vpop.f32.mrf.mxu0 }
 0x1ef   : > { %9311 = vst [vmem:[#allocation43_spill] sm:$0xff] %v6361_v51  ;;  %v2519_v48 = vsub.f32 %v1029_v16, %v5616_v44  ;;  %v1142_v24 = vpop.f32.mrf.mxu1  ;;  %vm9032_vm9 = vcmp.gt.f32.partialorder %v6361_v51, 0.0 }
 0x1f0   : > { %v6363_v30 = vmin.f32 %v2856_v10, %v3016_v47  ;;  %v2520_v6 = vsub.f32 %v1142_v24, %v5621_v11  ;;  %v2531_v10 = vsub.f32 %v5497_v22, %v5369_v41  ;;  %v2532_v47 = vsub.f32 %v5499_v27, %v5372_v39 }
 0x1f1   : > { %v916_v49 = vpop.f32.mrf.mxu3  ;;  %v1255_v61 = vpop.f32.mrf.mxu2  ;;  %4365 = vmatmul.msk.f32.gmra.mxu0 %vm406_vm0, %v4636_v2 }
 0x1f2   : > { %9312 = vst [vmem:[#allocation89_spill] sm:$0xff] %v6363_v30  ;;  %v2518_v3 = vsub.f32 %v916_v49, %v5628_v0  ;;  %v2521_v63 = vsub.f32 %v1255_v61, %v5631_v4  ;;  %4397 = vmatmul.msk.f32.gmra.mxu1 %vm406_vm0, %v4636_v2  ;;  %v2857_v61 = vmin.f32 %v2729_v62, %v2825_v54  ;;  %v4637_v30 = vld [vmem:[%s4821_s15 + $0x20] sm:$0xff] }
 0x1f3   : > { %v6393_v2 = vsel %vm9032_vm9, %v2532_v47, %v2531_v10 }
 0x1f4   : > { %v2921_v16 = vsel %vm9029_vm15, %v2519_v48, %v2518_v3  ;;  %v2953_v24 = vsel %vm9029_vm15, %v2521_v63, %v2520_v6  ;;  %9314 = vst [vmem:[#allocation91_spill] sm:$0xff] %v6393_v2  ;;  %v6397_v48 = vsub.f32 %v5519_v33, %v5354_v43  ;;  %v4638_v3 = vld [vmem:[%s8904_s1 + $0xa0] sm:$0xff] }
 0x1f5   : > { %v6385_v49 = vsel %vm9026_vm11, %v2953_v24, %v2921_v16  ;;  %v383_v63 = vunpack.c.h.bf16 %v4638_v3  ;;  %v333_v16 = vld [vmem:[%s8904_s1 + $0xb0] sm:$0xf]  ;;  %vm9033_vm11 = vcmp.gt.f32.partialorder %v6393_v2, 0.0 }
 0x1f6   : > { %9313 = vst [vmem:[#allocation90_spill] sm:$0xff] %v6385_v49  ;;  %v3017_v22 = vand.u32 2147483647, %v6385_v49  ;;  %4334 = vmatmul.msk.f32.gmra.mxu3 %vm406_vm0, %v4637_v30  ;;  %4430 = vmatmul.msk.f32.gmra.mxu2 %vm406_vm0, %v4637_v30  ;;  %v1032_v27 = vpop.f32.mrf.mxu0  ;;  %v386_v33 = vunpack.c.l.bf16 %v333_v16  ;;  %vm9034_vm15 = vcmp.gt.f32.partialorder %v6397_v48, 0.0 }
 0x1f7   : > { %9315 = vst [vmem:[#allocation92_spill] sm:$0xff] %v6397_v48  ;;  %v2534_v62 = vsub.f32 %v1032_v27, %v5616_v44  ;;  %v1145_v54 = vpop.f32.mrf.mxu1  ;;  %1759 = vmatpush.msrb.mxu3 %v383_v63 }
 0x1f8   : > { %v6399_v6 = vmin.f32 %v2857_v61, %v3017_v22  ;;  %v2535_v47 = vsub.f32 %v1145_v54, %v5621_v11  ;;  %v2730_v61 = vand.u32 2147483647, %v6361_v51  ;;  %v2826_v22 = vand.u32 2147483647, %v6393_v2  ;;  %v9317_v54 = vld [vmem:[#allocation49_spill] sm:$0xff]  ;;  %2098 = vmatpush.msrb.mxu2 %v386_v33 }
 0x1f9   : > { %v919_v10 = vpop.f32.mrf.mxu3  ;;  %v1258_v24 = vpop.f32.mrf.mxu2  ;;  %4366 = vmatmul.msk.f32.gmra.mxu0 %vm406_vm0, %v4637_v30  ;;  %v2547_v14 = vsub.f32 %v9317_v54, %v5372_v39  ;;  %v4645_v51 = vld [vmem:[%s4821_s15 + $0x58] sm:$0xff] }
 0x1fa   : > { %9316 = vst [vmem:[#allocation93_spill] sm:$0xff] %v6399_v6  ;;  %v2533_v27 = vsub.f32 %v919_v10, %v5628_v0  ;;  %v2536_v3 = vsub.f32 %v1258_v24, %v5631_v4  ;;  %v2546_v6 = vsub.f32 %v5527_v57, %v5369_v41  ;;  %4398 = vmatmul.msk.f32.gmra.mxu1 %vm406_vm0, %v4637_v30 }
 0x1fb   : > { %v2858_v24 = vmin.f32 %v2730_v61, %v2826_v22 }
 0x1fc   : > { %v2922_v16 = vsel %vm9033_vm11, %v2534_v62, %v2533_v27  ;;  %v2954_v10 = vsel %vm9033_vm11, %v2536_v3, %v2535_v47  ;;  %v6435_v33 = vsel %vm9034_vm15, %v2547_v14, %v2546_v6  ;;  %v6439_v62 = vsub.f32 %v5552_v53, %v5354_v43  ;;  %v332_v27 = vld [vmem:[%s8904_s1 + $0xa8] sm:$0xff] }
 0x1fd   : > { %v6427_v63 = vsel %vm9032_vm9, %v2954_v10, %v2922_v16  ;;  %9319 = vst [vmem:[#allocation94_spill] sm:$0xff] %v6435_v33  ;;  %v384_v14 = vunpack.c.l.bf16 %v332_v27  ;;  %v385_v6 = vunpack.c.h.bf16 %v332_v27  ;;  %v2731_v53 = vand.u32 2147483647, %v6397_v48  ;;  %v9344_v48 = vld [vmem:[#allocation39_spill] sm:$0xff] }
 0x1fe   : > { %9318 = vst [vmem:[#allocation49_spill] sm:$0xff] %v6427_v63  ;;  %v3018_v57 = vand.u32 2147483647, %v6427_v63  ;;  %4335 = vmatmul.msk.f32.gmra.mxu3 %vm406_vm0, %v4639_v13  ;;  %4431 = vmatmul.msk.f32.gmra.mxu2 %vm406_vm0, %v4639_v13  ;;  %v1035_v30 = vpop.f32.mrf.mxu0  ;;  %v2827_v10 = vand.u32 2147483647, %v6435_v33  ;;  %vm9035_vm9 = vcmp.gt.f32.partialorder %v6435_v33, 0.0 }
 0x1ff   : > { %9320 = vst [vmem:[#allocation95_spill] sm:$0xff] %v6439_v62  ;;  %v2549_v61 = vsub.f32 %v1035_v30, %v5616_v44  ;;  %v1148_v22 = vpop.f32.mrf.mxu1  ;;  %v2561_v30 = vsub.f32 %v5560_v58, %v5369_v41  ;;  %1872 = vmatpush.msrb.mxu0 %v384_v14  ;;  %vm9036_vm11 = vcmp.gt.f32.partialorder %v6439_v62, 0.0  ;;  %1985 = vmatpush.msrb.mxu1 %v385_v6 }
 0x200   : > { %v6441_v47 = vmin.f32 %v2858_v24, %v3018_v57  ;;  %v2550_v54 = vsub.f32 %v1148_v22, %v5621_v11  ;;  %v2562_v22 = vsub.f32 %v5562_v34, %v5372_v39  ;;  %v2859_v58 = vmin.f32 %v2731_v53, %v2827_v10  ;;  %v4640_v34 = vld [vmem:[%s4821_s15 + $0x30] sm:$0xff] }
 0x201   : > { %v922_v3 = vpop.f32.mrf.mxu3  ;;  %v1261_v16 = vpop.f32.mrf.mxu2  ;;  %4367 = vmatmul.msk.f32.gmra.mxu0 %vm406_vm0, %v4639_v13 }
 0x202   : > { %9321 = vst [vmem:[#allocation96_spill] sm:$0xff] %v6441_v47  ;;  %v2548_v24 = vsub.f32 %v922_v3, %v5628_v0  ;;  %v2551_v57 = vsub.f32 %v1261_v16, %v5631_v4  ;;  %4399 = vmatmul.msk.f32.gmra.mxu1 %vm406_vm0, %v4639_v13 }
 0x204   : > { %v2923_v27 = vsel %vm9035_vm9, %v2549_v61, %v2548_v24  ;;  %v2955_v3 = vsel %vm9035_vm9, %v2551_v57, %v2550_v54  ;;  %v6474_v61 = vsel %vm9036_vm11, %v2562_v22, %v2561_v30  ;;  %v9324_v54 = vld [vmem:[#allocation54_spill] sm:$0xff] }
 0x205   : > { %v6466_v16 = vsel %vm9034_vm15, %v2955_v3, %v2923_v27  ;;  %9323 = vst [vmem:[#allocation98_spill] sm:$0xff] %v6474_v61  ;;  %v6478_v14 = vsub.f32 %v9324_v54, %v5354_v43  ;;  %v2732_v3 = vand.u32 2147483647, %v6439_v62  ;;  %v2828_v30 = vand.u32 2147483647, %v6474_v61  ;;  %v4644_v62 = vld [vmem:[%s4821_s15 + $0x50] sm:$0xff] }
 0x206   : > { %9322 = vst [vmem:[#allocation97_spill] sm:$0xff] %v6466_v16  ;;  %v3019_v47 = vand.u32 2147483647, %v6466_v16  ;;  %4336 = vmatmul.msk.f32.gmra.mxu3 %vm406_vm0, %v4640_v34  ;;  %4432 = vmatmul.msk.f32.gmra.mxu2 %vm406_vm0, %v4640_v34  ;;  %v1038_v13 = vpop.f32.mrf.mxu0  ;;  %vm9100_vm15 = vcmp.gt.f32.partialorder %v6474_v61, 0.0 }
 0x207   : > { %9325 = vst [vmem:[#allocation54_spill] sm:$0xff] %v6478_v14  ;;  %v2564_v53 = vsub.f32 %v1038_v13, %v5616_v44  ;;  %v1151_v10 = vpop.f32.mrf.mxu1  ;;  %v9328_v13 = vld [vmem:[#allocation59_spill] sm:$0xff]  ;;  %vm9037_vm9 = vcmp.gt.f32.partialorder %v6478_v14, 0.0 }
 0x208   : > { %v6480_v6 = vmin.f32 %v2859_v58, %v3019_v47  ;;  %v2565_v57 = vsub.f32 %v1151_v10, %v5621_v11  ;;  %v9327_v47 = vld [vmem:[#allocation58_spill] sm:$0xff]  ;;  %v2577_v54 = vsub.f32 %v9328_v13, %v5372_v39  ;;  %v2733_v13 = vand.u32 2147483647, %v6478_v14  ;;  %v4643_v14 = vld [vmem:[%s4821_s15 + $0x48] sm:$0xff] }
 0x209   : > { %v925_v24 = vpop.f32.mrf.mxu3  ;;  %v1264_v27 = vpop.f32.mrf.mxu2  ;;  %4368 = vmatmul.msk.f32.gmra.mxu0 %vm406_vm0, %v4640_v34  ;;  %v2576_v58 = vsub.f32 %v9327_v47, %v5369_v41  ;;  %v4641_v47 = vld [vmem:[%s4821_s15 + $0x38] sm:$0xff] }
 0x20a   : > { %9326 = vst [vmem:[#allocation99_spill] sm:$0xff] %v6480_v6  ;;  %v2563_v22 = vsub.f32 %v925_v24, %v5628_v0  ;;  %v2566_v43 = vsub.f32 %v1264_v27, %v5631_v4  ;;  %4400 = vmatmul.msk.f32.gmra.mxu1 %vm406_vm0, %v4640_v34  ;;  %v2860_v6 = vmin.f32 %v2732_v3, %v2828_v30 }
 0x20b   : > { %v6510_v34 = vsel %vm9037_vm9, %v2577_v54, %v2576_v58 }
 0x20c   : > { %v2924_v10 = vsel %vm9100_vm15, %v2564_v53, %v2563_v22  ;;  %v2956_v24 = vsel %vm9100_vm15, %v2566_v43, %v2565_v57  ;;  %9330 = vst [vmem:[#allocation59_spill] sm:$0xff] %v6510_v34 }
 0x20d   : > { %v6502_v27 = vsel %vm9036_vm11, %v2956_v24, %v2924_v10  ;;  %v2829_v10 = vand.u32 2147483647, %v6510_v34  ;;  %vm9101_vm11 = vcmp.gt.f32.partialorder %v6510_v34, 0.0 }
 0x20e   : > { %9329 = vst [vmem:[#allocation58_spill] sm:$0xff] %v6502_v27  ;;  %v3020_v41 = vand.u32 2147483647, %v6502_v27  ;;  %4337 = vmatmul.msk.f32.gmra.mxu3 %vm406_vm0, %v4641_v47  ;;  %4433 = vmatmul.msk.f32.gmra.mxu2 %vm406_vm0, %v4641_v47  ;;  %v1041_v39 = vpop.f32.mrf.mxu0 }
 0x20f   : > { %v2579_v57 = vsub.f32 %v1041_v39, %v5616_v44  ;;  %v1154_v22 = vpop.f32.mrf.mxu1  ;;  %v2861_v39 = vmin.f32 %v2733_v13, %v2829_v10 }
 0x210   : > { %v6512_v53 = vmin.f32 %v2860_v6, %v3020_v41  ;;  %v2580_v3 = vsub.f32 %v1154_v22, %v5621_v11 }
 0x211   : > { %v928_v43 = vpop.f32.mrf.mxu3  ;;  %v1267_v30 = vpop.f32.mrf.mxu2  ;;  %4369 = vmatmul.msk.f32.gmra.mxu0 %vm406_vm0, %v4641_v47 }
 0x212   : > { %9331 = vst [vmem:[#allocation100_spill] sm:$0xff] %v6512_v53  ;;  %v2578_v24 = vsub.f32 %v928_v43, %v5628_v0  ;;  %v2581_v58 = vsub.f32 %v1267_v30, %v5631_v4  ;;  %4401 = vmatmul.msk.f32.gmra.mxu1 %vm406_vm0, %v4641_v47  ;;  %v4642_v43 = vld [vmem:[%s4821_s15 + $0x40] sm:$0xff]  ;;  %v9339_v53 = vld [vmem:[#allocation36_spill] sm:$0xff] }
 0x214   : > { %v2925_v6 = vsel %vm9101_vm11, %v2579_v57, %v2578_v24  ;;  %v2957_v54 = vsel %vm9101_vm11, %v2581_v58, %v2580_v3 }
 0x215   : > { %v6529_v41 = vsel %vm9037_vm9, %v2957_v54, %v2925_v6  ;;  %v9334_v54 = vld [vmem:[#allocation33_spill] sm:$0xff] }
 0x216   : > { %9332 = vst [vmem:[#allocation101_spill] sm:$0xff] %v6529_v41  ;;  %v3021_v22 = vand.u32 2147483647, %v6529_v41  ;;  %4338 = vmatmul.msk.f32.gmra.mxu3 %vm406_vm0, %v4642_v43  ;;  %4434 = vmatmul.msk.f32.gmra.mxu2 %vm406_vm0, %v4642_v43  ;;  %v1044_v30 = vpop.f32.mrf.mxu0  ;;  %vm9102_vm9 = vcmp.gt.f32.partialorder %v9334_v54, 0.0 }
 0x217   : > { %v2594_v57 = vsub.f32 %v1044_v30, %v5616_v44  ;;  %v1157_v24 = vpop.f32.mrf.mxu1 }
 0x218   : > { %v6535_v47 = vmin.f32 %v2861_v39, %v3021_v22  ;;  %v2595_v58 = vsub.f32 %v1157_v24, %v5621_v11 }
 0x219   : > { %v931_v3 = vpop.f32.mrf.mxu3  ;;  %v1270_v6 = vpop.f32.mrf.mxu2  ;;  %4370 = vmatmul.msk.f32.gmra.mxu0 %vm406_vm0, %v4642_v43 }
 0x21a   : > { %9333 = vst [vmem:[#allocation102_spill] sm:$0xff] %v6535_v47  ;;  %v2593_v13 = vsub.f32 %v931_v3, %v5628_v0  ;;  %v2596_v10 = vsub.f32 %v1270_v6, %v5631_v4  ;;  %4402 = vmatmul.msk.f32.gmra.mxu1 %vm406_vm0, %v4642_v43  ;;  %v9337_v6 = vld [vmem:[#allocation35_spill] sm:$0xff] }
 0x21c   : > { %v2926_v39 = vsel %vm9102_vm9, %v2594_v57, %v2593_v13  ;;  %v2958_v22 = vsel %vm9102_vm9, %v2596_v10, %v2595_v58 }
 0x21d   : > { %v6550_v24 = vsel %vm9040_vm1, %v2958_v22, %v2926_v39  ;;  %vm9103_vm1 = vcmp.gt.f32.partialorder %v9339_v53, 0.0 }
 0x21e   : > { %9336 = vst [vmem:[#allocation103_spill] sm:$0xff] %v6550_v24  ;;  %v3022_v47 = vand.u32 2147483647, %v6550_v24  ;;  %4339 = vmatmul.msk.f32.gmra.mxu3 %vm406_vm0, %v4643_v14  ;;  %4435 = vmatmul.msk.f32.gmra.mxu2 %vm406_vm0, %v4643_v14  ;;  %v1047_v3 = vpop.f32.mrf.mxu0 }
 0x21f   : > { %v2609_v57 = vsub.f32 %v1047_v3, %v5616_v44  ;;  %v1160_v13 = vpop.f32.mrf.mxu1 }
 0x220   : > { %v6557_v43 = vmin.f32 %v9337_v6, %v3022_v47  ;;  %v2610_v10 = vsub.f32 %v1160_v13, %v5621_v11 }
 0x221   : > { %v934_v58 = vpop.f32.mrf.mxu3  ;;  %v1273_v39 = vpop.f32.mrf.mxu2  ;;  %4371 = vmatmul.msk.f32.gmra.mxu0 %vm406_vm0, %v4643_v14 }
 0x222   : > { %9338 = vst [vmem:[#allocation35_spill] sm:$0xff] %v6557_v43  ;;  %v2608_v22 = vsub.f32 %v934_v58, %v5628_v0  ;;  %v2611_v30 = vsub.f32 %v1273_v39, %v5631_v4  ;;  %4403 = vmatmul.msk.f32.gmra.mxu1 %vm406_vm0, %v4643_v14  ;;  %v9342_v39 = vld [vmem:[#allocation38_spill] sm:$0xff] }
 0x224   : > { %v2927_v47 = vsel %vm9103_vm1, %v2609_v57, %v2608_v22  ;;  %v2959_v3 = vsel %vm9103_vm1, %v2611_v30, %v2610_v10 }
 0x225   : > { %v6572_v13 = vsel %vm9045_vm2, %v2959_v3, %v2927_v47  ;;  %vm9105_vm2 = vcmp.gt.f32.partialorder %v9344_v48, 0.0 }
 0x226   : > { %9341 = vst [vmem:[#allocation104_spill] sm:$0xff] %v6572_v13  ;;  %v3023_v43 = vand.u32 2147483647, %v6572_v13  ;;  %4340 = vmatmul.msk.f32.gmra.mxu3 %vm406_vm0, %v4644_v62  ;;  %4436 = vmatmul.msk.f32.gmra.mxu2 %vm406_vm0, %v4644_v62  ;;  %v1050_v58 = vpop.f32.mrf.mxu0 }
 0x227   : > { %v2624_v57 = vsub.f32 %v1050_v58, %v5616_v44  ;;  %v1163_v22 = vpop.f32.mrf.mxu1 }
 0x228   : > { %v6579_v14 = vmin.f32 %v9342_v39, %v3023_v43  ;;  %v2625_v10 = vsub.f32 %v1163_v22, %v5621_v11 }
 0x229   : > { %v937_v30 = vpop.f32.mrf.mxu3  ;;  %v1276_v47 = vpop.f32.mrf.mxu2  ;;  %4372 = vmatmul.msk.f32.gmra.mxu0 %vm406_vm0, %v4644_v62 }
 0x22a   : > { %9343 = vst [vmem:[#allocation38_spill] sm:$0xff] %v6579_v14  ;;  %v2623_v3 = vsub.f32 %v937_v30, %v5628_v0  ;;  %v2626_v6 = vsub.f32 %v1276_v47, %v5631_v4  ;;  %4404 = vmatmul.msk.f32.gmra.mxu1 %vm406_vm0, %v4644_v62  ;;  %v9347_v47 = vld [vmem:[#allocation41_spill] sm:$0xff] }
 0x22c   : > { %v2928_v43 = vsel %vm9105_vm2, %v2624_v57, %v2623_v3  ;;  %v2960_v58 = vsel %vm9105_vm2, %v2626_v6, %v2625_v10 }
 0x22d   : > { %v6594_v22 = vsel %vm9050_vm3, %v2960_v58, %v2928_v43  ;;  %vm9108_vm3 = vcmp.gt.f32.partialorder %v9349_v60, 0.0 }
 0x22e   : > { %9346 = vst [vmem:[#allocation105_spill] sm:$0xff] %v6594_v22  ;;  %v3024_v14 = vand.u32 2147483647, %v6594_v22  ;;  %4341 = vmatmul.msk.f32.gmra.mxu3 %vm406_vm0, %v4645_v51  ;;  %4437 = vmatmul.msk.f32.gmra.mxu2 %vm406_vm0, %v4645_v51  ;;  %v1053_v30 = vpop.f32.mrf.mxu0 }
 0x22f   : > { %v2639_v57 = vsub.f32 %v1053_v30, %v5616_v44  ;;  %v1166_v3 = vpop.f32.mrf.mxu1 }
 0x230   : > { %v6601_v62 = vmin.f32 %v9347_v47, %v3024_v14  ;;  %v2640_v10 = vsub.f32 %v1166_v3, %v5621_v11 }
 0x231   : > { %v940_v6 = vpop.f32.mrf.mxu3  ;;  %v1279_v43 = vpop.f32.mrf.mxu2  ;;  %4373 = vmatmul.msk.f32.gmra.mxu0 %vm406_vm0, %v4645_v51 }
 0x232   : > { %9348 = vst [vmem:[#allocation41_spill] sm:$0xff] %v6601_v62  ;;  %v2638_v58 = vsub.f32 %v940_v6, %v5628_v0  ;;  %v2641_v39 = vsub.f32 %v1279_v43, %v5631_v4  ;;  %4405 = vmatmul.msk.f32.gmra.mxu1 %vm406_vm0, %v4645_v51  ;;  %v9352_v43 = vld [vmem:[#allocation45_spill] sm:$0xff] }
 0x234   : > { %v2929_v14 = vsel %vm9108_vm3, %v2639_v57, %v2638_v58  ;;  %v2961_v30 = vsel %vm9108_vm3, %v2641_v39, %v2640_v10  ;;  %v4647_v39 = vld [vmem:[%s8904_s1 + $0x64] sm:$0xff] }
 0x235   : > { %v6616_v3 = vsel %vm9054_vm4, %v2961_v30, %v2929_v14  ;;  %v368_v10 = vunpack.c.h.bf16 %v4647_v39  ;;  %v325_v14 = vld [vmem:[%s8904_s1 + $0x74] sm:$0xf] }
 0x236   : > { %9351 = vst [vmem:[#allocation106_spill] sm:$0xff] %v6616_v3  ;;  %v3025_v62 = vand.u32 2147483647, %v6616_v3  ;;  %4342 = vmatmul.msk.f32.gmra.mxu3 %vm406_vm0, %v4646_v19  ;;  %4438 = vmatmul.msk.f32.gmra.mxu2 %vm406_vm0, %v4646_v19  ;;  %v1056_v6 = vpop.f32.mrf.mxu0 }
 0x237   : > { %v2654_v57 = vsub.f32 %v1056_v6, %v5616_v44  ;;  %v1169_v58 = vpop.f32.mrf.mxu1  ;;  %1760 = vmatpush.msrb.mxu3 %v368_v10 }
 0x238   : > { %v6623_v51 = vmin.f32 %v9352_v43, %v3025_v62  ;;  %v2655_v47 = vsub.f32 %v1169_v58, %v5621_v11  ;;  %v371_v62 = vunpack.c.l.bf16 %v325_v14  ;;  %v4648_v14 = vld [vmem:[%s4821_s15 + $0x68] sm:$0xff] }
 0x239   : > { %v943_v30 = vpop.f32.mrf.mxu3  ;;  %v1282_v60 = vpop.f32.mrf.mxu2  ;;  %4374 = vmatmul.msk.f32.gmra.mxu0 %vm406_vm0, %v4646_v19 }
 0x23a   : > { %9353 = vst [vmem:[#allocation45_spill] sm:$0xff] %v6623_v51  ;;  %v2653_v6 = vsub.f32 %v943_v30, %v5628_v0  ;;  %v2656_v43 = vsub.f32 %v1282_v60, %v5631_v4  ;;  %v9354_v51 = vld [vmem:[#allocation46_spill] sm:$0xff]  ;;  %4406 = vmatmul.msk.f32.gmra.mxu1 %vm406_vm0, %v4646_v19  ;;  %2099 = vmatpush.msrb.mxu2 %v371_v62  ;;  %v324_v60 = vld [vmem:[%s8904_s1 + $0x6c] sm:$0xff] }
 0x23b   : > { %vm9110_vm4 = vcmp.gt.f32.partialorder %v9354_v51, 0.0  ;;  %v370_v30 = vunpack.c.h.bf16 %v324_v60  ;;  %v9357_v62 = vld [vmem:[#allocation48_spill] sm:$0xff] }
 0x23c   : > { %v2930_v39 = vsel %vm9110_vm4, %v2654_v57, %v2653_v6  ;;  %v2962_v58 = vsel %vm9110_vm4, %v2656_v43, %v2655_v47  ;;  %v369_v57 = vunpack.c.l.bf16 %v324_v60  ;;  %v9359_v60 = vld [vmem:[#allocation50_spill] sm:$0xff] }
 0x23d   : > { %v6644_v48 = vsel %vm9061_vm5, %v2962_v58, %v2930_v39  ;;  %1986 = vmatpush.msrb.mxu1 %v370_v30  ;;  %vm9111_vm5 = vcmp.gt.f32.partialorder %v9359_v60, 0.0  ;;  %v4650_v60 = vld [vmem:[%s4821_s15 + $0x78] sm:$0xff] }
 0x23e   : > { %9356 = vst [vmem:[#allocation107_spill] sm:$0xff] %v6644_v48  ;;  %v3026_v10 = vand.u32 2147483647, %v6644_v48  ;;  %4343 = vmatmul.msk.f32.gmra.mxu3 %vm406_vm0, %v4648_v14  ;;  %4439 = vmatmul.msk.f32.gmra.mxu2 %vm406_vm0, %v4648_v14  ;;  %v1059_v19 = vpop.f32.mrf.mxu0 }
 0x23f   : > { %v2669_v6 = vsub.f32 %v1059_v19, %v5616_v44  ;;  %v1172_v43 = vpop.f32.mrf.mxu1  ;;  %1873 = vmatpush.msrb.mxu0 %v369_v57 }
 0x240   : > { %v6654_v47 = vmin.f32 %v9357_v62, %v3026_v10  ;;  %v2670_v58 = vsub.f32 %v1172_v43, %v5621_v11  ;;  %v4649_v43 = vld [vmem:[%s4821_s15 + $0x70] sm:$0xff] }
 0x241   : > { %v946_v39 = vpop.f32.mrf.mxu3  ;;  %v1285_v3 = vpop.f32.mrf.mxu2  ;;  %4375 = vmatmul.msk.f32.gmra.mxu0 %vm406_vm0, %v4648_v14 }
 0x242   : > { %9358 = vst [vmem:[#allocation48_spill] sm:$0xff] %v6654_v47  ;;  %v2668_v51 = vsub.f32 %v946_v39, %v5628_v0  ;;  %v2671_v48 = vsub.f32 %v1285_v3, %v5631_v4  ;;  %4407 = vmatmul.msk.f32.gmra.mxu1 %vm406_vm0, %v4648_v14  ;;  %v9362_v39 = vld [vmem:[#allocation52_spill] sm:$0xff]  ;;  %v9364_v47 = vld [vmem:[#allocation53_spill] sm:$0xff] }
 0x244   : > { %v2931_v10 = vsel %vm9111_vm5, %v2669_v6, %v2668_v51  ;;  %v2963_v19 = vsel %vm9111_vm5, %v2671_v48, %v2670_v58 }
 0x245   : > { %v6669_v30 = vsel %vm9062_vm6, %v2963_v19, %v2931_v10  ;;  %vm9112_vm6 = vcmp.gt.f32.partialorder %v9364_v47, 0.0 }
 0x246   : > { %9361 = vst [vmem:[#allocation108_spill] sm:$0xff] %v6669_v30  ;;  %v3027_v62 = vand.u32 2147483647, %v6669_v30  ;;  %4344 = vmatmul.msk.f32.gmra.mxu3 %vm406_vm0, %v4649_v43  ;;  %4440 = vmatmul.msk.f32.gmra.mxu2 %vm406_vm0, %v4649_v43  ;;  %v1062_v3 = vpop.f32.mrf.mxu0 }
 0x247   : > { %v2684_v51 = vsub.f32 %v1062_v3, %v5616_v44  ;;  %v1175_v6 = vpop.f32.mrf.mxu1 }
 0x248   : > { %v6676_v14 = vmin.f32 %v9362_v39, %v3027_v62  ;;  %v2685_v58 = vsub.f32 %v1175_v6, %v5621_v11 }
 0x249   : > { %v949_v48 = vpop.f32.mrf.mxu3  ;;  %v1288_v10 = vpop.f32.mrf.mxu2  ;;  %4376 = vmatmul.msk.f32.gmra.mxu0 %vm406_vm0, %v4649_v43 }
 0x24a   : > { %9363 = vst [vmem:[#allocation52_spill] sm:$0xff] %v6676_v14  ;;  %v2683_v19 = vsub.f32 %v949_v48, %v5628_v0  ;;  %v2686_v57 = vsub.f32 %v1288_v10, %v5631_v4  ;;  %4408 = vmatmul.msk.f32.gmra.mxu1 %vm406_vm0, %v4649_v43  ;;  %v9367_v10 = vld [vmem:[#allocation56_spill] sm:$0xff] }
 0x24c   : > { %v2932_v62 = vsel %vm9112_vm6, %v2684_v51, %v2683_v19  ;;  %v2964_v3 = vsel %vm9112_vm6, %v2686_v57, %v2685_v58 }
 0x24d   : > { %v6691_v6 = vsel %vm9065_vm7, %v2964_v3, %v2932_v62  ;;  %v403_v3 = vld [vmem:[%s8905_s2 + $0x8] sm:$0xff] }
 0x24e   : > { %9366 = vst [vmem:[#allocation109_spill] sm:$0xff] %v6691_v6  ;;  %v3028_v14 = vand.u32 2147483647, %v6691_v6  ;;  %4345 = vmatmul.msk.f32.gmra.mxu3 %vm406_vm0, %v4650_v60  ;;  %4441 = vmatmul.msk.f32.gmra.mxu2 %vm406_vm0, %v4650_v60  ;;  %v1065_v48 = vpop.f32.mrf.mxu0 }
 0x24f   : > { %v2699_v51 = vsub.f32 %v1065_v48, %v5616_v44  ;;  %v1178_v19 = vpop.f32.mrf.mxu1  ;;  %v6714_v48 = vperm.slane %v403_v3, 0 }
 0x250   : > { %v6698_v43 = vmin.f32 %v9367_v10, %v3028_v14  ;;  %v2700_v58 = vsub.f32 %v1178_v19, %v5621_v11  ;;  %v9369_v14 = vld [vmem:[#allocation60_spill] sm:$0xff] }
 0x251   : > { %v952_v57 = vpop.f32.mrf.mxu3  ;;  %v1291_v62 = vpop.f32.mrf.mxu2  ;;  %4377 = vmatmul.msk.f32.gmra.mxu0 %vm406_vm0, %v4650_v60  ;;  %vm9125_vm7 = vcmp.gt.f32.partialorder %v9369_v14, 0.0 }
 0x252   : > { %9368 = vst [vmem:[#allocation56_spill] sm:$0xff] %v6698_v43  ;;  %v2698_v39 = vsub.f32 %v952_v57, %v5628_v0  ;;  %v2701_v47 = vsub.f32 %v1291_v62, %v5631_v4  ;;  %4409 = vmatmul.msk.f32.gmra.mxu1 %vm406_vm0, %v4650_v60  ;;  %v6720_v43 = vperm.slane %v403_v3, 1  ;;  %v4651_v4 = vld [vmem:[%s4821_s15 + $0x80] sm:$0xff] }
 0x253   : > { %v4652_v60 = vld [vmem:[%s8905_s2] sm:$0xff] }
 0x254   : > { %v2933_v44 = vsel %vm9125_vm7, %v2699_v51, %v2698_v39  ;;  %v2965_v11 = vsel %vm9125_vm7, %v2701_v47, %v2700_v58  ;;  %v6729_v47 = vperm.slane %v4652_v60, 7  ;;  %v6731_v51 = vperm.slane %v403_v3, 2 }
 0x255   : > { %v6718_v19 = vsel %vm9067_vm8, %v2965_v11, %v2933_v44  ;;  %vm3062_vm8 = vcmp.gt.f32.partialorder %v5665_v8, 0.0 }
 0x256   : > { %9371 = vst [vmem:[#allocation110_spill] sm:$0xff] %v6718_v19  ;;  %v3029_v0 = vand.u32 2147483647, %v6718_v19  ;;  %4346 = vmatmul.msk.f32.gmra.mxu3 %vm406_vm0, %v4651_v4  ;;  %4442 = vmatmul.msk.f32.gmra.mxu2 %vm406_vm0, %v4651_v4  ;;  %v1424_v39 = vpop.f32.mrf.mxu0 }
 0x257   : > { %v2238_v58 = vsub.f32 %v1424_v39, %v6714_v48  ;;  %v1537_v62 = vpop.f32.mrf.mxu1  ;;  %v4653_v39 = vld [vmem:[%s4821_s15 + $0x88] sm:$0xff] }
 0x258   : > { %v6734_v57 = vmin.f32 %v5637_v37, %v3029_v0  ;;  %v2239_v11 = vsub.f32 %v1537_v62, %v6720_v43 }
 0x259   : > { %v1311_v44 = vpop.f32.mrf.mxu3  ;;  %v1650_v10 = vpop.f32.mrf.mxu2  ;;  %4378 = vmatmul.msk.f32.gmra.mxu0 %vm406_vm0, %v4651_v4 }
 0x25a   : > { %9372 = vst [vmem:[#allocation111_spill] sm:$0xff] %v6734_v57  ;;  %v2237_v14 = vsub.f32 %v1311_v44, %v6729_v47  ;;  %v2240_v60 = vsub.f32 %v1650_v10, %v6731_v51  ;;  %4410 = vmatmul.msk.f32.gmra.mxu1 %vm406_vm0, %v4651_v4 }
 0x25c   : > { %v3094_v37 = vsel %vm3062_vm8, %v2238_v58, %v2237_v14  ;;  %v3126_v3 = vsel %vm3062_vm8, %v2240_v60, %v2239_v11 }
 0x25d   : > { %v6749_v0 = vsel %vm9068_vm10, %v3126_v3, %v3094_v37  ;;  %vm3063_vm10 = vcmp.gt.f32.partialorder %v5704_v7, 0.0 }
 0x25e   : > { %4347 = vmatmul.msk.f32.gmra.mxu3 %vm406_vm0, %v4653_v39  ;;  %4443 = vmatmul.msk.f32.gmra.mxu2 %vm406_vm0, %v4653_v39  ;;  %v1427_v10 = vpop.f32.mrf.mxu0 }
 0x25f   : > { %v2253_v62 = vsub.f32 %v1427_v10, %v6714_v48  ;;  %v1540_v4 = vpop.f32.mrf.mxu1 }
 0x260   : > { %v2254_v14 = vsub.f32 %v1540_v4, %v6720_v43  ;;  %v4654_v4 = vld [vmem:[%s4821_s15 + $0x90] sm:$0xff] }
 0x261   : > { %v1314_v44 = vpop.f32.mrf.mxu3  ;;  %v1653_v58 = vpop.f32.mrf.mxu2  ;;  %4379 = vmatmul.msk.f32.gmra.mxu0 %vm406_vm0, %v4653_v39 }
 0x262   : > { %v2252_v11 = vsub.f32 %v1314_v44, %v6729_v47  ;;  %v2255_v60 = vsub.f32 %v1653_v58, %v6731_v51  ;;  %4411 = vmatmul.msk.f32.gmra.mxu1 %vm406_vm0, %v4653_v39 }
 0x264   : > { %v3095_v37 = vsel %vm3063_vm10, %v2253_v62, %v2252_v11  ;;  %v3127_v3 = vsel %vm3063_vm10, %v2255_v60, %v2254_v14 }
 0x265   : > { %v6767_v10 = vsel %vm9069_vm12, %v3127_v3, %v3095_v37  ;;  %vm3064_vm12 = vcmp.gt.f32.partialorder %v5743_v52, 0.0 }
 0x266   : > { %9373 = vst [vmem:[#allocation112_spill] sm:$0xff] %v6767_v10  ;;  %4348 = vmatmul.msk.f32.gmra.mxu3 %vm406_vm0, %v4654_v4  ;;  %4444 = vmatmul.msk.f32.gmra.mxu2 %vm406_vm0, %v4654_v4  ;;  %v1430_v44 = vpop.f32.mrf.mxu0 }
 0x267   : > { %v2268_v58 = vsub.f32 %v1430_v44, %v6714_v48  ;;  %v1543_v39 = vpop.f32.mrf.mxu1 }
 0x268   : > { %v2269_v62 = vsub.f32 %v1543_v39, %v6720_v43  ;;  %v4655_v39 = vld [vmem:[%s4821_s15 + $0x98] sm:$0xff] }
 0x269   : > { %v1317_v57 = vpop.f32.mrf.mxu3  ;;  %v1656_v11 = vpop.f32.mrf.mxu2  ;;  %4380 = vmatmul.msk.f32.gmra.mxu0 %vm406_vm0, %v4654_v4 }
 0x26a   : > { %v2267_v14 = vsub.f32 %v1317_v57, %v6729_v47  ;;  %v2270_v60 = vsub.f32 %v1656_v11, %v6731_v51  ;;  %4412 = vmatmul.msk.f32.gmra.mxu1 %vm406_vm0, %v4654_v4 }
 0x26c   : > { %v3096_v37 = vsel %vm3064_vm12, %v2268_v58, %v2267_v14  ;;  %v3128_v3 = vsel %vm3064_vm12, %v2270_v60, %v2269_v62 }
 0x26d   : > { %v6785_v44 = vsel %vm9070_vm14, %v3128_v3, %v3096_v37  ;;  %vm9074_vm14 = vcmp.gt.f32.partialorder %v5782_v15, 0.0 }
 0x26e   : > { %4349 = vmatmul.msk.f32.gmra.mxu3 %vm406_vm0, %v4655_v39  ;;  %4445 = vmatmul.msk.f32.gmra.mxu2 %vm406_vm0, %v4655_v39  ;;  %v1433_v57 = vpop.f32.mrf.mxu0 }
 0x26f   : > { %v2283_v11 = vsub.f32 %v1433_v57, %v6714_v48  ;;  %v1546_v4 = vpop.f32.mrf.mxu1 }
 0x270   : > { %v2284_v58 = vsub.f32 %v1546_v4, %v6720_v43  ;;  %v4656_v4 = vld [vmem:[%s4821_s15 + $0xa0] sm:$0xff] }
 0x271   : > { %v1320_v10 = vpop.f32.mrf.mxu3  ;;  %v1659_v14 = vpop.f32.mrf.mxu2  ;;  %4381 = vmatmul.msk.f32.gmra.mxu0 %vm406_vm0, %v4655_v39 }
 0x272   : > { %v2282_v62 = vsub.f32 %v1320_v10, %v6729_v47  ;;  %v2285_v60 = vsub.f32 %v1659_v14, %v6731_v51  ;;  %4413 = vmatmul.msk.f32.gmra.mxu1 %vm406_vm0, %v4655_v39  ;;  %v4657_v39 = vld [vmem:[%s8904_s1 + $0x28] sm:$0xff] }
 0x273   : > { %v353_v14 = vunpack.c.h.bf16 %v4657_v39 }
 0x274   : > { %v3097_v37 = vsel %vm9074_vm14, %v2283_v11, %v2282_v62  ;;  %v3129_v3 = vsel %vm9074_vm14, %v2285_v60, %v2284_v58  ;;  %v317_v11 = vld [vmem:[%s8904_s1 + $0x38] sm:$0xf]  ;;  %vm9375_vm14 = vcmp.gt.f32.partialorder %v5791_v46, 0.0 }
 0x275   : > { %v6803_v57 = vsel %vm9073_vm13, %v3129_v3, %v3097_v37  ;;  %v356_v58 = vunpack.c.l.bf16 %v317_v11  ;;  %1761 = vmatpush.msrb.mxu3 %v353_v14  ;;  %vm9075_vm13 = vcmp.gt.f32.partialorder %v5824_v20, 0.0 }
 0x276   : > { %9374 = vst [vmem:[#allocation113_spill] sm:$0xff] %v6803_v57  ;;  %4350 = vmatmul.msk.f32.gmra.mxu3 %vm406_vm0, %v4656_v4  ;;  %4446 = vmatmul.msk.f32.gmra.mxu2 %vm406_vm0, %v4656_v4  ;;  %v1436_v10 = vpop.f32.mrf.mxu0 }
 0x277   : > { %v2298_v62 = vsub.f32 %v1436_v10, %v6714_v48  ;;  %v1549_v60 = vpop.f32.mrf.mxu1  ;;  %2100 = vmatpush.msrb.mxu2 %v356_v58  ;;  %v316_v58 = vld [vmem:[%s8904_s1 + $0x30] sm:$0xff] }
 0x278   : > { %v2299_v3 = vsub.f32 %v1549_v60, %v6720_v43  ;;  %v4658_v60 = vld [vmem:[%s4821_s15 + $0xa8] sm:$0xff] }
 0x279   : > { %v1323_v37 = vpop.f32.mrf.mxu3  ;;  %v1662_v57 = vpop.f32.mrf.mxu2  ;;  %4382 = vmatmul.msk.f32.gmra.mxu0 %vm406_vm0, %v4656_v4 }
 0x27a   : > { %v2297_v29 = vsub.f32 %v1323_v37, %v6729_v47  ;;  %v2300_v39 = vsub.f32 %v1662_v57, %v6731_v51  ;;  %4414 = vmatmul.msk.f32.gmra.mxu1 %vm406_vm0, %v4656_v4  ;;  %v354_v4 = vunpack.c.l.bf16 %v316_v58  ;;  %v355_v37 = vunpack.c.h.bf16 %v316_v58 }
 0x27c   : > { %v3098_v10 = vsel %vm9075_vm13, %v2298_v62, %v2297_v29  ;;  %v3130_v14 = vsel %vm9075_vm13, %v2300_v39, %v2299_v3  ;;  %1874 = vmatpush.msrb.mxu0 %v354_v4  ;;  %1987 = vmatpush.msrb.mxu1 %v355_v37  ;;  %vm9377_vm13 = vcmp.gt.f32.partialorder %v5833_v55, 0.0  ;;  %v4659_v37 = vld [vmem:[%s4821_s15 + $0xb0] sm:$0xff] }
 0x27d   : > { %v6827_v11 = vsel %vm9375_vm14, %v3130_v14, %v3098_v10  ;;  %vm9076_vm14 = vcmp.gt.f32.partialorder %v5866_v21, 0.0 }
 0x27e   : > { %9376 = vst [vmem:[#allocation114_spill] sm:$0xff] %v6827_v11  ;;  %4351 = vmatmul.msk.f32.gmra.mxu3 %vm406_vm0, %v4658_v60  ;;  %4447 = vmatmul.msk.f32.gmra.mxu2 %vm406_vm0, %v4658_v60  ;;  %v1439_v57 = vpop.f32.mrf.mxu0 }
 0x27f   : > { %v2313_v29 = vsub.f32 %v1439_v57, %v6714_v48  ;;  %v1552_v62 = vpop.f32.mrf.mxu1 }
 0x280   : > { %v2314_v39 = vsub.f32 %v1552_v62, %v6720_v43 }
 0x281   : > { %v1326_v3 = vpop.f32.mrf.mxu3  ;;  %v1665_v10 = vpop.f32.mrf.mxu2  ;;  %4383 = vmatmul.msk.f32.gmra.mxu0 %vm406_vm0, %v4658_v60 }
 0x282   : > { %v2312_v14 = vsub.f32 %v1326_v3, %v6729_v47  ;;  %v2315_v11 = vsub.f32 %v1665_v10, %v6731_v51  ;;  %4415 = vmatmul.msk.f32.gmra.mxu1 %vm406_vm0, %v4658_v60 }
 0x284   : > { %v3099_v58 = vsel %vm9076_vm14, %v2313_v29, %v2312_v14  ;;  %v3131_v57 = vsel %vm9076_vm14, %v2315_v11, %v2314_v39  ;;  %vm9379_vm14 = vcmp.gt.f32.partialorder %v5875_v5, 0.0 }
 0x285   : > { %v6848_v4 = vsel %vm9377_vm13, %v3131_v57, %v3099_v58  ;;  %vm9077_vm13 = vcmp.gt.f32.partialorder %v5905_v50, 0.0 }
 0x286   : > { %9378 = vst [vmem:[#allocation115_spill] sm:$0xff] %v6848_v4  ;;  %4352 = vmatmul.msk.f32.gmra.mxu3 %vm406_vm0, %v4659_v37  ;;  %4448 = vmatmul.msk.f32.gmra.mxu2 %vm406_vm0, %v4659_v37  ;;  %v1442_v62 = vpop.f32.mrf.mxu0 }
 0x287   : > { %v2328_v3 = vsub.f32 %v1442_v62, %v6714_v48  ;;  %v1555_v60 = vpop.f32.mrf.mxu1 }
 0x288   : > { %v2329_v29 = vsub.f32 %v1555_v60, %v6720_v43  ;;  %v4660_v60 = vld [vmem:[%s4821_s15 + $0xb8] sm:$0xff] }
 0x289   : > { %v1329_v10 = vpop.f32.mrf.mxu3  ;;  %v1668_v14 = vpop.f32.mrf.mxu2  ;;  %4384 = vmatmul.msk.f32.gmra.mxu0 %vm406_vm0, %v4659_v37 }
 0x28a   : > { %v2327_v11 = vsub.f32 %v1329_v10, %v6729_v47  ;;  %v2330_v39 = vsub.f32 %v1668_v14, %v6731_v51  ;;  %4416 = vmatmul.msk.f32.gmra.mxu1 %vm406_vm0, %v4659_v37 }
 0x28c   : > { %v3100_v58 = vsel %vm9077_vm13, %v2328_v3, %v2327_v11  ;;  %v3132_v57 = vsel %vm9077_vm13, %v2330_v39, %v2329_v29  ;;  %vm9381_vm13 = vcmp.gt.f32.partialorder %v5914_v9, 0.0 }
 0x28d   : > { %v6866_v62 = vsel %vm9379_vm14, %v3132_v57, %v3100_v58  ;;  %vm9078_vm14 = vcmp.gt.f32.partialorder %v5944_v25, 0.0 }
 0x28e   : > { %9380 = vst [vmem:[#allocation116_spill] sm:$0xff] %v6866_v62  ;;  %4353 = vmatmul.msk.f32.gmra.mxu3 %vm406_vm0, %v4660_v60  ;;  %4449 = vmatmul.msk.f32.gmra.mxu2 %vm406_vm0, %v4660_v60  ;;  %v1445_v10 = vpop.f32.mrf.mxu0 }
 0x28f   : > { %v2343_v14 = vsub.f32 %v1445_v10, %v6714_v48  ;;  %v1558_v37 = vpop.f32.mrf.mxu1 }
 0x290   : > { %v2344_v3 = vsub.f32 %v1558_v37, %v6720_v43  ;;  %v4661_v37 = vld [vmem:[%s4821_s15 + $0xc0] sm:$0xff] }
 0x291   : > { %v1332_v4 = vpop.f32.mrf.mxu3  ;;  %v1671_v11 = vpop.f32.mrf.mxu2  ;;  %4385 = vmatmul.msk.f32.gmra.mxu0 %vm406_vm0, %v4660_v60 }
 0x292   : > { %v2342_v29 = vsub.f32 %v1332_v4, %v6729_v47  ;;  %v2345_v39 = vsub.f32 %v1671_v11, %v6731_v51  ;;  %4417 = vmatmul.msk.f32.gmra.mxu1 %vm406_vm0, %v4660_v60 }
 0x294   : > { %v3101_v58 = vsel %vm9078_vm14, %v2343_v14, %v2342_v29  ;;  %v3133_v57 = vsel %vm9078_vm14, %v2345_v39, %v2344_v3  ;;  %vm9383_vm14 = vcmp.gt.f32.partialorder %v5952_v31, 0.0 }
 0x295   : > { %v6884_v10 = vsel %vm9381_vm13, %v3133_v57, %v3101_v58  ;;  %vm9079_vm13 = vcmp.gt.f32.partialorder %v5980_v1, 0.0 }
 0x296   : > { %9382 = vst [vmem:[#allocation117_spill] sm:$0xff] %v6884_v10  ;;  %4354 = vmatmul.msk.f32.gmra.mxu3 %vm406_vm0, %v4661_v37  ;;  %4450 = vmatmul.msk.f32.gmra.mxu2 %vm406_vm0, %v4661_v37  ;;  %v1448_v4 = vpop.f32.mrf.mxu0 }
 0x297   : > { %v2358_v11 = vsub.f32 %v1448_v4, %v6714_v48  ;;  %v1561_v60 = vpop.f32.mrf.mxu1 }
 0x298   : > { %v2359_v14 = vsub.f32 %v1561_v60, %v6720_v43  ;;  %v4662_v60 = vld [vmem:[%s4821_s15 + $0xc8] sm:$0xff] }
 0x299   : > { %v1335_v62 = vpop.f32.mrf.mxu3  ;;  %v1674_v29 = vpop.f32.mrf.mxu2  ;;  %4386 = vmatmul.msk.f32.gmra.mxu0 %vm406_vm0, %v4661_v37 }
 0x29a   : > { %v2357_v3 = vsub.f32 %v1335_v62, %v6729_v47  ;;  %v2360_v39 = vsub.f32 %v1674_v29, %v6731_v51  ;;  %4418 = vmatmul.msk.f32.gmra.mxu1 %vm406_vm0, %v4661_v37 }
 0x29c   : > { %v3102_v58 = vsel %vm9079_vm13, %v2358_v11, %v2357_v3  ;;  %v3134_v57 = vsel %vm9079_vm13, %v2360_v39, %v2359_v14  ;;  %vm9385_vm13 = vcmp.gt.f32.partialorder %v5988_v59, 0.0  ;;  %v4664_v59 = vld [vmem:[%s4821_s15 + $0xd8] sm:$0xff] }
 0x29d   : > { %v6902_v4 = vsel %vm9383_vm14, %v3134_v57, %v3102_v58  ;;  %vm9080_vm14 = vcmp.gt.f32.partialorder %v6016_v38, 0.0 }
 0x29e   : > { %9384 = vst [vmem:[#allocation118_spill] sm:$0xff] %v6902_v4  ;;  %4355 = vmatmul.msk.f32.gmra.mxu3 %vm406_vm0, %v4662_v60  ;;  %4451 = vmatmul.msk.f32.gmra.mxu2 %vm406_vm0, %v4662_v60  ;;  %v1451_v62 = vpop.f32.mrf.mxu0 }
 0x29f   : > { %v2373_v29 = vsub.f32 %v1451_v62, %v6714_v48  ;;  %v1564_v37 = vpop.f32.mrf.mxu1 }
 0x2a0   : > { %v2374_v11 = vsub.f32 %v1564_v37, %v6720_v43  ;;  %v4663_v37 = vld [vmem:[%s4821_s15 + $0xd0] sm:$0xff] }
 0x2a1   : > { %v1338_v10 = vpop.f32.mrf.mxu3  ;;  %v1677_v3 = vpop.f32.mrf.mxu2  ;;  %4387 = vmatmul.msk.f32.gmra.mxu0 %vm406_vm0, %v4662_v60 }
 0x2a2   : > { %v2372_v14 = vsub.f32 %v1338_v10, %v6729_v47  ;;  %v2375_v39 = vsub.f32 %v1677_v3, %v6731_v51  ;;  %4419 = vmatmul.msk.f32.gmra.mxu1 %vm406_vm0, %v4662_v60 }
 0x2a4   : > { %v3103_v58 = vsel %vm9080_vm14, %v2373_v29, %v2372_v14  ;;  %v3135_v57 = vsel %vm9080_vm14, %v2375_v39, %v2374_v11 }
 0x2a5   : > { %v6920_v62 = vsel %vm9385_vm13, %v3135_v57, %v3103_v58  ;;  %v9387_v58 = vld [vmem:[#allocation13_spill] sm:$0xff] }
 0x2a6   : > { %9386 = vst [vmem:[#allocation119_spill] sm:$0xff] %v6920_v62  ;;  %4356 = vmatmul.msk.f32.gmra.mxu3 %vm406_vm0, %v4663_v37  ;;  %4452 = vmatmul.msk.f32.gmra.mxu2 %vm406_vm0, %v4663_v37  ;;  %v1454_v10 = vpop.f32.mrf.mxu0  ;;  %vm9085_vm13 = vcmp.gt.f32.partialorder %v9387_v58, 0.0  ;;  %v9388_v62 = vld [vmem:[#allocation10_spill] sm:$0xff] }
 0x2a7   : > { %v2388_v3 = vsub.f32 %v1454_v10, %v6714_v48  ;;  %v1567_v60 = vpop.f32.mrf.mxu1  ;;  %vm9389_vm14 = vcmp.gt.f32.partialorder %v9388_v62, 0.0  ;;  %v4665_v62 = vld [vmem:[%s4821_s15 + $0xe0] sm:$0xff] }
 0x2a8   : > { %v2389_v29 = vsub.f32 %v1567_v60, %v6720_v43 }
 0x2a9   : > { %v1341_v4 = vpop.f32.mrf.mxu3  ;;  %v1680_v14 = vpop.f32.mrf.mxu2  ;;  %4388 = vmatmul.msk.f32.gmra.mxu0 %vm406_vm0, %v4663_v37 }
 0x2aa   : > { %v2387_v11 = vsub.f32 %v1341_v4, %v6729_v47  ;;  %v2390_v39 = vsub.f32 %v1680_v14, %v6731_v51  ;;  %4420 = vmatmul.msk.f32.gmra.mxu1 %vm406_vm0, %v4663_v37 }
 0x2ac   : > { %v3104_v57 = vsel %vm9085_vm13, %v2388_v3, %v2387_v11  ;;  %v3136_v10 = vsel %vm9085_vm13, %v2390_v39, %v2389_v29 }
 0x2ad   : > { %v6938_v60 = vsel %vm9389_vm14, %v3136_v10, %v3104_v57  ;;  %v9391_v57 = vld [vmem:[#allocation17_spill] sm:$0xff] }
 0x2ae   : > { %9390 = vst [vmem:[#allocation120_spill] sm:$0xff] %v6938_v60  ;;  %4357 = vmatmul.msk.f32.gmra.mxu3 %vm406_vm0, %v4664_v59  ;;  %4453 = vmatmul.msk.f32.gmra.mxu2 %vm406_vm0, %v4664_v59  ;;  %v1457_v4 = vpop.f32.mrf.mxu0  ;;  %vm9087_vm14 = vcmp.gt.f32.partialorder %v9391_v57, 0.0  ;;  %v9392_v60 = vld [vmem:[#allocation14_spill] sm:$0xff] }
 0x2af   : > { %v2403_v14 = vsub.f32 %v1457_v4, %v6714_v48  ;;  %v1570_v37 = vpop.f32.mrf.mxu1  ;;  %vm9393_vm13 = vcmp.gt.f32.partialorder %v9392_v60, 0.0  ;;  %v4666_v60 = vld [vmem:[%s4821_s15 + $0xe8] sm:$0xff] }
 0x2b0   : > { %v2404_v3 = vsub.f32 %v1570_v37, %v6720_v43 }
 0x2b1   : > { %v1344_v38 = vpop.f32.mrf.mxu3  ;;  %v1683_v11 = vpop.f32.mrf.mxu2  ;;  %4389 = vmatmul.msk.f32.gmra.mxu0 %vm406_vm0, %v4664_v59 }
 0x2b2   : > { %v2402_v29 = vsub.f32 %v1344_v38, %v6729_v47  ;;  %v2405_v39 = vsub.f32 %v1683_v11, %v6731_v51  ;;  %4421 = vmatmul.msk.f32.gmra.mxu1 %vm406_vm0, %v4664_v59 }
 0x2b4   : > { %v3105_v10 = vsel %vm9087_vm14, %v2403_v14, %v2402_v29  ;;  %v3137_v4 = vsel %vm9087_vm14, %v2405_v39, %v2404_v3 }
 0x2b5   : > { %v6956_v37 = vsel %vm9393_vm13, %v3137_v4, %v3105_v10  ;;  %v9395_v10 = vld [vmem:[#allocation21_spill] sm:$0xff] }
 0x2b6   : > { %9394 = vst [vmem:[#allocation121_spill] sm:$0xff] %v6956_v37  ;;  %4358 = vmatmul.msk.f32.gmra.mxu3 %vm406_vm0, %v4665_v62  ;;  %4454 = vmatmul.msk.f32.gmra.mxu2 %vm406_vm0, %v4665_v62  ;;  %v1460_v38 = vpop.f32.mrf.mxu0  ;;  %vm9089_vm13 = vcmp.gt.f32.partialorder %v9395_v10, 0.0  ;;  %v9396_v37 = vld [vmem:[#allocation18_spill] sm:$0xff] }
 0x2b7   : > { %v2418_v11 = vsub.f32 %v1460_v38, %v6714_v48  ;;  %v1573_v59 = vpop.f32.mrf.mxu1  ;;  %vm9397_vm14 = vcmp.gt.f32.partialorder %v9396_v37, 0.0 }
 0x2b8   : > { %v2419_v14 = vsub.f32 %v1573_v59, %v6720_v43 }
 0x2b9   : > { %v1347_v58 = vpop.f32.mrf.mxu3  ;;  %v1686_v29 = vpop.f32.mrf.mxu2  ;;  %4390 = vmatmul.msk.f32.gmra.mxu0 %vm406_vm0, %v4665_v62 }
 0x2ba   : > { %v2417_v3 = vsub.f32 %v1347_v58, %v6729_v47  ;;  %v2420_v39 = vsub.f32 %v1686_v29, %v6731_v51  ;;  %4422 = vmatmul.msk.f32.gmra.mxu1 %vm406_vm0, %v4665_v62 }
 0x2bc   : > { %v3106_v4 = vsel %vm9089_vm13, %v2418_v11, %v2417_v3  ;;  %v3138_v38 = vsel %vm9089_vm13, %v2420_v39, %v2419_v14 }
 0x2bd   : > { %v6974_v59 = vsel %vm9397_vm14, %v3138_v38, %v3106_v4  ;;  %vm9090_vm14 = vcmp.gt.f32.partialorder %v6169_v26, 0.0 }
 0x2be   : > { %9398 = vst [vmem:[#allocation21_spill] sm:$0xff] %v6974_v59  ;;  %4359 = vmatmul.msk.f32.gmra.mxu3 %vm406_vm0, %v4666_v60  ;;  %4455 = vmatmul.msk.f32.gmra.mxu2 %vm406_vm0, %v4666_v60  ;;  %v1463_v58 = vpop.f32.mrf.mxu0  ;;  %v4667_v59 = vld [vmem:[%s4821_s15 + $0xf0] sm:$0xff] }
 0x2bf   : > { %v2433_v29 = vsub.f32 %v1463_v58, %v6714_v48  ;;  %v1576_v62 = vpop.f32.mrf.mxu1  ;;  %v9399_v58 = vld [vmem:[#allocation22_spill] sm:$0xff] }
 0x2c0   : > { %v2434_v11 = vsub.f32 %v1576_v62, %v6720_v43  ;;  %vm9400_vm13 = vcmp.gt.f32.partialorder %v9399_v58, 0.0  ;;  %v4668_v58 = vld [vmem:[%s4821_s15 + $0xf8] sm:$0xff] }
 0x2c1   : > { %v1350_v57 = vpop.f32.mrf.mxu3  ;;  %v1689_v3 = vpop.f32.mrf.mxu2  ;;  %4391 = vmatmul.msk.f32.gmra.mxu0 %vm406_vm0, %v4666_v60 }
 0x2c2   : > { %v2432_v14 = vsub.f32 %v1350_v57, %v6729_v47  ;;  %v2435_v39 = vsub.f32 %v1689_v3, %v6731_v51  ;;  %4423 = vmatmul.msk.f32.gmra.mxu1 %vm406_vm0, %v4666_v60 }
 0x2c4   : > { %v3107_v4 = vsel %vm9090_vm14, %v2433_v29, %v2432_v14  ;;  %v3139_v38 = vsel %vm9090_vm14, %v2435_v39, %v2434_v11 }
 0x2c5   : > { %v6992_v62 = vsel %vm9400_vm13, %v3139_v38, %v3107_v4  ;;  %v9402_v4 = vld [vmem:[#allocation27_spill] sm:$0xff] }
 0x2c6   : > { %9401 = vst [vmem:[#allocation122_spill] sm:$0xff] %v6992_v62  ;;  %4360 = vmatmul.msk.f32.gmra.mxu3 %vm406_vm0, %v4667_v59  ;;  %4456 = vmatmul.msk.f32.gmra.mxu2 %vm406_vm0, %v4667_v59  ;;  %v1466_v57 = vpop.f32.mrf.mxu0  ;;  %vm9093_vm13 = vcmp.gt.f32.partialorder %v9402_v4, 0.0  ;;  %v9403_v62 = vld [vmem:[#allocation25_spill] sm:$0xff] }
 0x2c7   : > { %v2448_v3 = vsub.f32 %v1466_v57, %v6714_v48  ;;  %v1579_v60 = vpop.f32.mrf.mxu1  ;;  %vm9404_vm14 = vcmp.gt.f32.partialorder %v9403_v62, 0.0 }
 0x2c8   : > { %v2449_v29 = vsub.f32 %v1579_v60, %v6720_v43 }
 0x2c9   : > { %v1353_v37 = vpop.f32.mrf.mxu3  ;;  %v1692_v14 = vpop.f32.mrf.mxu2  ;;  %4392 = vmatmul.msk.f32.gmra.mxu0 %vm406_vm0, %v4667_v59 }
 0x2ca   : > { %v2447_v11 = vsub.f32 %v1353_v37, %v6729_v47  ;;  %v2450_v39 = vsub.f32 %v1692_v14, %v6731_v51  ;;  %4424 = vmatmul.msk.f32.gmra.mxu1 %vm406_vm0, %v4667_v59 }
 0x2cc   : > { %v3108_v38 = vsel %vm9093_vm13, %v2448_v3, %v2447_v11  ;;  %v3140_v57 = vsel %vm9093_vm13, %v2450_v39, %v2449_v29  ;;  %vm9406_vm13 = vcmp.gt.f32.partialorder %v6213_v42, 0.0 }
 0x2cd   : > { %v7010_v60 = vsel %vm9404_vm14, %v3140_v57, %v3108_v38  ;;  %vm9094_vm14 = vcmp.gt.f32.partialorder %v6241_v40, 0.0 }
 0x2ce   : > { %9405 = vst [vmem:[#allocation27_spill] sm:$0xff] %v7010_v60  ;;  %4361 = vmatmul.msk.f32.gmra.mxu3 %vm406_vm0, %v4668_v58  ;;  %4457 = vmatmul.msk.f32.gmra.mxu2 %vm406_vm0, %v4668_v58  ;;  %v1469_v37 = vpop.f32.mrf.mxu0 }
 0x2cf   : > { %v2463_v14 = vsub.f32 %v1469_v37, %v6714_v48  ;;  %v1582_v59 = vpop.f32.mrf.mxu1 }
 0x2d0   : > { %v2464_v3 = vsub.f32 %v1582_v59, %v6720_v43  ;;  %v4669_v59 = vld [vmem:[%s4821_s15] sm:$0xff] }
 0x2d1   : > { %v1356_v26 = vpop.f32.mrf.mxu3  ;;  %v1695_v11 = vpop.f32.mrf.mxu2  ;;  %4393 = vmatmul.msk.f32.gmra.mxu0 %vm406_vm0, %v4668_v58 }
 0x2d2   : > { %v2462_v29 = vsub.f32 %v1356_v26, %v6729_v47  ;;  %v2465_v39 = vsub.f32 %v1695_v11, %v6731_v51  ;;  %4425 = vmatmul.msk.f32.gmra.mxu1 %vm406_vm0, %v4668_v58 }
 0x2d4   : > { %v3109_v38 = vsel %vm9094_vm14, %v2463_v14, %v2462_v29  ;;  %v3141_v57 = vsel %vm9094_vm14, %v2465_v39, %v2464_v3  ;;  %vm9408_vm14 = vcmp.gt.f32.partialorder %v6249_v45, 0.0 }
 0x2d5   : > { %v7028_v37 = vsel %vm9406_vm13, %v3141_v57, %v3109_v38  ;;  %vm9095_vm13 = vcmp.gt.f32.partialorder %v6277_v56, 0.0 }
 0x2d6   : > { %9407 = vst [vmem:[#allocation25_spill] sm:$0xff] %v7028_v37  ;;  %4458 = vmatmul.msk.f32.vlgmr.msrb.gmra.mxu3 %vm406_vm0, %v4669_v59  ;;  %4554 = vmatmul.msk.f32.vlgmr.msrb.gmra.mxu2 %vm406_vm0, %v4669_v59  ;;  %v1472_v26 = vpop.f32.mrf.mxu0 }
 0x2d7   : > { %v2478_v11 = vsub.f32 %v1472_v26, %v6714_v48  ;;  %v1585_v58 = vpop.f32.mrf.mxu1 }
 0x2d8   : > { %v2479_v14 = vsub.f32 %v1585_v58, %v6720_v43  ;;  %v4670_v58 = vld [vmem:[%s4821_s15 + $0x8] sm:$0xff] }
 0x2d9   : > { %v1359_v60 = vpop.f32.mrf.mxu3  ;;  %v1698_v29 = vpop.f32.mrf.mxu2  ;;  %4490 = vmatmul.msk.f32.vlgmr.msrb.gmra.mxu0 %vm406_vm0, %v4669_v59 }
 0x2da   : > { %v2477_v3 = vsub.f32 %v1359_v60, %v6729_v47  ;;  %v2480_v39 = vsub.f32 %v1698_v29, %v6731_v51  ;;  %4522 = vmatmul.msk.f32.vlgmr.msrb.gmra.mxu1 %vm406_vm0, %v4669_v59 }
 0x2dc   : > { %v3110_v38 = vsel %vm9095_vm13, %v2478_v11, %v2477_v3  ;;  %v3142_v57 = vsel %vm9095_vm13, %v2480_v39, %v2479_v14  ;;  %vm9410_vm13 = vcmp.gt.f32.partialorder %v6285_v28, 0.0 }
 0x2dd   : > { %v7046_v26 = vsel %vm9408_vm14, %v3142_v57, %v3110_v38  ;;  %vm9096_vm14 = vcmp.gt.f32.partialorder %v6313_v32, 0.0 }
 0x2de   : > { %9409 = vst [vmem:[#allocation123_spill] sm:$0xff] %v7046_v26  ;;  %4459 = vmatmul.msk.f32.gmra.mxu3 %vm406_vm0, %v4670_v58  ;;  %4555 = vmatmul.msk.f32.gmra.mxu2 %vm406_vm0, %v4670_v58  ;;  %v1475_v60 = vpop.f32.mrf.mxu0 }
 0x2df   : > { %v2493_v29 = vsub.f32 %v1475_v60, %v6714_v48  ;;  %v1588_v59 = vpop.f32.mrf.mxu1 }
 0x2e0   : > { %v2494_v11 = vsub.f32 %v1588_v59, %v6720_v43  ;;  %v4671_v59 = vld [vmem:[%s4821_s15 + $0x10] sm:$0xff] }
 0x2e1   : > { %v1362_v37 = vpop.f32.mrf.mxu3  ;;  %v1701_v3 = vpop.f32.mrf.mxu2  ;;  %4491 = vmatmul.msk.f32.gmra.mxu0 %vm406_vm0, %v4670_v58 }
 0x2e2   : > { %v2492_v14 = vsub.f32 %v1362_v37, %v6729_v47  ;;  %v2495_v39 = vsub.f32 %v1701_v3, %v6731_v51  ;;  %4523 = vmatmul.msk.f32.gmra.mxu1 %vm406_vm0, %v4670_v58 }
 0x2e4   : > { %v3111_v38 = vsel %vm9096_vm14, %v2493_v29, %v2492_v14  ;;  %v3143_v57 = vsel %vm9096_vm14, %v2495_v39, %v2494_v11  ;;  %vm9412_vm14 = vcmp.gt.f32.partialorder %v6321_v18, 0.0 }
 0x2e5   : > { %v7064_v60 = vsel %vm9410_vm13, %v3143_v57, %v3111_v38  ;;  %vm9097_vm13 = vcmp.gt.f32.partialorder %v6349_v35, 0.0 }
 0x2e6   : > { %9411 = vst [vmem:[#allocation124_spill] sm:$0xff] %v7064_v60  ;;  %4460 = vmatmul.msk.f32.gmra.mxu3 %vm406_vm0, %v4671_v59  ;;  %4556 = vmatmul.msk.f32.gmra.mxu2 %vm406_vm0, %v4671_v59  ;;  %v1478_v37 = vpop.f32.mrf.mxu0 }
 0x2e7   : > { %v2508_v3 = vsub.f32 %v1478_v37, %v6714_v48  ;;  %v1591_v58 = vpop.f32.mrf.mxu1 }
 0x2e8   : > { %v2509_v29 = vsub.f32 %v1591_v58, %v6720_v43  ;;  %v4672_v58 = vld [vmem:[%s4821_s15 + $0x18] sm:$0xff] }
 0x2e9   : > { %v1365_v26 = vpop.f32.mrf.mxu3  ;;  %v1704_v14 = vpop.f32.mrf.mxu2  ;;  %4492 = vmatmul.msk.f32.gmra.mxu0 %vm406_vm0, %v4671_v59 }
 0x2ea   : > { %v2507_v11 = vsub.f32 %v1365_v26, %v6729_v47  ;;  %v2510_v39 = vsub.f32 %v1704_v14, %v6731_v51  ;;  %4524 = vmatmul.msk.f32.gmra.mxu1 %vm406_vm0, %v4671_v59 }
 0x2ec   : > { %v3112_v38 = vsel %vm9097_vm13, %v2508_v3, %v2507_v11  ;;  %v3144_v57 = vsel %vm9097_vm13, %v2510_v39, %v2509_v29  ;;  %vm9414_vm13 = vcmp.gt.f32.partialorder %v6357_v12, 0.0 }
 0x2ed   : > { %v7082_v37 = vsel %vm9412_vm14, %v3144_v57, %v3112_v38  ;;  %vm9098_vm14 = vcmp.gt.f32.partialorder %v6385_v49, 0.0 }
 0x2ee   : > { %9413 = vst [vmem:[#allocation125_spill] sm:$0xff] %v7082_v37  ;;  %4461 = vmatmul.msk.f32.gmra.mxu3 %vm406_vm0, %v4672_v58  ;;  %4557 = vmatmul.msk.f32.gmra.mxu2 %vm406_vm0, %v4672_v58  ;;  %v1481_v26 = vpop.f32.mrf.mxu0 }
 0x2ef   : > { %v2523_v14 = vsub.f32 %v1481_v26, %v6714_v48  ;;  %v1594_v59 = vpop.f32.mrf.mxu1 }
 0x2f0   : > { %v2524_v3 = vsub.f32 %v1594_v59, %v6720_v43  ;;  %v4673_v59 = vld [vmem:[%s4821_s15 + $0x20] sm:$0xff] }
 0x2f1   : > { %v1368_v60 = vpop.f32.mrf.mxu3  ;;  %v1707_v11 = vpop.f32.mrf.mxu2  ;;  %4493 = vmatmul.msk.f32.gmra.mxu0 %vm406_vm0, %v4672_v58 }
 0x2f2   : > { %v2522_v29 = vsub.f32 %v1368_v60, %v6729_v47  ;;  %v2525_v39 = vsub.f32 %v1707_v11, %v6731_v51  ;;  %4525 = vmatmul.msk.f32.gmra.mxu1 %vm406_vm0, %v4672_v58 }
 0x2f4   : > { %v3113_v38 = vsel %vm9098_vm14, %v2523_v14, %v2522_v29  ;;  %v3145_v57 = vsel %vm9098_vm14, %v2525_v39, %v2524_v3  ;;  %vm9416_vm14 = vcmp.gt.f32.partialorder %v6393_v2, 0.0  ;;  %v9441_v2 = vld [vmem:[#allocation63_spill] sm:$0xff] }
 0x2f5   : > { %v7100_v26 = vsel %vm9414_vm13, %v3145_v57, %v3113_v38  ;;  %vm9099_vm13 = vcmp.gt.f32.partialorder %v6427_v63, 0.0 }
 0x2f6   : > { %9415 = vst [vmem:[#allocation126_spill] sm:$0xff] %v7100_v26  ;;  %4462 = vmatmul.msk.f32.gmra.mxu3 %vm406_vm0, %v4673_v59  ;;  %4558 = vmatmul.msk.f32.gmra.mxu2 %vm406_vm0, %v4673_v59  ;;  %v1484_v60 = vpop.f32.mrf.mxu0 }
 0x2f7   : > { %v2538_v11 = vsub.f32 %v1484_v60, %v6714_v48  ;;  %v1597_v58 = vpop.f32.mrf.mxu1 }
 0x2f8   : > { %v2539_v14 = vsub.f32 %v1597_v58, %v6720_v43  ;;  %v4674_v58 = vld [vmem:[%s4821_s15 + $0x28] sm:$0xff] }
 0x2f9   : > { %v1371_v37 = vpop.f32.mrf.mxu3  ;;  %v1710_v29 = vpop.f32.mrf.mxu2  ;;  %4494 = vmatmul.msk.f32.gmra.mxu0 %vm406_vm0, %v4673_v59 }
 0x2fa   : > { %v2537_v3 = vsub.f32 %v1371_v37, %v6729_v47  ;;  %v2540_v39 = vsub.f32 %v1710_v29, %v6731_v51  ;;  %4526 = vmatmul.msk.f32.gmra.mxu1 %vm406_vm0, %v4673_v59 }
 0x2fc   : > { %v3114_v38 = vsel %vm9099_vm13, %v2538_v11, %v2537_v3  ;;  %v3146_v57 = vsel %vm9099_vm13, %v2540_v39, %v2539_v14  ;;  %vm9418_vm13 = vcmp.gt.f32.partialorder %v6435_v33, 0.0 }
 0x2fd   : > { %v7118_v60 = vsel %vm9416_vm14, %v3146_v57, %v3114_v38  ;;  %vm3083_vm14 = vcmp.gt.f32.partialorder %v6466_v16, 0.0 }
 0x2fe   : > { %9417 = vst [vmem:[#allocation127_spill] sm:$0xff] %v7118_v60  ;;  %4463 = vmatmul.msk.f32.gmra.mxu3 %vm406_vm0, %v4674_v58  ;;  %4559 = vmatmul.msk.f32.gmra.mxu2 %vm406_vm0, %v4674_v58  ;;  %v1487_v37 = vpop.f32.mrf.mxu0 }
 0x2ff   : > { %v2553_v29 = vsub.f32 %v1487_v37, %v6714_v48  ;;  %v1600_v59 = vpop.f32.mrf.mxu1 }
 0x300   : > { %v2554_v11 = vsub.f32 %v1600_v59, %v6720_v43  ;;  %v4675_v59 = vld [vmem:[%s4821_s15 + $0x30] sm:$0xff] }
 0x301   : > { %v1374_v26 = vpop.f32.mrf.mxu3  ;;  %v1713_v3 = vpop.f32.mrf.mxu2  ;;  %4495 = vmatmul.msk.f32.gmra.mxu0 %vm406_vm0, %v4674_v58 }
 0x302   : > { %v2552_v14 = vsub.f32 %v1374_v26, %v6729_v47  ;;  %v2555_v39 = vsub.f32 %v1713_v3, %v6731_v51  ;;  %4527 = vmatmul.msk.f32.gmra.mxu1 %vm406_vm0, %v4674_v58 }
 0x304   : > { %v3115_v38 = vsel %vm3083_vm14, %v2553_v29, %v2552_v14  ;;  %v3147_v57 = vsel %vm3083_vm14, %v2555_v39, %v2554_v11 }
 0x305   : > { %v7136_v37 = vsel %vm9418_vm13, %v3147_v57, %v3115_v38  ;;  %vm3084_vm13 = vcmp.gt.f32.partialorder %v6502_v27, 0.0 }
 0x306   : > { %9419 = vst [vmem:[#allocation128_spill] sm:$0xff] %v7136_v37  ;;  %4464 = vmatmul.msk.f32.gmra.mxu3 %vm406_vm0, %v4675_v59  ;;  %4560 = vmatmul.msk.f32.gmra.mxu2 %vm406_vm0, %v4675_v59  ;;  %v1490_v26 = vpop.f32.mrf.mxu0 }
 0x307   : > { %v2568_v3 = vsub.f32 %v1490_v26, %v6714_v48  ;;  %v1603_v58 = vpop.f32.mrf.mxu1 }
 0x308   : > { %v2569_v29 = vsub.f32 %v1603_v58, %v6720_v43  ;;  %v4676_v58 = vld [vmem:[%s4821_s15 + $0x38] sm:$0xff] }
 0x309   : > { %v1377_v60 = vpop.f32.mrf.mxu3  ;;  %v1716_v14 = vpop.f32.mrf.mxu2  ;;  %4496 = vmatmul.msk.f32.gmra.mxu0 %vm406_vm0, %v4675_v59 }
 0x30a   : > { %v2567_v11 = vsub.f32 %v1377_v60, %v6729_v47  ;;  %v2570_v39 = vsub.f32 %v1716_v14, %v6731_v51  ;;  %4528 = vmatmul.msk.f32.gmra.mxu1 %vm406_vm0, %v4675_v59 }
 0x30c   : > { %v3116_v38 = vsel %vm3084_vm13, %v2568_v3, %v2567_v11  ;;  %v3148_v57 = vsel %vm3084_vm13, %v2570_v39, %v2569_v29 }
 0x30d   : > { %v7154_v26 = vsel %vm9100_vm15, %v3148_v57, %v3116_v38  ;;  %vm3085_vm15 = vcmp.gt.f32.partialorder %v6529_v41, 0.0 }
 0x30e   : > { %9420 = vst [vmem:[#allocation129_spill] sm:$0xff] %v7154_v26  ;;  %4465 = vmatmul.msk.f32.gmra.mxu3 %vm406_vm0, %v4676_v58  ;;  %4561 = vmatmul.msk.f32.gmra.mxu2 %vm406_vm0, %v4676_v58  ;;  %v1493_v60 = vpop.f32.mrf.mxu0 }
 0x30f   : > { %v2583_v14 = vsub.f32 %v1493_v60, %v6714_v48  ;;  %v1606_v59 = vpop.f32.mrf.mxu1 }
 0x310   : > { %v2584_v3 = vsub.f32 %v1606_v59, %v6720_v43  ;;  %v4677_v59 = vld [vmem:[%s4821_s15 + $0x40] sm:$0xff] }
 0x311   : > { %v1380_v37 = vpop.f32.mrf.mxu3  ;;  %v1719_v11 = vpop.f32.mrf.mxu2  ;;  %4497 = vmatmul.msk.f32.gmra.mxu0 %vm406_vm0, %v4676_v58 }
 0x312   : > { %v2582_v29 = vsub.f32 %v1380_v37, %v6729_v47  ;;  %v2585_v39 = vsub.f32 %v1719_v11, %v6731_v51  ;;  %4529 = vmatmul.msk.f32.gmra.mxu1 %vm406_vm0, %v4676_v58 }
 0x314   : > { %v3117_v38 = vsel %vm3085_vm15, %v2583_v14, %v2582_v29  ;;  %v3149_v57 = vsel %vm3085_vm15, %v2585_v39, %v2584_v3 }
 0x315   : > { %v7172_v60 = vsel %vm9101_vm11, %v3149_v57, %v3117_v38  ;;  %vm3086_vm11 = vcmp.gt.f32.partialorder %v6550_v24, 0.0 }
 0x316   : > { %9421 = vst [vmem:[#allocation130_spill] sm:$0xff] %v7172_v60  ;;  %4466 = vmatmul.msk.f32.gmra.mxu3 %vm406_vm0, %v4677_v59  ;;  %4562 = vmatmul.msk.f32.gmra.mxu2 %vm406_vm0, %v4677_v59  ;;  %v1496_v37 = vpop.f32.mrf.mxu0 }
 0x317   : > { %v2598_v11 = vsub.f32 %v1496_v37, %v6714_v48  ;;  %v1609_v58 = vpop.f32.mrf.mxu1 }
 0x318   : > { %v2599_v14 = vsub.f32 %v1609_v58, %v6720_v43  ;;  %v4678_v58 = vld [vmem:[%s4821_s15 + $0x48] sm:$0xff] }
 0x319   : > { %v1383_v26 = vpop.f32.mrf.mxu3  ;;  %v1722_v29 = vpop.f32.mrf.mxu2  ;;  %4498 = vmatmul.msk.f32.gmra.mxu0 %vm406_vm0, %v4677_v59 }
 0x31a   : > { %v2597_v3 = vsub.f32 %v1383_v26, %v6729_v47  ;;  %v2600_v39 = vsub.f32 %v1722_v29, %v6731_v51  ;;  %4530 = vmatmul.msk.f32.gmra.mxu1 %vm406_vm0, %v4677_v59 }
 0x31c   : > { %v3118_v38 = vsel %vm3086_vm11, %v2598_v11, %v2597_v3  ;;  %v3150_v57 = vsel %vm3086_vm11, %v2600_v39, %v2599_v14 }
 0x31d   : > { %v7190_v37 = vsel %vm9102_vm9, %v3150_v57, %v3118_v38  ;;  %vm3087_vm9 = vcmp.gt.f32.partialorder %v6572_v13, 0.0 }
 0x31e   : > { %9422 = vst [vmem:[#allocation131_spill] sm:$0xff] %v7190_v37  ;;  %4467 = vmatmul.msk.f32.gmra.mxu3 %vm406_vm0, %v4678_v58  ;;  %4563 = vmatmul.msk.f32.gmra.mxu2 %vm406_vm0, %v4678_v58  ;;  %v1499_v26 = vpop.f32.mrf.mxu0 }
 0x31f   : > { %v2613_v29 = vsub.f32 %v1499_v26, %v6714_v48  ;;  %v1612_v59 = vpop.f32.mrf.mxu1 }
 0x320   : > { %v2614_v11 = vsub.f32 %v1612_v59, %v6720_v43  ;;  %v4679_v59 = vld [vmem:[%s4821_s15 + $0x50] sm:$0xff] }
 0x321   : > { %v1386_v60 = vpop.f32.mrf.mxu3  ;;  %v1725_v3 = vpop.f32.mrf.mxu2  ;;  %4499 = vmatmul.msk.f32.gmra.mxu0 %vm406_vm0, %v4678_v58 }
 0x322   : > { %v2612_v14 = vsub.f32 %v1386_v60, %v6729_v47  ;;  %v2615_v39 = vsub.f32 %v1725_v3, %v6731_v51  ;;  %4531 = vmatmul.msk.f32.gmra.mxu1 %vm406_vm0, %v4678_v58 }
 0x324   : > { %v3119_v38 = vsel %vm3087_vm9, %v2613_v29, %v2612_v14  ;;  %v3151_v57 = vsel %vm3087_vm9, %v2615_v39, %v2614_v11 }
 0x325   : > { %v7208_v26 = vsel %vm9103_vm1, %v3151_v57, %v3119_v38  ;;  %vm3088_vm1 = vcmp.gt.f32.partialorder %v6594_v22, 0.0 }
 0x326   : > { %9423 = vst [vmem:[#allocation132_spill] sm:$0xff] %v7208_v26  ;;  %4468 = vmatmul.msk.f32.gmra.mxu3 %vm406_vm0, %v4679_v59  ;;  %4564 = vmatmul.msk.f32.gmra.mxu2 %vm406_vm0, %v4679_v59  ;;  %v1502_v60 = vpop.f32.mrf.mxu0  ;;  %v4680_v26 = vld [vmem:[%s4821_s15 + $0x58] sm:$0xff] }
 0x327   : > { %v2628_v3 = vsub.f32 %v1502_v60, %v6714_v48  ;;  %v1615_v58 = vpop.f32.mrf.mxu1  ;;  %v4681_v60 = vld [vmem:[%s4821_s15 + $0x60] sm:$0xff] }
 0x328   : > { %v2629_v29 = vsub.f32 %v1615_v58, %v6720_v43 }
 0x329   : > { %v1389_v37 = vpop.f32.mrf.mxu3  ;;  %v1728_v14 = vpop.f32.mrf.mxu2  ;;  %4500 = vmatmul.msk.f32.gmra.mxu0 %vm406_vm0, %v4679_v59 }
 0x32a   : > { %v2627_v11 = vsub.f32 %v1389_v37, %v6729_v47  ;;  %v2630_v39 = vsub.f32 %v1728_v14, %v6731_v51  ;;  %4532 = vmatmul.msk.f32.gmra.mxu1 %vm406_vm0, %v4679_v59 }
 0x32c   : > { %v3120_v38 = vsel %vm3088_vm1, %v2628_v3, %v2627_v11  ;;  %v3152_v57 = vsel %vm3088_vm1, %v2630_v39, %v2629_v29 }
 0x32d   : > { %v7226_v58 = vsel %vm9105_vm2, %v3152_v57, %v3120_v38  ;;  %v9426_v38 = vld [vmem:[#allocation106_spill] sm:$0xff] }
 0x32e   : > { %9425 = vst [vmem:[#allocation133_spill] sm:$0xff] %v7226_v58  ;;  %4469 = vmatmul.msk.f32.gmra.mxu3 %vm406_vm0, %v4680_v26  ;;  %4565 = vmatmul.msk.f32.gmra.mxu2 %vm406_vm0, %v4680_v26  ;;  %v1505_v37 = vpop.f32.mrf.mxu0  ;;  %vm3089_vm2 = vcmp.gt.f32.partialorder %v9426_v38, 0.0  ;;  %v4682_v58 = vld [vmem:[%s4821_s15 + $0x68] sm:$0xff] }
 0x32f   : > { %v2643_v14 = vsub.f32 %v1505_v37, %v6714_v48  ;;  %v1618_v59 = vpop.f32.mrf.mxu1 }
 0x330   : > { %v2644_v3 = vsub.f32 %v1618_v59, %v6720_v43 }
 0x331   : > { %v1392_v53 = vpop.f32.mrf.mxu3  ;;  %v1731_v11 = vpop.f32.mrf.mxu2  ;;  %4501 = vmatmul.msk.f32.gmra.mxu0 %vm406_vm0, %v4680_v26 }
 0x332   : > { %v2642_v29 = vsub.f32 %v1392_v53, %v6729_v47  ;;  %v2645_v39 = vsub.f32 %v1731_v11, %v6731_v51  ;;  %4533 = vmatmul.msk.f32.gmra.mxu1 %vm406_vm0, %v4680_v26 }
 0x334   : > { %v3121_v57 = vsel %vm3089_vm2, %v2643_v14, %v2642_v29  ;;  %v3153_v37 = vsel %vm3089_vm2, %v2645_v39, %v2644_v3 }
 0x335   : > { %v7244_v59 = vsel %vm9108_vm3, %v3153_v37, %v3121_v57  ;;  %v9429_v57 = vld [vmem:[#allocation107_spill] sm:$0xff] }
 0x336   : > { %9428 = vst [vmem:[#allocation134_spill] sm:$0xff] %v7244_v59  ;;  %4470 = vmatmul.msk.f32.gmra.mxu3 %vm406_vm0, %v4681_v60  ;;  %4566 = vmatmul.msk.f32.gmra.mxu2 %vm406_vm0, %v4681_v60  ;;  %v1508_v53 = vpop.f32.mrf.mxu0  ;;  %vm3090_vm3 = vcmp.gt.f32.partialorder %v9429_v57, 0.0 }
 0x337   : > { %v2658_v11 = vsub.f32 %v1508_v53, %v6714_v48  ;;  %v1621_v26 = vpop.f32.mrf.mxu1 }
 0x338   : > { %v2659_v14 = vsub.f32 %v1621_v26, %v6720_v43 }
 0x339   : > { %v1395_v22 = vpop.f32.mrf.mxu3  ;;  %v1734_v29 = vpop.f32.mrf.mxu2  ;;  %4502 = vmatmul.msk.f32.gmra.mxu0 %vm406_vm0, %v4681_v60 }
 0x33a   : > { %v2657_v3 = vsub.f32 %v1395_v22, %v6729_v47  ;;  %v2660_v39 = vsub.f32 %v1734_v29, %v6731_v51  ;;  %4534 = vmatmul.msk.f32.gmra.mxu1 %vm406_vm0, %v4681_v60 }
 0x33c   : > { %v3122_v37 = vsel %vm3090_vm3, %v2658_v11, %v2657_v3  ;;  %v3154_v53 = vsel %vm3090_vm3, %v2660_v39, %v2659_v14 }
 0x33d   : > { %v7262_v26 = vsel %vm9110_vm4, %v3154_v53, %v3122_v37  ;;  %vm9162_vm4 = vcmp.gt.f32.partialorder %v6669_v30, 0.0 }
 0x33e   : > { %9431 = vst [vmem:[#allocation135_spill] sm:$0xff] %v7262_v26  ;;  %4471 = vmatmul.msk.f32.gmra.mxu3 %vm406_vm0, %v4682_v58  ;;  %4567 = vmatmul.msk.f32.gmra.mxu2 %vm406_vm0, %v4682_v58  ;;  %v1511_v22 = vpop.f32.mrf.mxu0  ;;  %v4683_v26 = vld [vmem:[%s4821_s15 + $0x70] sm:$0xff] }
 0x33f   : > { %v2673_v29 = vsub.f32 %v1511_v22, %v6714_v48  ;;  %v1624_v60 = vpop.f32.mrf.mxu1 }
 0x340   : > { %v2674_v11 = vsub.f32 %v1624_v60, %v6720_v43 }
 0x341   : > { %v1398_v38 = vpop.f32.mrf.mxu3  ;;  %v1737_v3 = vpop.f32.mrf.mxu2  ;;  %4503 = vmatmul.msk.f32.gmra.mxu0 %vm406_vm0, %v4682_v58 }
 0x342   : > { %v2672_v14 = vsub.f32 %v1398_v38, %v6729_v47  ;;  %v2675_v39 = vsub.f32 %v1737_v3, %v6731_v51  ;;  %4535 = vmatmul.msk.f32.gmra.mxu1 %vm406_vm0, %v4682_v58 }
 0x344   : > { %v3123_v37 = vsel %vm9162_vm4, %v2673_v29, %v2672_v14  ;;  %v3155_v53 = vsel %vm9162_vm4, %v2675_v39, %v2674_v11  ;;  %vm9486_vm4 = vcmp.gt.f32.partialorder %v5866_v21, 0.0 }
 0x345   : > { %v7280_v60 = vsel %vm9111_vm5, %v3155_v53, %v3123_v37  ;;  %vm9161_vm5 = vcmp.gt.f32.partialorder %v6691_v6, 0.0 }
 0x346   : > { %9433 = vst [vmem:[#allocation136_spill] sm:$0xff] %v7280_v60  ;;  %4472 = vmatmul.msk.f32.gmra.mxu3 %vm406_vm0, %v4683_v26  ;;  %4568 = vmatmul.msk.f32.gmra.mxu2 %vm406_vm0, %v4683_v26  ;;  %v1514_v38 = vpop.f32.mrf.mxu0  ;;  %v4684_v60 = vld [vmem:[%s4821_s15 + $0x78] sm:$0xff] }
 0x347   : > { %v2688_v3 = vsub.f32 %v1514_v38, %v6714_v48  ;;  %v1627_v58 = vpop.f32.mrf.mxu1 }
 0x348   : > { %v2689_v29 = vsub.f32 %v1627_v58, %v6720_v43 }
 0x349   : > { %v1401_v59 = vpop.f32.mrf.mxu3  ;;  %v1740_v14 = vpop.f32.mrf.mxu2  ;;  %4504 = vmatmul.msk.f32.gmra.mxu0 %vm406_vm0, %v4683_v26 }
 0x34a   : > { %v2687_v11 = vsub.f32 %v1401_v59, %v6729_v47  ;;  %v2690_v39 = vsub.f32 %v1740_v14, %v6731_v51  ;;  %4536 = vmatmul.msk.f32.gmra.mxu1 %vm406_vm0, %v4683_v26 }
 0x34c   : > { %v3124_v37 = vsel %vm9161_vm5, %v2688_v3, %v2687_v11  ;;  %v3156_v53 = vsel %vm9161_vm5, %v2690_v39, %v2689_v29 }
 0x34d   : > { %v7298_v58 = vsel %vm9112_vm6, %v3156_v53, %v3124_v37  ;;  %vm9132_vm6 = vcmp.gt.f32.partialorder %v6718_v19, 0.0 }
 0x34e   : > { %9435 = vst [vmem:[#allocation137_spill] sm:$0xff] %v7298_v58  ;;  %4473 = vmatmul.msk.f32.gmra.mxu3 %vm406_vm0, %v4684_v60  ;;  %4569 = vmatmul.msk.f32.gmra.mxu2 %vm406_vm0, %v4684_v60  ;;  %v1517_v59 = vpop.f32.mrf.mxu0 }
 0x34f   : > { %v2703_v14 = vsub.f32 %v1517_v59, %v6714_v48  ;;  %v1630_v26 = vpop.f32.mrf.mxu1 }
 0x350   : > { %v2704_v3 = vsub.f32 %v1630_v26, %v6720_v43  ;;  %v4685_v43 = vld [vmem:[%s8905_s2 + $0x8] sm:$0xff]  ;;  %v404_v26 = vld [vmem:[%s8906_s3] sm:$0xff] }
 0x351   : > { %v1404_v22 = vpop.f32.mrf.mxu3  ;;  %v1743_v11 = vpop.f32.mrf.mxu2  ;;  %4505 = vmatmul.msk.f32.gmra.mxu0 %vm406_vm0, %v4684_v60  ;;  %v7317_v53 = vperm.slane %v4685_v43, 4  ;;  %v7340_v59 = vperm.slane %v404_v26, 1  ;;  %v7342_v19 = vperm.slane %v404_v26, 0  ;;  %v7344_v58 = vperm.slane %v404_v26, 3 }
 0x352   : > { %v2702_v29 = vsub.f32 %v1404_v22, %v6729_v47  ;;  %v2705_v39 = vsub.f32 %v1743_v11, %v6731_v51  ;;  %4537 = vmatmul.msk.f32.gmra.mxu1 %vm406_vm0, %v4684_v60  ;;  %v7323_v51 = vperm.slane %v4685_v43, 5  ;;  %v4686_v22 = vld [vmem:[%s4821_s15 + $0x80] sm:$0xff]  ;;  %v7328_v60 = vperm.slane %v4685_v43, 3 }
 0x353   : > { %v7349_v38 = vperm.slane %v404_v26, 2  ;;  %v7351_v6 = vperm.slane %v404_v26, 5  ;;  %v7353_v30 = vperm.slane %v404_v26, 4  ;;  %v7357_v57 = vperm.slane %v404_v26, 6 }
 0x354   : > { %v3125_v37 = vsel %vm9132_vm6, %v2703_v14, %v2702_v29  ;;  %v3157_v48 = vsel %vm9132_vm6, %v2705_v39, %v2704_v3  ;;  %v7333_v3 = vperm.slane %v4685_v43, 6  ;;  %v405_v39 = vld [vmem:[%s8906_s3 + $0x8] sm:$0xff] }
 0x355   : > { %v7321_v47 = vsel %vm9125_vm7, %v3157_v48, %v3125_v37  ;;  %v7359_v13 = vperm.slane %v405_v39, 1  ;;  %v7366_v54 = vperm.slane %v405_v39, 0  ;;  %v7368_v24 = vperm.slane %v405_v39, 3 }
 0x356   : > { %9437 = vst [vmem:[#allocation138_spill] sm:$0xff] %v7321_v47  ;;  %4474 = vmatmul.msk.f32.gmra.mxu3 %vm406_vm0, %v4686_v22  ;;  %4570 = vmatmul.msk.f32.gmra.mxu2 %vm406_vm0, %v4686_v22  ;;  %v1876_v14 = vpop.f32.mrf.mxu0  ;;  %vm9438_vm7 = vcmp.gt.f32.partialorder %v5635_v36, 0.0  ;;  %v7372_v41 = vperm.slane %v405_v39, 2  ;;  %v7376_v61 = vperm.slane %v405_v39, 4 }
 0x357   : > { %v2242_v11 = vsub.f32 %v1876_v14, %v7317_v53  ;;  %v1989_v29 = vpop.f32.mrf.mxu1 }
 0x358   : > { %v2243_v48 = vsub.f32 %v1989_v29, %v7323_v51  ;;  %v7355_v29 = vperm.slane %v404_v26, 7  ;;  %v7374_v26 = vperm.slane %v405_v39, 5 }
 0x359   : > { %v1763_v37 = vpop.f32.mrf.mxu3  ;;  %v2102_v47 = vpop.f32.mrf.mxu2  ;;  %4506 = vmatmul.msk.f32.gmra.mxu0 %vm406_vm0, %v4686_v22 }
 0x35a   : > { %v2241_v43 = vsub.f32 %v1763_v37, %v7328_v60  ;;  %v2244_v14 = vsub.f32 %v2102_v47, %v7333_v3  ;;  %4538 = vmatmul.msk.f32.gmra.mxu1 %vm406_vm0, %v4686_v22  ;;  %v9439_v22 = vld [vmem:[#allocation57_spill] sm:$0xff] }
 0x35b   : > { %vm9440_vm6 = vcmp.gt.f32.partialorder %v9439_v22, 0.0 }
 0x35c   : > { %v3158_v37 = vsel %vm3062_vm8, %v2242_v11, %v2241_v43  ;;  %v3190_v47 = vsel %vm3062_vm8, %v2244_v14, %v2243_v48  ;;  %v7381_v43 = vperm.slane %v405_v39, 7  ;;  %v7383_v48 = vperm.slane %v405_v39, 6  ;;  %v4687_v14 = vld [vmem:[%s4821_s15 + $0x88] sm:$0xff] }
 0x35d   : > { %v3254_v34 = vsel %vm9438_vm7, %v3190_v47, %v3158_v37 }
 0x35e   : > { %v3286_v11 = vsel %vm9440_vm6, %v3254_v34, %v6749_v0  ;;  %4475 = vmatmul.msk.f32.gmra.mxu3 %vm406_vm0, %v4687_v14  ;;  %4571 = vmatmul.msk.f32.gmra.mxu2 %vm406_vm0, %v4687_v14  ;;  %v1879_v37 = vpop.f32.mrf.mxu0  ;;  %vm9442_vm6 = vcmp.gt.f32.partialorder %v5635_v36, 0.0 }
 0x35f   : > { %v3318_v47 = vand.u32 2147483647, %v3286_v11  ;;  %vm3382_vm7 = vcmp.gt.f32.partialorder %v3286_v11, 0.0  ;;  %v2257_v27 = vsub.f32 %v1879_v37, %v7317_v53  ;;  %v1992_v16 = vpop.f32.mrf.mxu1 }
 0x360   : > { %v3416_v33 = vsel %vm3382_vm7, %v7340_v59, %v7342_v19  ;;  %v3450_v34 = vsel %vm3382_vm7, %v7344_v58, %v7349_v38  ;;  %v3484_v0 = vsel %vm3382_vm7, %v7351_v6, %v7353_v30  ;;  %v3518_v39 = vsel %vm3382_vm7, %v7355_v29, %v7357_v57 }
 0x361   : > { %v3350_v63 = vmin.f32 %v9441_v2, %v3318_v47  ;;  %v3552_v11 = vsel %vm3382_vm7, %v7359_v13, %v7366_v54  ;;  %v3586_v37 = vsel %vm3382_vm7, %v7368_v24, %v7372_v41  ;;  %v3620_v12 = vsel %vm3382_vm7, %v7374_v26, %v7376_v61  ;;  %v1766_v49 = vpop.f32.mrf.mxu3  ;;  %v2105_v18 = vpop.f32.mrf.mxu2  ;;  %4507 = vmatmul.msk.f32.gmra.mxu0 %vm406_vm0, %v4687_v14 }
 0x362   : > { %v3654_v35 = vsel %vm3382_vm7, %v7381_v43, %v7383_v48  ;;  %v3686_v2 = vsel %vm3062_vm8, %v3450_v34, %v3416_v33  ;;  %v3718_v47 = vsel %vm3062_vm8, %v3518_v39, %v3484_v0  ;;  %v3750_v28 = vsel %vm3062_vm8, %v3586_v37, %v3552_v11  ;;  %4539 = vmatmul.msk.f32.gmra.mxu1 %vm406_vm0, %v4687_v14  ;;  %vm9443_vm7 = vmmov %vm9442_vm6 }
 0x363   : > { %v3782_v32 = vsel %vm3062_vm8, %v3654_v35, %v3620_v12  ;;  %v3814_v45 = vsel %vm9442_vm6, %v3718_v47, %v3686_v2  ;;  %v2256_v56 = vsub.f32 %v1766_v49, %v7328_v60  ;;  %v2258_v42 = vsub.f32 %v1992_v16, %v7323_v51  ;;  %v9446_v49 = vld [vmem:[#allocation112_spill] sm:$0xff]  ;;  %v9447_v16 = vld [vmem:[#allocation61_spill] sm:$0xff] }
 0x364   : > { %v3846_v33 = vsel %vm9443_vm7, %v3782_v32, %v3750_v28  ;;  %v2259_v34 = vsub.f32 %v2105_v18, %v7333_v3  ;;  %vm9444_vm8 = vcmp.gt.f32.partialorder %v9439_v22, 0.0  ;;  %v4688_v28 = vld [vmem:[%s4821_s15 + $0x90] sm:$0xff]  ;;  %vm9445_vm6 = vcmp.gt.f32.partialorder %v5674_v17, 0.0  ;;  %v9449_v2 = vld [vmem:[#allocation65_spill] sm:$0xff] }
 0x365   : > { %v3878_v8 = vsel %vm9444_vm8, %v3846_v33, %v3814_v45  ;;  %v3159_v35 = vsel %vm3063_vm10, %v2257_v27, %v2256_v56  ;;  %vm9448_vm7 = vcmp.gt.f32.partialorder %v9447_v16, 0.0 }
 0x366   : > { %v3910_v12 = vmul.f32 %v3878_v8, %v3350_v63  ;;  %v3191_v36 = vsel %vm3063_vm10, %v2259_v34, %v2258_v42  ;;  %4476 = vmatmul.msk.f32.gmra.mxu3 %vm406_vm0, %v4688_v28  ;;  %4572 = vmatmul.msk.f32.gmra.mxu2 %vm406_vm0, %v4688_v28  ;;  %v1882_v32 = vpop.f32.mrf.mxu0 }
 0x367   : > { %v3255_v18 = vsel %vm9445_vm6, %v3191_v36, %v3159_v35  ;;  %v1995_v22 = vpop.f32.mrf.mxu1  ;;  %v2272_v42 = vsub.f32 %v1882_v32, %v7317_v53 }
 0x368   : > { %3942 = vst [vmem:[%s7428_s28] sm:$0xff] %v3910_v12  ;;  %v3287_v45 = vsel %vm9448_vm7, %v3255_v18, %v9446_v49  ;;  %v2273_v27 = vsub.f32 %v1995_v22, %v7323_v51  ;;  %vm9450_vm7 = vmmov %vm9445_vm6 }
 0x369   : > { %v3319_v56 = vand.u32 2147483647, %v3287_v45  ;;  %vm3383_vm8 = vcmp.gt.f32.partialorder %v3287_v45, 0.0  ;;  %v1769_v63 = vpop.f32.mrf.mxu3  ;;  %v2108_v14 = vpop.f32.mrf.mxu2  ;;  %4508 = vmatmul.msk.f32.gmra.mxu0 %vm406_vm0, %v4688_v28 }
 0x36a   : > { %v3417_v0 = vsel %vm3383_vm8, %v7340_v59, %v7342_v19  ;;  %v3451_v39 = vsel %vm3383_vm8, %v7344_v58, %v7349_v38  ;;  %v3485_v11 = vsel %vm3383_vm8, %v7351_v6, %v7353_v30  ;;  %v3519_v37 = vsel %vm3383_vm8, %v7355_v29, %v7357_v57  ;;  %4540 = vmatmul.msk.f32.gmra.mxu1 %vm406_vm0, %v4688_v28 }
 0x36b   : > { %v3351_v47 = vmin.f32 %v9449_v2, %v3319_v56  ;;  %v3553_v33 = vsel %vm3383_vm8, %v7359_v13, %v7366_v54  ;;  %v3587_v34 = vsel %vm3383_vm8, %v7368_v24, %v7372_v41  ;;  %v3621_v8 = vsel %vm3383_vm8, %v7374_v26, %v7376_v61  ;;  %v4689_v56 = vld [vmem:[%s4821_s15 + $0x98] sm:$0xff] }
 0x36c   : > { %v3655_v35 = vsel %vm3383_vm8, %v7381_v43, %v7383_v48  ;;  %v3687_v12 = vsel %vm3063_vm10, %v3451_v39, %v3417_v0  ;;  %v3719_v36 = vsel %vm3063_vm10, %v3519_v37, %v3485_v11  ;;  %v3751_v32 = vsel %vm3063_vm10, %v3587_v34, %v3553_v33  ;;  %v9453_v37 = vld [vmem:[#allocation62_spill] sm:$0xff] }
 0x36d   : > { %v3783_v18 = vsel %vm3063_vm10, %v3655_v35, %v3621_v8  ;;  %v3815_v49 = vsel %vm9445_vm6, %v3719_v36, %v3687_v12  ;;  %v2271_v28 = vsub.f32 %v1769_v63, %v7328_v60  ;;  %v2274_v45 = vsub.f32 %v2108_v14, %v7333_v3 }
 0x36e   : > { %v3847_v22 = vsel %vm9450_vm7, %v3783_v18, %v3751_v32  ;;  %4477 = vmatmul.msk.f32.gmra.mxu3 %vm406_vm0, %v4689_v56  ;;  %4573 = vmatmul.msk.f32.gmra.mxu2 %vm406_vm0, %v4689_v56  ;;  %v1885_v0 = vpop.f32.mrf.mxu0  ;;  %vm9451_vm8 = vcmp.gt.f32.partialorder %v9447_v16, 0.0  ;;  %vm9452_vm10 = vcmp.gt.f32.partialorder %v5713_v23, 0.0  ;;  %vm9454_vm6 = vcmp.gt.f32.partialorder %v9453_v37, 0.0  ;;  %v9455_v32 = vld [vmem:[#allocation68_spill] sm:$0xff] }
 0x36f   : > { %v3879_v7 = vsel %vm9451_vm8, %v3847_v22, %v3815_v49  ;;  %v3160_v39 = vsel %vm3064_vm12, %v2272_v42, %v2271_v28  ;;  %v3192_v63 = vsel %vm3064_vm12, %v2274_v45, %v2273_v27  ;;  %v1998_v11 = vpop.f32.mrf.mxu1  ;;  %v2287_v34 = vsub.f32 %v1885_v0, %v7317_v53  ;;  %vm9456_vm8 = vmmov %vm9452_vm10 }
 0x370   : > { %v3911_v14 = vmul.f32 %v3879_v7, %v3351_v47  ;;  %v3256_v17 = vsel %vm9452_vm10, %v3192_v63, %v3160_v39  ;;  %v2288_v16 = vsub.f32 %v1998_v11, %v7323_v51  ;;  %vm9457_vm10 = vcmp.gt.f32.partialorder %v5782_v15, 0.0  ;;  %v4690_v11 = vld [vmem:[%s4821_s15 + $0xa0] sm:$0xff] }
 0x371   : > { %v3288_v2 = vsel %vm9454_vm6, %v3256_v17, %v6785_v44  ;;  %v1772_v33 = vpop.f32.mrf.mxu3  ;;  %v2111_v8 = vpop.f32.mrf.mxu2  ;;  %4509 = vmatmul.msk.f32.gmra.mxu0 %vm406_vm0, %v4689_v56  ;;  %vm9458_vm6 = vmmov %vm9457_vm10 }
 0x372   : > { %3943 = vst [vmem:[%s7428_s28 + $0x8] sm:$0xff] %v3911_v14  ;;  %v3320_v42 = vand.u32 2147483647, %v3288_v2  ;;  %vm3384_vm7 = vcmp.gt.f32.partialorder %v3288_v2, 0.0  ;;  %v2286_v27 = vsub.f32 %v1772_v33, %v7328_v60  ;;  %v2289_v47 = vsub.f32 %v2111_v8, %v7333_v3  ;;  %4541 = vmatmul.msk.f32.gmra.mxu1 %vm406_vm0, %v4689_v56  ;;  %v9460_v8 = vld [vmem:[#allocation66_spill] sm:$0xff] }
 0x373   : > { %v3418_v35 = vsel %vm3384_vm7, %v7340_v59, %v7342_v19  ;;  %v3452_v44 = vsel %vm3384_vm7, %v7344_v58, %v7349_v38  ;;  %v3486_v12 = vsel %vm3384_vm7, %v7351_v6, %v7353_v30  ;;  %v3520_v36 = vsel %vm3384_vm7, %v7355_v29, %v7357_v57 }
 0x374   : > { %v3352_v18 = vmin.f32 %v9455_v32, %v3320_v42  ;;  %v3554_v49 = vsel %vm3384_vm7, %v7359_v13, %v7366_v54  ;;  %v3588_v28 = vsel %vm3384_vm7, %v7368_v24, %v7372_v41  ;;  %v3622_v45 = vsel %vm3384_vm7, %v7374_v26, %v7376_v61 }
 0x375   : > { %v3656_v22 = vsel %vm3384_vm7, %v7381_v43, %v7383_v48  ;;  %v3688_v0 = vsel %vm3064_vm12, %v3452_v44, %v3418_v35  ;;  %v3720_v56 = vsel %vm3064_vm12, %v3520_v36, %v3486_v12  ;;  %v3752_v7 = vsel %vm3064_vm12, %v3588_v28, %v3554_v49  ;;  %vm9459_vm7 = vmmov %vm9456_vm8 }
 0x376   : > { %v3784_v39 = vsel %vm3064_vm12, %v3656_v22, %v3622_v45  ;;  %v3816_v63 = vsel %vm9456_vm8, %v3720_v56, %v3688_v0  ;;  %v3161_v14 = vsel %vm9457_vm10, %v2287_v34, %v2286_v27  ;;  %v3193_v17 = vsel %vm9458_vm6, %v2289_v47, %v2288_v16  ;;  %4478 = vmatmul.msk.f32.gmra.mxu3 %vm406_vm0, %v4690_v11  ;;  %v1888_v2 = vpop.f32.mrf.mxu0  ;;  %v9463_v34 = vld [vmem:[#allocation113_spill] sm:$0xff]  ;;  %v9464_v27 = vld [vmem:[#allocation64_spill] sm:$0xff]  ;;  %v9466_v45 = vld [vmem:[#allocation70_spill] sm:$0xff] }
 0x377   : > { %v3848_v33 = vsel %vm9459_vm7, %v3784_v39, %v3752_v7  ;;  %vm9461_vm5 = vcmp.gt.f32.partialorder %v9460_v8, 0.0  ;;  %4574 = vmatmul.msk.f32.gmra.mxu2 %vm406_vm0, %v4690_v11  ;;  %vm9462_vm12 = vcmp.gt.f32.partialorder %v9453_v37, 0.0  ;;  %vm9465_vm8 = vcmp.gt.f32.partialorder %v9464_v27, 0.0  ;;  %v2001_v35 = vpop.f32.mrf.mxu1 }
 0x378   : > { %v3257_v52 = vsel %vm9461_vm5, %v3193_v17, %v3161_v14  ;;  %v3880_v42 = vsel %vm9462_vm12, %v3848_v33, %v3816_v63  ;;  %v2302_v47 = vsub.f32 %v1888_v2, %v7317_v53  ;;  %v2303_v36 = vsub.f32 %v2001_v35, %v7323_v51  ;;  %vm9467_vm5 = vmmov %vm9458_vm6 }
 0x379   : > { %v3289_v16 = vsel %vm9465_vm8, %v3257_v52, %v9463_v34  ;;  %v3912_v44 = vmul.f32 %v3880_v42, %v3352_v18  ;;  %v1775_v23 = vpop.f32.mrf.mxu3  ;;  %v2114_v32 = vpop.f32.mrf.mxu2  ;;  %4510 = vmatmul.msk.f32.gmra.mxu0 %vm406_vm0, %v4690_v11  ;;  %vm9468_vm6 = vmmov %vm9467_vm5  ;;  %vm9471_vm8 = vcmp.gt.f32.partialorder %v9460_v8, 0.0 }
 0x37a   : > { %v3321_v12 = vand.u32 2147483647, %v3289_v16  ;;  %vm3385_vm10 = vcmp.gt.f32.partialorder %v3289_v16, 0.0  ;;  %vm9469_vm7 = vmmov %vm9467_vm5  ;;  %4542 = vmatmul.msk.f32.gmra.mxu1 %vm406_vm0, %v4690_v11  ;;  %v2301_v52 = vsub.f32 %v1775_v23, %v7328_v60  ;;  %v2304_v42 = vsub.f32 %v2114_v32, %v7333_v3  ;;  %v4691_v16 = vld [vmem:[%s4821_s15 + $0xa8] sm:$0xff]  ;;  %v9477_v32 = vld [vmem:[#allocation114_spill] sm:$0xff] }
 0x37b   : > { %v3419_v37 = vsel %vm3385_vm10, %v7340_v59, %v7342_v19  ;;  %v3453_v49 = vsel %vm3385_vm10, %v7344_v58, %v7349_v38  ;;  %v3487_v28 = vsel %vm3385_vm10, %v7351_v6, %v7353_v30  ;;  %v3521_v18 = vsel %vm3385_vm10, %v7355_v29, %v7357_v57  ;;  %3944 = vst [vmem:[%s7428_s28 + $0x10] sm:$0xff] %v3912_v44  ;;  %vm9470_vm12 = vmmov %vm9467_vm5 }
 0x37c   : > { %v3353_v22 = vmin.f32 %v9466_v45, %v3321_v12  ;;  %v3555_v0 = vsel %vm3385_vm10, %v7359_v13, %v7366_v54  ;;  %v3589_v56 = vsel %vm3385_vm10, %v7368_v24, %v7372_v41  ;;  %v3623_v7 = vsel %vm3385_vm10, %v7374_v26, %v7376_v61 }
 0x37d   : > { %v3657_v39 = vsel %vm3385_vm10, %v7381_v43, %v7383_v48  ;;  %v3689_v63 = vsel %vm9467_vm5, %v3453_v49, %v3419_v37  ;;  %v3721_v14 = vsel %vm9468_vm6, %v3521_v18, %v3487_v28  ;;  %v3753_v17 = vsel %vm9469_vm7, %v3589_v56, %v3555_v0  ;;  %vm9472_vm10 = vmmov %vm9471_vm8  ;;  %v9478_v37 = vld [vmem:[#allocation67_spill] sm:$0xff] }
 0x37e   : > { %v3785_v2 = vsel %vm9470_vm12, %v3657_v39, %v3623_v7  ;;  %v3817_v33 = vsel %vm9471_vm8, %v3721_v14, %v3689_v63  ;;  %4479 = vmatmul.msk.f32.gmra.mxu3 %vm406_vm0, %v4691_v16  ;;  %v1891_v35 = vpop.f32.mrf.mxu0  ;;  %vm9473_vm5 = vcmp.gt.f32.partialorder %v9464_v27, 0.0  ;;  %vm9474_vm6 = vcmp.gt.f32.partialorder %v5824_v20, 0.0  ;;  %v9480_v63 = vld [vmem:[#allocation72_spill] sm:$0xff] }
 0x37f   : > { %v3849_v34 = vsel %vm9472_vm10, %v3785_v2, %v3753_v17  ;;  %v3162_v15 = vsel %vm9474_vm6, %v2302_v47, %v2301_v52  ;;  %vm9475_vm7 = vmmov %vm9474_vm6  ;;  %4575 = vmatmul.msk.f32.gmra.mxu2 %vm406_vm0, %v4691_v16  ;;  %vm9476_vm12 = vcmp.gt.f32.partialorder %v5791_v46, 0.0  ;;  %v2004_v23 = vpop.f32.mrf.mxu1  ;;  %vm9479_vm8 = vcmp.gt.f32.partialorder %v9478_v37, 0.0 }
 0x380   : > { %v3881_v11 = vsel %vm9473_vm5, %v3849_v34, %v3817_v33  ;;  %v3194_v44 = vsel %vm9475_vm7, %v2304_v42, %v2303_v36  ;;  %v2317_v27 = vsub.f32 %v1891_v35, %v7317_v53  ;;  %v2318_v18 = vsub.f32 %v2004_v23, %v7323_v51  ;;  %vm9481_vm5 = vmmov %vm9474_vm6 }
 0x381   : > { %v3913_v12 = vmul.f32 %v3881_v11, %v3353_v22  ;;  %v3258_v8 = vsel %vm9476_vm12, %v3194_v44, %v3162_v15  ;;  %v1778_v28 = vpop.f32.mrf.mxu3  ;;  %v2117_v47 = vpop.f32.mrf.mxu2  ;;  %4511 = vmatmul.msk.f32.gmra.mxu0 %vm406_vm0, %v4691_v16  ;;  %vm9482_vm6 = vmmov %vm9481_vm5 }
 0x382   : > { %v3290_v49 = vsel %vm9479_vm8, %v3258_v8, %v9477_v32  ;;  %v2316_v45 = vsub.f32 %v1778_v28, %v7328_v60  ;;  %v2319_v22 = vsub.f32 %v2117_v47, %v7333_v3  ;;  %4543 = vmatmul.msk.f32.gmra.mxu1 %vm406_vm0, %v4691_v16  ;;  %vm9483_vm7 = vmmov %vm9481_vm5  ;;  %vm9485_vm8 = vcmp.gt.f32.partialorder %v5791_v46, 0.0  ;;  %v9492_v28 = vld [vmem:[#allocation69_spill] sm:$0xff] }
 0x383   : > { %3945 = vst [vmem:[%s7428_s28 + $0x18] sm:$0xff] %v3913_v12  ;;  %v3322_v36 = vand.u32 2147483647, %v3290_v49  ;;  %vm3386_vm10 = vcmp.gt.f32.partialorder %v3290_v49, 0.0  ;;  %vm9484_vm12 = vmmov %vm9481_vm5  ;;  %v4692_v12 = vld [vmem:[%s4821_s15 + $0xb0] sm:$0xff]  ;;  %v9491_v49 = vld [vmem:[#allocation115_spill] sm:$0xff] }
 0x384   : > { %v3420_v0 = vsel %vm3386_vm10, %v7340_v59, %v7342_v19  ;;  %v3454_v56 = vsel %vm3386_vm10, %v7344_v58, %v7349_v38  ;;  %v3488_v7 = vsel %vm3386_vm10, %v7351_v6, %v7353_v30  ;;  %v3522_v39 = vsel %vm3386_vm10, %v7355_v29, %v7357_v57 }
 0x385   : > { %v3354_v14 = vmin.f32 %v9480_v63, %v3322_v36  ;;  %v3556_v17 = vsel %vm3386_vm10, %v7359_v13, %v7366_v54  ;;  %v3590_v2 = vsel %vm3386_vm10, %v7368_v24, %v7372_v41  ;;  %v3624_v33 = vsel %vm3386_vm10, %v7374_v26, %v7376_v61  ;;  %v9494_v63 = vld [vmem:[#allocation74_spill] sm:$0xff] }
 0x386   : > { %v3658_v52 = vsel %vm3386_vm10, %v7381_v43, %v7383_v48  ;;  %v3690_v42 = vsel %vm9481_vm5, %v3454_v56, %v3420_v0  ;;  %v3722_v34 = vsel %vm9482_vm6, %v3522_v39, %v3488_v7  ;;  %v3754_v35 = vsel %vm9483_vm7, %v3590_v2, %v3556_v17  ;;  %vm9487_vm10 = vmmov %vm9486_vm4  ;;  %4480 = vmatmul.msk.f32.gmra.mxu3 %vm406_vm0, %v4692_v12  ;;  %v1894_v8 = vpop.f32.mrf.mxu0 }
 0x387   : > { %v3786_v11 = vsel %vm9484_vm12, %v3658_v52, %v3624_v33  ;;  %v3818_v15 = vsel %vm9485_vm8, %v3722_v34, %v3690_v42  ;;  %v3163_v16 = vsel %vm9486_vm4, %v2317_v27, %v2316_v45  ;;  %v3195_v44 = vsel %vm9487_vm10, %v2319_v22, %v2318_v18  ;;  %vm9488_vm5 = vmmov %vm9485_vm8  ;;  %4576 = vmatmul.msk.f32.gmra.mxu2 %vm406_vm0, %v4692_v12  ;;  %v2007_v47 = vpop.f32.mrf.mxu1 }
 0x388   : > { %v3850_v23 = vsel %vm9488_vm5, %v3786_v11, %v3754_v35  ;;  %vm9489_vm6 = vcmp.gt.f32.partialorder %v5833_v55, 0.0  ;;  %vm9490_vm7 = vcmp.gt.f32.partialorder %v9478_v37, 0.0  ;;  %vm9493_vm4 = vcmp.gt.f32.partialorder %v9492_v28, 0.0  ;;  %vm9495_vm8 = vmmov %vm9487_vm10 }
 0x389   : > { %v3259_v20 = vsel %vm9489_vm6, %v3195_v44, %v3163_v16  ;;  %v3882_v32 = vsel %vm9490_vm7, %v3850_v23, %v3818_v15  ;;  %v2332_v18 = vsub.f32 %v1894_v8, %v7317_v53  ;;  %v1781_v46 = vpop.f32.mrf.mxu3  ;;  %v2333_v22 = vsub.f32 %v2007_v47, %v7323_v51  ;;  %v2120_v0 = vpop.f32.mrf.mxu2  ;;  %4512 = vmatmul.msk.f32.gmra.mxu0 %vm406_vm0, %v4692_v12  ;;  %vm9496_vm10 = vmmov %vm9495_vm8  ;;  %v4693_v23 = vld [vmem:[%s4821_s15 + $0xb8] sm:$0xff]  ;;  %v9505_v47 = vld [vmem:[#allocation116_spill] sm:$0xff] }
 0x38a   : > { %v3291_v27 = vsel %vm9493_vm4, %v3259_v20, %v9491_v49  ;;  %v3914_v36 = vmul.f32 %v3882_v32, %v3354_v14  ;;  %vm9497_vm5 = vmmov %vm9495_vm8  ;;  %4544 = vmatmul.msk.f32.gmra.mxu1 %vm406_vm0, %v4692_v12  ;;  %vm9499_vm7 = vcmp.gt.f32.partialorder %v5833_v55, 0.0  ;;  %v2331_v16 = vsub.f32 %v1781_v46, %v7328_v60 }
 0x38b   : > { %v3323_v45 = vand.u32 2147483647, %v3291_v27  ;;  %vm3387_vm12 = vcmp.gt.f32.partialorder %v3291_v27, 0.0  ;;  %vm9498_vm6 = vmmov %vm9497_vm5  ;;  %v2334_v44 = vsub.f32 %v2120_v0, %v7333_v3 }
 0x38c   : > { %v3421_v37 = vsel %vm3387_vm12, %v7340_v59, %v7342_v19  ;;  %v3455_v56 = vsel %vm3387_vm12, %v7344_v58, %v7349_v38  ;;  %v3489_v7 = vsel %vm3387_vm12, %v7351_v6, %v7353_v30  ;;  %v3523_v39 = vsel %vm3387_vm12, %v7355_v29, %v7357_v57  ;;  %3946 = vst [vmem:[%s7428_s28 + $0x20] sm:$0xff] %v3914_v36  ;;  %vm9500_vm4 = vmmov %vm9499_vm7  ;;  %v9506_v36 = vld [vmem:[#allocation71_spill] sm:$0xff] }
 0x38d   : > { %v3355_v14 = vmin.f32 %v9494_v63, %v3323_v45  ;;  %v3557_v17 = vsel %vm3387_vm12, %v7359_v13, %v7366_v54  ;;  %v3591_v2 = vsel %vm3387_vm12, %v7368_v24, %v7372_v41  ;;  %v3625_v33 = vsel %vm3387_vm12, %v7374_v26, %v7376_v61 }
 0x38e   : > { %v3659_v52 = vsel %vm3387_vm12, %v7381_v43, %v7383_v48  ;;  %v3691_v42 = vsel %vm9495_vm8, %v3455_v56, %v3421_v37  ;;  %v3723_v34 = vsel %vm9496_vm10, %v3523_v39, %v3489_v7  ;;  %v3755_v35 = vsel %vm9497_vm5, %v3591_v2, %v3557_v17  ;;  %4481 = vmatmul.msk.f32.gmra.mxu3 %vm406_vm0, %v4693_v23  ;;  %v1897_v20 = vpop.f32.mrf.mxu0  ;;  %v9508_v17 = vld [vmem:[#allocation4_spill] sm:$0xff] }
 0x38f   : > { %v3787_v11 = vsel %vm9498_vm6, %v3659_v52, %v3625_v33  ;;  %v3819_v15 = vsel %vm9499_vm7, %v3723_v34, %v3691_v42  ;;  %vm9501_vm12 = vcmp.gt.f32.partialorder %v9492_v28, 0.0  ;;  %vm9502_vm8 = vcmp.gt.f32.partialorder %v5905_v50, 0.0  ;;  %4577 = vmatmul.msk.f32.gmra.mxu2 %vm406_vm0, %v4693_v23  ;;  %v2010_v27 = vpop.f32.mrf.mxu1 }
 0x390   : > { %v3851_v8 = vsel %vm9500_vm4, %v3787_v11, %v3755_v35  ;;  %v3164_v21 = vsel %vm9502_vm8, %v2332_v18, %v2331_v16  ;;  %vm9503_vm10 = vmmov %vm9502_vm8  ;;  %vm9504_vm5 = vcmp.gt.f32.partialorder %v5875_v5, 0.0  ;;  %vm9507_vm6 = vcmp.gt.f32.partialorder %v9506_v36, 0.0 }
 0x391   : > { %v3883_v12 = vsel %vm9501_vm12, %v3851_v8, %v3819_v15  ;;  %v3196_v32 = vsel %vm9503_vm10, %v2334_v44, %v2333_v22  ;;  %v1784_v46 = vpop.f32.mrf.mxu3  ;;  %v2347_v28 = vsub.f32 %v1897_v20, %v7317_v53  ;;  %v2348_v0 = vsub.f32 %v2010_v27, %v7323_v51  ;;  %v2123_v18 = vpop.f32.mrf.mxu2  ;;  %4513 = vmatmul.msk.f32.gmra.mxu0 %vm406_vm0, %v4693_v23  ;;  %vm9509_vm4 = vmmov %vm9502_vm8  ;;  %v4694_v20 = vld [vmem:[%s4821_s15 + $0xc0] sm:$0xff] }
 0x392   : > { %v3915_v49 = vmul.f32 %v3883_v12, %v3355_v14  ;;  %v3260_v55 = vsel %vm9504_vm5, %v3196_v32, %v3164_v21  ;;  %v2346_v37 = vsub.f32 %v1784_v46, %v7328_v60  ;;  %v2349_v56 = vsub.f32 %v2123_v18, %v7333_v3  ;;  %4545 = vmatmul.msk.f32.gmra.mxu1 %vm406_vm0, %v4693_v23  ;;  %vm9510_vm12 = vmmov %vm9509_vm4 }
 0x393   : > { %v3292_v45 = vsel %vm9507_vm6, %v3260_v55, %v9505_v47  ;;  %vm9511_vm8 = vmmov %vm9509_vm4  ;;  %vm9513_vm6 = vcmp.gt.f32.partialorder %v5944_v25, 0.0  ;;  %v9519_v55 = vld [vmem:[#allocation73_spill] sm:$0xff] }
 0x394   : > { %3947 = vst [vmem:[%s7428_s28 + $0x28] sm:$0xff] %v3915_v49  ;;  %v3324_v22 = vand.u32 2147483647, %v3292_v45  ;;  %vm3388_vm7 = vcmp.gt.f32.partialorder %v3292_v45, 0.0  ;;  %vm9512_vm10 = vmmov %vm9509_vm4  ;;  %v3165_v8 = vsel %vm9513_vm6, %v2347_v28, %v2346_v37  ;;  %v9518_v49 = vld [vmem:[#allocation117_spill] sm:$0xff] }
 0x395   : > { %v3422_v7 = vsel %vm3388_vm7, %v7340_v59, %v7342_v19  ;;  %v3456_v39 = vsel %vm3388_vm7, %v7344_v58, %v7349_v38  ;;  %v3490_v63 = vsel %vm3388_vm7, %v7351_v6, %v7353_v30  ;;  %v3524_v14 = vsel %vm3388_vm7, %v7355_v29, %v7357_v57 }
 0x396   : > { %v3356_v2 = vmin.f32 %v9508_v17, %v3324_v22  ;;  %v3558_v33 = vsel %vm3388_vm7, %v7359_v13, %v7366_v54  ;;  %v3592_v52 = vsel %vm3388_vm7, %v7368_v24, %v7372_v41  ;;  %v3626_v42 = vsel %vm3388_vm7, %v7374_v26, %v7376_v61  ;;  %4482 = vmatmul.msk.f32.gmra.mxu3 %vm406_vm0, %v4694_v20  ;;  %v1900_v12 = vpop.f32.mrf.mxu0 }
 0x397   : > { %v3660_v34 = vsel %vm3388_vm7, %v7381_v43, %v7383_v48  ;;  %v3692_v35 = vsel %vm9509_vm4, %v3456_v39, %v3422_v7  ;;  %v3724_v11 = vsel %vm9510_vm12, %v3524_v14, %v3490_v63  ;;  %v3756_v15 = vsel %vm9511_vm8, %v3592_v52, %v3558_v33  ;;  %vm9514_vm7 = vmmov %vm9513_vm6  ;;  %4578 = vmatmul.msk.f32.gmra.mxu2 %vm406_vm0, %v4694_v20  ;;  %v2013_v45 = vpop.f32.mrf.mxu1  ;;  %v9521_v7 = vld [vmem:[#allocation5_spill] sm:$0xff] }
 0x398   : > { %v3788_v16 = vsel %vm9512_vm10, %v3660_v34, %v3626_v42  ;;  %v3820_v44 = vsel %vm9504_vm5, %v3724_v11, %v3692_v35  ;;  %v3197_v23 = vsel %vm9514_vm7, %v2349_v56, %v2348_v0  ;;  %vm9515_vm4 = vmmov %vm9504_vm5  ;;  %vm9516_vm12 = vcmp.gt.f32.partialorder %v5914_v9, 0.0 }
 0x399   : > { %v3852_v21 = vsel %vm9515_vm4, %v3788_v16, %v3756_v15  ;;  %v3261_v50 = vsel %vm9516_vm12, %v3197_v23, %v3165_v8  ;;  %vm9517_vm8 = vcmp.gt.f32.partialorder %v9506_v36, 0.0  ;;  %vm9520_vm10 = vcmp.gt.f32.partialorder %v9519_v55, 0.0  ;;  %v1787_v5 = vpop.f32.mrf.mxu3  ;;  %v2126_v18 = vpop.f32.mrf.mxu2  ;;  %4514 = vmatmul.msk.f32.gmra.mxu0 %vm406_vm0, %v4694_v20  ;;  %vm9522_vm7 = vmmov %vm9513_vm6 }
 0x39a   : > { %v3884_v32 = vsel %vm9517_vm8, %v3852_v21, %v3820_v44  ;;  %v3293_v27 = vsel %vm9520_vm10, %v3261_v50, %v9518_v49  ;;  %v2362_v47 = vsub.f32 %v1900_v12, %v7317_v53  ;;  %v2363_v0 = vsub.f32 %v2013_v45, %v7323_v51  ;;  %vm9523_vm4 = vmmov %vm9513_vm6  ;;  %4546 = vmatmul.msk.f32.gmra.mxu1 %vm406_vm0, %v4694_v20  ;;  %v4695_v44 = vld [vmem:[%s4821_s15 + $0xc8] sm:$0xff]  ;;  %v9531_v50 = vld [vmem:[#allocation118_spill] sm:$0xff] }
 0x39b   : > { %v3916_v46 = vmul.f32 %v3884_v32, %v3356_v2  ;;  %v3325_v28 = vand.u32 2147483647, %v3293_v27  ;;  %vm3389_vm5 = vcmp.gt.f32.partialorder %v3293_v27, 0.0  ;;  %vm9524_vm12 = vmmov %vm9523_vm4  ;;  %vm9525_vm8 = vcmp.gt.f32.partialorder %v5914_v9, 0.0  ;;  %v9532_v32 = vld [vmem:[#allocation3_spill] sm:$0xff] }
 0x39c   : > { %v3423_v36 = vsel %vm3389_vm5, %v7340_v59, %v7342_v19  ;;  %v3457_v22 = vsel %vm3389_vm5, %v7344_v58, %v7349_v38  ;;  %v3491_v37 = vsel %vm3389_vm5, %v7351_v6, %v7353_v30  ;;  %v3525_v56 = vsel %vm3389_vm5, %v7355_v29, %v7357_v57  ;;  %vm9526_vm10 = vmmov %vm9525_vm8 }
 0x39d   : > { %3948 = vst [vmem:[%s7428_s28 + $0x30] sm:$0xff] %v3916_v46  ;;  %v3357_v39 = vmin.f32 %v9521_v7, %v3325_v28  ;;  %v3559_v63 = vsel %vm3389_vm5, %v7359_v13, %v7366_v54  ;;  %v3593_v14 = vsel %vm3389_vm5, %v7368_v24, %v7372_v41  ;;  %v3627_v17 = vsel %vm3389_vm5, %v7374_v26, %v7376_v61 }
 0x39e   : > { %v3661_v2 = vsel %vm3389_vm5, %v7381_v43, %v7383_v48  ;;  %v3693_v33 = vsel %vm9513_vm6, %v3457_v22, %v3423_v36  ;;  %v3725_v52 = vsel %vm9522_vm7, %v3525_v56, %v3491_v37  ;;  %v3757_v42 = vsel %vm9523_vm4, %v3593_v14, %v3559_v63  ;;  %4483 = vmatmul.msk.f32.gmra.mxu3 %vm406_vm0, %v4695_v44  ;;  %v1903_v8 = vpop.f32.mrf.mxu0  ;;  %v9534_v37 = vld [vmem:[#allocation8_spill] sm:$0xff] }
 0x39f   : > { %v3789_v34 = vsel %vm9524_vm12, %v3661_v2, %v3627_v17  ;;  %v3821_v35 = vsel %vm9525_vm8, %v3725_v52, %v3693_v33  ;;  %v2361_v11 = vsub.f32 %v1787_v5, %v7328_v60  ;;  %v2364_v15 = vsub.f32 %v2126_v18, %v7333_v3  ;;  %4579 = vmatmul.msk.f32.gmra.mxu2 %vm406_vm0, %v4695_v44  ;;  %v2016_v21 = vpop.f32.mrf.mxu1 }
 0x3a0   : > { %v3853_v16 = vsel %vm9526_vm10, %v3789_v34, %v3757_v42  ;;  %vm9527_vm5 = vcmp.gt.f32.partialorder %v9519_v55, 0.0  ;;  %vm9528_vm6 = vcmp.gt.f32.partialorder %v5980_v1, 0.0  ;;  %vm9530_vm4 = vcmp.gt.f32.partialorder %v5952_v31, 0.0  ;;  %v9539_v34 = vld [vmem:[#allocation9_spill] sm:$0xff] }
 0x3a1   : > { %v3885_v23 = vsel %vm9527_vm5, %v3853_v16, %v3821_v35  ;;  %v3166_v25 = vsel %vm9528_vm6, %v2362_v47, %v2361_v11  ;;  %vm9529_vm7 = vmmov %vm9528_vm6  ;;  %vm9533_vm12 = vcmp.gt.f32.partialorder %v9532_v32, 0.0  ;;  %v1790_v27 = vpop.f32.mrf.mxu3  ;;  %v2377_v55 = vsub.f32 %v1903_v8, %v7317_v53  ;;  %v2129_v47 = vpop.f32.mrf.mxu2  ;;  %4515 = vmatmul.msk.f32.gmra.mxu0 %vm406_vm0, %v4695_v44  ;;  %v9543_v8 = vld [vmem:[#allocation6_spill] sm:$0xff] }
 0x3a2   : > { %v3198_v20 = vsel %vm9529_vm7, %v2364_v15, %v2363_v0  ;;  %v3917_v12 = vmul.f32 %v3885_v23, %v3357_v39  ;;  %v2378_v45 = vsub.f32 %v2016_v21, %v7323_v51  ;;  %v2376_v28 = vsub.f32 %v1790_v27, %v7328_v60  ;;  %4547 = vmatmul.msk.f32.gmra.mxu1 %vm406_vm0, %v4695_v44  ;;  %vm9535_vm10 = vmmov %vm9528_vm6  ;;  %v4696_v15 = vld [vmem:[%s4821_s15 + $0xd0] sm:$0xff] }
 0x3a3   : > { %v3262_v9 = vsel %vm9530_vm4, %v3198_v20, %v3166_v25  ;;  %v2379_v5 = vsub.f32 %v2129_v47, %v7333_v3  ;;  %vm9536_vm5 = vmmov %vm9528_vm6  ;;  %v9546_v25 = vld [vmem:[#allocation119_spill] sm:$0xff]  ;;  %v9547_v20 = vld [vmem:[#allocation2_spill] sm:$0xff] }
 0x3a4   : > { %v3294_v49 = vsel %vm9533_vm12, %v3262_v9, %v9531_v50  ;;  %3949 = vst [vmem:[%s7428_s28 + $0x38] sm:$0xff] %v3917_v12  ;;  %vm9537_vm6 = vmmov %vm9536_vm5  ;;  %vm9540_vm12 = vcmp.gt.f32.partialorder %v9539_v34, 0.0  ;;  %v9556_v34 = vld [vmem:[#allocation13_spill] sm:$0xff] }
 0x3a5   : > { %v3326_v46 = vand.u32 2147483647, %v3294_v49  ;;  %vm3390_vm8 = vcmp.gt.f32.partialorder %v3294_v49, 0.0  ;;  %vm9538_vm7 = vmmov %vm9536_vm5  ;;  %v3167_v35 = vsel %vm9540_vm12, %v2377_v55, %v2376_v28  ;;  %v9549_v28 = vld [vmem:[#allocation12_spill] sm:$0xff] }
 0x3a6   : > { %v3424_v0 = vsel %vm3390_vm8, %v7340_v59, %v7342_v19  ;;  %v3458_v18 = vsel %vm3390_vm8, %v7344_v58, %v7349_v38  ;;  %v3492_v36 = vsel %vm3390_vm8, %v7351_v6, %v7353_v30  ;;  %v3526_v22 = vsel %vm3390_vm8, %v7355_v29, %v7357_v57  ;;  %4484 = vmatmul.msk.f32.gmra.mxu3 %vm406_vm0, %v4696_v15  ;;  %v1906_v16 = vpop.f32.mrf.mxu0 }
 0x3a7   : > { %v3358_v56 = vmin.f32 %v9534_v37, %v3326_v46  ;;  %v3560_v7 = vsel %vm3390_vm8, %v7359_v13, %v7366_v54  ;;  %v3594_v39 = vsel %vm3390_vm8, %v7368_v24, %v7372_v41  ;;  %v3628_v63 = vsel %vm3390_vm8, %v7374_v26, %v7376_v61  ;;  %4580 = vmatmul.msk.f32.gmra.mxu2 %vm406_vm0, %v4696_v15  ;;  %v2019_v21 = vpop.f32.mrf.mxu1 }
 0x3a8   : > { %v3662_v14 = vsel %vm3390_vm8, %v7381_v43, %v7383_v48  ;;  %v3694_v17 = vsel %vm9535_vm10, %v3458_v18, %v3424_v0  ;;  %v3726_v2 = vsel %vm9536_vm5, %v3526_v22, %v3492_v36  ;;  %v3758_v33 = vsel %vm9537_vm6, %v3594_v39, %v3560_v7  ;;  %vm9541_vm8 = vmmov %vm9540_vm12 }
 0x3a9   : > { %v3790_v52 = vsel %vm9538_vm7, %v3662_v14, %v3628_v63  ;;  %v3822_v42 = vsel %vm9530_vm4, %v3726_v2, %v3694_v17  ;;  %v3199_v11 = vsel %vm9541_vm8, %v2379_v5, %v2378_v45  ;;  %vm9542_vm10 = vmmov %vm9530_vm4  ;;  %vm9544_vm5 = vcmp.gt.f32.partialorder %v9543_v8, 0.0  ;;  %v1793_v31 = vpop.f32.mrf.mxu3  ;;  %v2132_v55 = vpop.f32.mrf.mxu2  ;;  %4516 = vmatmul.msk.f32.gmra.mxu0 %vm406_vm0, %v4696_v15 }
 0x3aa   : > { %v3854_v44 = vsel %vm9542_vm10, %v3790_v52, %v3758_v33  ;;  %v3263_v1 = vsel %vm9544_vm5, %v3199_v11, %v3167_v35  ;;  %vm9545_vm6 = vcmp.gt.f32.partialorder %v9532_v32, 0.0  ;;  %vm9548_vm7 = vcmp.gt.f32.partialorder %v9547_v20, 0.0  ;;  %vm9550_vm12 = vmmov %vm9541_vm8  ;;  %4548 = vmatmul.msk.f32.gmra.mxu1 %vm406_vm0, %v4696_v15  ;;  %v4697_v33 = vld [vmem:[%s4821_s15 + $0xd8] sm:$0xff] }
 0x3ab   : > { %v3886_v23 = vsel %vm9545_vm6, %v3854_v44, %v3822_v42  ;;  %v3295_v12 = vsel %vm9548_vm7, %v3263_v1, %v9546_v25  ;;  %v2392_v9 = vsub.f32 %v1906_v16, %v7317_v53  ;;  %v2393_v27 = vsub.f32 %v2019_v21, %v7323_v51  ;;  %vm9551_vm10 = vmmov %vm9541_vm8  ;;  %v9559_v16 = vld [vmem:[#allocation10_spill] sm:$0xff]  ;;  %v9561_v1 = vld [vmem:[#allocation120_spill] sm:$0xff] }
 0x3ac   : > { %v3918_v50 = vmul.f32 %v3886_v23, %v3358_v56  ;;  %v3327_v49 = vand.u32 2147483647, %v3295_v12  ;;  %vm3391_vm4 = vcmp.gt.f32.partialorder %v3295_v12, 0.0  ;;  %vm9552_vm5 = vmmov %vm9541_vm8  ;;  %vm9553_vm6 = vcmp.gt.f32.partialorder %v9543_v8, 0.0  ;;  %v9562_v23 = vld [vmem:[#allocation7_spill] sm:$0xff] }
 0x3ad   : > { %v3425_v32 = vsel %vm3391_vm4, %v7340_v59, %v7342_v19  ;;  %v3459_v45 = vsel %vm3391_vm4, %v7344_v58, %v7349_v38  ;;  %v3493_v47 = vsel %vm3391_vm4, %v7351_v6, %v7353_v30  ;;  %v3527_v46 = vsel %vm3391_vm4, %v7355_v29, %v7357_v57  ;;  %vm9554_vm7 = vmmov %vm9553_vm6 }
 0x3ae   : > { %3950 = vst [vmem:[%s7428_s28 + $0x40] sm:$0xff] %v3918_v50  ;;  %v3359_v5 = vmin.f32 %v9549_v28, %v3327_v49  ;;  %v3561_v0 = vsel %vm3391_vm4, %v7359_v13, %v7366_v54  ;;  %v3595_v18 = vsel %vm3391_vm4, %v7368_v24, %v7372_v41  ;;  %v3629_v36 = vsel %vm3391_vm4, %v7374_v26, %v7376_v61  ;;  %v1909_v52 = vpop.f32.mrf.mxu0 }
 0x3af   : > { %v3663_v22 = vsel %vm3391_vm4, %v7381_v43, %v7383_v48  ;;  %v3695_v37 = vsel %vm9550_vm12, %v3459_v45, %v3425_v32  ;;  %v3727_v56 = vsel %vm9541_vm8, %v3527_v46, %v3493_v47  ;;  %v3759_v7 = vsel %vm9551_vm10, %v3595_v18, %v3561_v0  ;;  %4485 = vmatmul.msk.f32.gmra.mxu3 %vm406_vm0, %v4697_v33  ;;  %v2022_v8 = vpop.f32.mrf.mxu1  ;;  %v9564_v47 = vld [vmem:[#allocation16_spill] sm:$0xff] }
 0x3b0   : > { %v3791_v39 = vsel %vm9552_vm5, %v3663_v22, %v3629_v36  ;;  %v3823_v63 = vsel %vm9553_vm6, %v3727_v56, %v3695_v37  ;;  %v2391_v14 = vsub.f32 %v1793_v31, %v7328_v60  ;;  %v2394_v17 = vsub.f32 %v2132_v55, %v7333_v3  ;;  %4581 = vmatmul.msk.f32.gmra.mxu2 %vm406_vm0, %v4697_v33 }
 0x3b1   : > { %v3855_v2 = vsel %vm9554_vm7, %v3791_v39, %v3759_v7  ;;  %vm9555_vm4 = vcmp.gt.f32.partialorder %v9547_v20, 0.0  ;;  %vm9557_vm12 = vcmp.gt.f32.partialorder %v9556_v34, 0.0  ;;  %vm9560_vm10 = vcmp.gt.f32.partialorder %v9559_v16, 0.0  ;;  %v1796_v12 = vpop.f32.mrf.mxu3  ;;  %4517 = vmatmul.msk.f32.gmra.mxu0 %vm406_vm0, %v4697_v33  ;;  %v9569_v39 = vld [vmem:[#allocation17_spill] sm:$0xff] }
 0x3b2   : > { %v3887_v42 = vsel %vm9555_vm4, %v3855_v2, %v3823_v63  ;;  %v3168_v35 = vsel %vm9557_vm12, %v2392_v9, %v2391_v14  ;;  %vm9558_vm8 = vmmov %vm9557_vm12  ;;  %vm9563_vm5 = vcmp.gt.f32.partialorder %v9562_v23, 0.0  ;;  %v2407_v20 = vsub.f32 %v1909_v52, %v7317_v53  ;;  %v2135_v9 = vpop.f32.mrf.mxu2  ;;  %4549 = vmatmul.msk.f32.gmra.mxu1 %vm406_vm0, %v4697_v33  ;;  %v9573_v52 = vld [vmem:[#allocation14_spill] sm:$0xff] }
 0x3b3   : > { %v3200_v11 = vsel %vm9558_vm8, %v2394_v17, %v2393_v27  ;;  %v3919_v15 = vmul.f32 %v3887_v42, %v3359_v5  ;;  %v2408_v21 = vsub.f32 %v2022_v8, %v7323_v51  ;;  %v2406_v49 = vsub.f32 %v1796_v12, %v7328_v60  ;;  %vm9565_vm7 = vmmov %vm9558_vm8  ;;  %v4698_v17 = vld [vmem:[%s4821_s15 + $0xe0] sm:$0xff] }
 0x3b4   : > { %v3264_v44 = vsel %vm9560_vm10, %v3200_v11, %v3168_v35  ;;  %v2409_v31 = vsub.f32 %v2135_v9, %v7333_v3  ;;  %vm9566_vm4 = vmmov %vm9565_vm7  ;;  %v9576_v35 = vld [vmem:[#allocation121_spill] sm:$0xff]  ;;  %v9577_v11 = vld [vmem:[#allocation11_spill] sm:$0xff] }
 0x3b5   : > { %v3296_v25 = vsel %vm9563_vm5, %v3264_v44, %v9561_v1  ;;  %3951 = vst [vmem:[%s7428_s28 + $0x48] sm:$0xff] %v3919_v15  ;;  %vm9567_vm12 = vmmov %vm9566_vm4  ;;  %vm9570_vm5 = vcmp.gt.f32.partialorder %v9569_v39, 0.0 }
 0x3b6   : > { %v3328_v50 = vand.u32 2147483647, %v3296_v25  ;;  %vm3392_vm6 = vcmp.gt.f32.partialorder %v3296_v25, 0.0  ;;  %vm9568_vm8 = vmmov %vm9566_vm4  ;;  %v3169_v63 = vsel %vm9570_vm5, %v2407_v20, %v2406_v49  ;;  %v1912_v2 = vpop.f32.mrf.mxu0  ;;  %v9579_v49 = vld [vmem:[#allocation20_spill] sm:$0xff] }
 0x3b7   : > { %v3426_v27 = vsel %vm3392_vm6, %v7340_v59, %v7342_v19  ;;  %v3460_v55 = vsel %vm3392_vm6, %v7344_v58, %v7349_v38  ;;  %v3494_v32 = vsel %vm3392_vm6, %v7351_v6, %v7353_v30  ;;  %v3528_v45 = vsel %vm3392_vm6, %v7355_v29, %v7357_v57  ;;  %4486 = vmatmul.msk.f32.gmra.mxu3 %vm406_vm0, %v4698_v17  ;;  %v2025_v8 = vpop.f32.mrf.mxu1 }
 0x3b8   : > { %v3360_v46 = vmin.f32 %v9564_v47, %v3328_v50  ;;  %v3562_v28 = vsel %vm3392_vm6, %v7359_v13, %v7366_v54  ;;  %v3596_v5 = vsel %vm3392_vm6, %v7368_v24, %v7372_v41  ;;  %v3630_v0 = vsel %vm3392_vm6, %v7374_v26, %v7376_v61  ;;  %4582 = vmatmul.msk.f32.gmra.mxu2 %vm406_vm0, %v4698_v17 }
 0x3b9   : > { %v3664_v18 = vsel %vm3392_vm6, %v7381_v43, %v7383_v48  ;;  %v3696_v36 = vsel %vm9565_vm7, %v3460_v55, %v3426_v27  ;;  %v3728_v22 = vsel %vm9566_vm4, %v3528_v45, %v3494_v32  ;;  %v3760_v37 = vsel %vm9567_vm12, %v3596_v5, %v3562_v28  ;;  %vm9571_vm6 = vmmov %vm9570_vm5  ;;  %v1799_v16 = vpop.f32.mrf.mxu3  ;;  %4518 = vmatmul.msk.f32.gmra.mxu0 %vm406_vm0, %v4698_v17 }
 0x3ba   : > { %v3792_v56 = vsel %vm9568_vm8, %v3664_v18, %v3630_v0  ;;  %v3824_v7 = vsel %vm9560_vm10, %v3728_v22, %v3696_v36  ;;  %v3201_v14 = vsel %vm9571_vm6, %v2409_v31, %v2408_v21  ;;  %vm9572_vm7 = vmmov %vm9560_vm10  ;;  %vm9574_vm4 = vcmp.gt.f32.partialorder %v9573_v52, 0.0  ;;  %v2138_v20 = vpop.f32.mrf.mxu2  ;;  %4550 = vmatmul.msk.f32.gmra.mxu1 %vm406_vm0, %v4698_v17  ;;  %v9588_v17 = vld [vmem:[#allocation18_spill] sm:$0xff] }
 0x3bb   : > { %v3856_v33 = vsel %vm9572_vm7, %v3792_v56, %v3760_v37  ;;  %v3265_v42 = vsel %vm9574_vm4, %v3201_v14, %v3169_v63  ;;  %vm9575_vm12 = vcmp.gt.f32.partialorder %v9562_v23, 0.0  ;;  %vm9578_vm8 = vcmp.gt.f32.partialorder %v9577_v11, 0.0  ;;  %vm9580_vm6 = vmmov %vm9570_vm5  ;;  %v4699_v37 = vld [vmem:[%s4821_s15 + $0xe8] sm:$0xff] }
 0x3bc   : > { %v3888_v34 = vsel %vm9575_vm12, %v3856_v33, %v3824_v7  ;;  %v3297_v15 = vsel %vm9578_vm8, %v3265_v42, %v9576_v35  ;;  %v2422_v44 = vsub.f32 %v1912_v2, %v7317_v53  ;;  %v2423_v12 = vsub.f32 %v2025_v8, %v7323_v51  ;;  %vm9581_vm7 = vmmov %vm9570_vm5  ;;  %v9591_v42 = vld [vmem:[#allocation15_spill] sm:$0xff] }
 0x3bd   : > { %v3920_v1 = vmul.f32 %v3888_v34, %v3360_v46  ;;  %v3329_v25 = vand.u32 2147483647, %v3297_v15  ;;  %vm3393_vm10 = vcmp.gt.f32.partialorder %v3297_v15, 0.0  ;;  %vm9582_vm4 = vmmov %vm9570_vm5  ;;  %vm9583_vm12 = vcmp.gt.f32.partialorder %v9573_v52, 0.0  ;;  %v9590_v52 = vld [vmem:[#allocation21_spill] sm:$0xff] }
 0x3be   : > { %v3427_v23 = vsel %vm3393_vm10, %v7340_v59, %v7342_v19  ;;  %v3461_v21 = vsel %vm3393_vm10, %v7344_v58, %v7349_v38  ;;  %v3495_v9 = vsel %vm3393_vm10, %v7351_v6, %v7353_v30  ;;  %v3529_v50 = vsel %vm3393_vm10, %v7355_v29, %v7357_v57  ;;  %vm9584_vm8 = vmmov %vm9583_vm12  ;;  %v1915_v56 = vpop.f32.mrf.mxu0 }
 0x3bf   : > { %3952 = vst [vmem:[%s7428_s28 + $0x50] sm:$0xff] %v3920_v1  ;;  %v3361_v31 = vmin.f32 %v9579_v49, %v3329_v25  ;;  %v3563_v27 = vsel %vm3393_vm10, %v7359_v13, %v7366_v54  ;;  %v3597_v55 = vsel %vm3393_vm10, %v7368_v24, %v7372_v41  ;;  %v3631_v32 = vsel %vm3393_vm10, %v7374_v26, %v7376_v61  ;;  %v2028_v33 = vpop.f32.mrf.mxu1 }
 0x3c0   : > { %v3665_v45 = vsel %vm3393_vm10, %v7381_v43, %v7383_v48  ;;  %v3697_v47 = vsel %vm9570_vm5, %v3461_v21, %v3427_v23  ;;  %v3729_v46 = vsel %vm9580_vm6, %v3529_v50, %v3495_v9  ;;  %v3761_v28 = vsel %vm9581_vm7, %v3597_v55, %v3563_v27  ;;  %4487 = vmatmul.msk.f32.gmra.mxu3 %vm406_vm0, %v4699_v37  ;;  %v9593_v21 = vld [vmem:[#allocation75_spill] sm:$0xff] }
 0x3c1   : > { %v3793_v5 = vsel %vm9582_vm4, %v3665_v45, %v3631_v32  ;;  %v3825_v0 = vsel %vm9583_vm12, %v3729_v46, %v3697_v47  ;;  %v2421_v18 = vsub.f32 %v1799_v16, %v7328_v60  ;;  %v2424_v36 = vsub.f32 %v2138_v20, %v7333_v3  ;;  %4583 = vmatmul.msk.f32.gmra.mxu2 %vm406_vm0, %v4699_v37  ;;  %v1802_v35 = vpop.f32.mrf.mxu3 }
 0x3c2   : > { %v3857_v22 = vsel %vm9584_vm8, %v3793_v5, %v3761_v28  ;;  %vm9585_vm10 = vcmp.gt.f32.partialorder %v9577_v11, 0.0  ;;  %vm9586_vm5 = vcmp.gt.f32.partialorder %v9395_v10, 0.0  ;;  %vm9589_vm7 = vcmp.gt.f32.partialorder %v9588_v17, 0.0  ;;  %4519 = vmatmul.msk.f32.gmra.mxu0 %vm406_vm0, %v4699_v37  ;;  %4551 = vmatmul.msk.f32.gmra.mxu1 %vm406_vm0, %v4699_v37  ;;  %v9597_v28 = vld [vmem:[#allocation24_spill] sm:$0xff]  ;;  %v9601_v37 = vld [vmem:[#allocation22_spill] sm:$0xff] }
 0x3c3   : > { %v3889_v7 = vsel %vm9585_vm10, %v3857_v22, %v3825_v0  ;;  %v3170_v39 = vsel %vm9586_vm5, %v2422_v44, %v2421_v18  ;;  %vm9587_vm6 = vmmov %vm9586_vm5  ;;  %vm9592_vm4 = vcmp.gt.f32.partialorder %v9591_v42, 0.0  ;;  %v2437_v11 = vsub.f32 %v1915_v56, %v7317_v53  ;;  %v2141_v44 = vpop.f32.mrf.mxu2  ;;  %v4700_v18 = vld [vmem:[%s4821_s15 + $0xf0] sm:$0xff] }
 0x3c4   : > { %v3202_v63 = vsel %vm9587_vm6, %v2424_v36, %v2423_v12  ;;  %v3921_v14 = vmul.f32 %v3889_v7, %v3361_v31  ;;  %v2438_v15 = vsub.f32 %v2028_v33, %v7323_v51  ;;  %v2436_v1 = vsub.f32 %v1802_v35, %v7328_v60  ;;  %vm9594_vm8 = vmmov %vm9586_vm5  ;;  %v9604_v7 = vld [vmem:[#allocation122_spill] sm:$0xff] }
 0x3c5   : > { %v3266_v2 = vsel %vm9589_vm7, %v3202_v63, %v3170_v39  ;;  %v2439_v25 = vsub.f32 %v2141_v44, %v7333_v3  ;;  %vm9595_vm10 = vmmov %vm9586_vm5  ;;  %v9605_v39 = vld [vmem:[#allocation19_spill] sm:$0xff] }
 0x3c6   : > { %v3298_v34 = vsel %vm9592_vm4, %v3266_v2, %v9590_v52  ;;  %3953 = vst [vmem:[%s7428_s28 + $0x58] sm:$0xff] %v3921_v14  ;;  %vm9596_vm6 = vmmov %vm9586_vm5  ;;  %vm9598_vm4 = vcmp.gt.f32.partialorder %v9597_v28, 0.0  ;;  %v1918_v36 = vpop.f32.mrf.mxu0 }
 0x3c7   : > { %v3330_v8 = vand.u32 2147483647, %v3298_v34  ;;  %vm3394_vm12 = vcmp.gt.f32.partialorder %v3298_v34, 0.0  ;;  %v3171_v5 = vsel %vm9598_vm4, %v2437_v11, %v2436_v1  ;;  %v2452_v14 = vsub.f32 %v1918_v36, %v7317_v53  ;;  %v2031_v2 = vpop.f32.mrf.mxu1  ;;  %v9617_v36 = vld [vmem:[#allocation27_spill] sm:$0xff] }
 0x3c8   : > { %v3428_v16 = vsel %vm3394_vm12, %v7340_v59, %v7342_v19  ;;  %v3462_v12 = vsel %vm3394_vm12, %v7344_v58, %v7349_v38  ;;  %v3496_v20 = vsel %vm3394_vm12, %v7351_v6, %v7353_v30  ;;  %v3530_v23 = vsel %vm3394_vm12, %v7355_v29, %v7357_v57  ;;  %4488 = vmatmul.msk.f32.gmra.mxu3 %vm406_vm0, %v4700_v18 }
 0x3c9   : > { %v3362_v9 = vmin.f32 %v9593_v21, %v3330_v8  ;;  %v3564_v50 = vsel %vm3394_vm12, %v7359_v13, %v7366_v54  ;;  %v3598_v49 = vsel %vm3394_vm12, %v7368_v24, %v7372_v41  ;;  %v3632_v31 = vsel %vm3394_vm12, %v7374_v26, %v7376_v61  ;;  %4584 = vmatmul.msk.f32.gmra.mxu2 %vm406_vm0, %v4700_v18  ;;  %v1805_v17 = vpop.f32.mrf.mxu3  ;;  %v9607_v8 = vld [vmem:[#allocation76_spill] sm:$0xff] }
 0x3ca   : > { %v3666_v27 = vsel %vm3394_vm12, %v7381_v43, %v7383_v48  ;;  %v3698_v55 = vsel %vm9594_vm8, %v3462_v12, %v3428_v16  ;;  %v3730_v32 = vsel %vm9595_vm10, %v3530_v23, %v3496_v20  ;;  %v3762_v45 = vsel %vm9586_vm5, %v3598_v49, %v3564_v50  ;;  %vm9599_vm12 = vmmov %vm9598_vm4  ;;  %4520 = vmatmul.msk.f32.gmra.mxu0 %vm406_vm0, %v4700_v18 }
 0x3cb   : > { %v3794_v47 = vsel %vm9596_vm6, %v3666_v27, %v3632_v31  ;;  %v3826_v46 = vsel %vm9589_vm7, %v3730_v32, %v3698_v55  ;;  %v3203_v0 = vsel %vm9599_vm12, %v2439_v25, %v2438_v15  ;;  %vm9600_vm8 = vmmov %vm9589_vm7  ;;  %vm9602_vm10 = vcmp.gt.f32.partialorder %v9601_v37, 0.0  ;;  %v2144_v35 = vpop.f32.mrf.mxu2  ;;  %4552 = vmatmul.msk.f32.gmra.mxu1 %vm406_vm0, %v4700_v18  ;;  %v4701_v32 = vld [vmem:[%s4821_s15 + $0xf8] sm:$0xff] }
 0x3cc   : > { %v3858_v22 = vsel %vm9600_vm8, %v3794_v47, %v3762_v45  ;;  %v3267_v10 = vsel %vm9602_vm10, %v3203_v0, %v3171_v5  ;;  %vm9603_vm5 = vcmp.gt.f32.partialorder %v9591_v42, 0.0  ;;  %vm9606_vm6 = vcmp.gt.f32.partialorder %v9605_v39, 0.0  ;;  %vm9608_vm12 = vmmov %vm9598_vm4 }
 0x3cd   : > { %v3890_v56 = vsel %vm9603_vm5, %v3858_v22, %v3826_v46  ;;  %v3299_v63 = vsel %vm9606_vm6, %v3267_v10, %v9604_v7  ;;  %v2453_v34 = vsub.f32 %v2031_v2, %v7323_v51  ;;  %vm9609_vm8 = vmmov %vm9598_vm4  ;;  %vm9611_vm5 = vcmp.gt.f32.partialorder %v9601_v37, 0.0  ;;  %v9618_v22 = vld [vmem:[#allocation23_spill] sm:$0xff] }
 0x3ce   : > { %v3922_v33 = vmul.f32 %v3890_v56, %v3362_v9  ;;  %v3331_v52 = vand.u32 2147483647, %v3299_v63  ;;  %vm3395_vm7 = vcmp.gt.f32.partialorder %v3299_v63, 0.0  ;;  %vm9610_vm10 = vmmov %vm9598_vm4  ;;  %v2451_v31 = vsub.f32 %v1805_v17, %v7328_v60  ;;  %v1921_v45 = vpop.f32.mrf.mxu0 }
 0x3cf   : > { %v3429_v42 = vsel %vm3395_vm7, %v7340_v59, %v7342_v19  ;;  %v3463_v11 = vsel %vm3395_vm7, %v7344_v58, %v7349_v38  ;;  %v3497_v15 = vsel %vm3395_vm7, %v7351_v6, %v7353_v30  ;;  %v3531_v44 = vsel %vm3395_vm7, %v7355_v29, %v7357_v57  ;;  %vm9612_vm6 = vmmov %vm9611_vm5  ;;  %v2034_v18 = vpop.f32.mrf.mxu1 }
 0x3d0   : > { %3954 = vst [vmem:[%s7428_s28 + $0x60] sm:$0xff] %v3922_v33  ;;  %v3363_v1 = vmin.f32 %v9607_v8, %v3331_v52  ;;  %v3565_v25 = vsel %vm3395_vm7, %v7359_v13, %v7366_v54  ;;  %v3599_v16 = vsel %vm3395_vm7, %v7368_v24, %v7372_v41  ;;  %v3633_v12 = vsel %vm3395_vm7, %v7374_v26, %v7376_v61 }
 0x3d1   : > { %v3667_v20 = vsel %vm3395_vm7, %v7381_v43, %v7383_v48  ;;  %v3699_v23 = vsel %vm9598_vm4, %v3463_v11, %v3429_v42  ;;  %v3731_v21 = vsel %vm9608_vm12, %v3531_v44, %v3497_v15  ;;  %v3763_v9 = vsel %vm9609_vm8, %v3599_v16, %v3565_v25  ;;  %4489 = vmatmul.msk.f32.gmra.mxu3 %vm406_vm0, %v4701_v32  ;;  %v1808_v10 = vpop.f32.mrf.mxu3 }
 0x3d2   : > { %v3795_v50 = vsel %vm9610_vm10, %v3667_v20, %v3633_v12  ;;  %v3827_v49 = vsel %vm9611_vm5, %v3731_v21, %v3699_v23  ;;  %v2454_v27 = vsub.f32 %v2144_v35, %v7333_v3  ;;  %vm9613_vm7 = vcmp.gt.f32.partialorder %v9605_v39, 0.0  ;;  %4585 = vmatmul.msk.f32.gmra.mxu2 %vm406_vm0, %v4701_v32  ;;  %4521 = vmatmul.msk.f32.gmra.mxu0 %vm406_vm0, %v4701_v32  ;;  %v9620_v35 = vld [vmem:[#allocation77_spill] sm:$0xff] }
 0x3d3   : > { %v3859_v55 = vsel %vm9612_vm6, %v3795_v50, %v3763_v9  ;;  %vm9614_vm4 = vcmp.gt.f32.partialorder %v9402_v4, 0.0  ;;  %vm9616_vm8 = vcmp.gt.f32.partialorder %v9403_v62, 0.0  ;;  %vm9619_vm10 = vcmp.gt.f32.partialorder %v9618_v22, 0.0  ;;  %v2147_v39 = vpop.f32.mrf.mxu2  ;;  %4553 = vmatmul.msk.f32.gmra.mxu1 %vm406_vm0, %v4701_v32 }
 0x3d4   : > { %v3891_v47 = vsel %vm9613_vm7, %v3859_v55, %v3827_v49  ;;  %v3172_v46 = vsel %vm9614_vm4, %v2452_v14, %v2451_v31  ;;  %vm9615_vm12 = vmmov %vm9614_vm4  ;;  %v2467_v56 = vsub.f32 %v1921_v45, %v7317_v53  ;;  %v2468_v7 = vsub.f32 %v2034_v18, %v7323_v51  ;;  %v9627_v49 = vld [vmem:[#allocation28_spill] sm:$0xff]  ;;  %v9631_v55 = vld [vmem:[#allocation26_spill] sm:$0xff] }
 0x3d5   : > { %v3204_v28 = vsel %vm9615_vm12, %v2454_v27, %v2453_v34  ;;  %v3923_v5 = vmul.f32 %v3891_v47, %v3363_v1  ;;  %v2466_v14 = vsub.f32 %v1808_v10, %v7328_v60  ;;  %v2469_v2 = vsub.f32 %v2147_v39, %v7333_v3  ;;  %vm9621_vm6 = vmmov %vm9614_vm4  ;;  %v9630_v27 = vld [vmem:[#allocation25_spill] sm:$0xff]  ;;  %v9633_v10 = vld [vmem:[#allocation78_spill] sm:$0xff] }
 0x3d6   : > { %v3268_v0 = vsel %vm9616_vm8, %v3204_v28, %v3172_v46  ;;  %vm9622_vm7 = vmmov %vm9614_vm4  ;;  %vm9624_vm0 = vcmp.gt.f32.partialorder %v6241_v40, 0.0  ;;  %v1924_v9 = vpop.f32.mrf.mxu0 }
 0x3d7   : > { %v3300_v37 = vsel %vm9619_vm10, %v3268_v0, %v9617_v36  ;;  %3955 = vst [vmem:[%s7428_s28 + $0x68] sm:$0xff] %v3923_v5  ;;  %vm9623_vm12 = vmmov %vm9614_vm4  ;;  %v3173_v23 = vsel %vm9624_vm0, %v2467_v56, %v2466_v14  ;;  %v2482_v45 = vsub.f32 %v1924_v9, %v7317_v53  ;;  %v2037_v47 = vpop.f32.mrf.mxu1 }
 0x3d8   : > { %v3332_v63 = vand.u32 2147483647, %v3300_v37  ;;  %vm3396_vm5 = vcmp.gt.f32.partialorder %v3300_v37, 0.0  ;;  %vm9625_vm10 = vmmov %vm9624_vm0  ;;  %v2483_v62 = vsub.f32 %v2037_v47, %v7323_v51 }
 0x3d9   : > { %v3430_v33 = vsel %vm3396_vm5, %v7340_v59, %v7342_v19  ;;  %v3464_v52 = vsel %vm3396_vm5, %v7344_v58, %v7349_v38  ;;  %v3498_v17 = vsel %vm3396_vm5, %v7351_v6, %v7353_v30  ;;  %v3532_v34 = vsel %vm3396_vm5, %v7355_v29, %v7357_v57  ;;  %v1811_v5 = vpop.f32.mrf.mxu3 }
 0x3da   : > { %v3364_v42 = vmin.f32 %v9620_v35, %v3332_v63  ;;  %v3566_v11 = vsel %vm3396_vm5, %v7359_v13, %v7366_v54  ;;  %v3600_v15 = vsel %vm3396_vm5, %v7368_v24, %v7372_v41  ;;  %v3634_v44 = vsel %vm3396_vm5, %v7374_v26, %v7376_v61 }
 0x3db   : > { %v3668_v8 = vsel %vm3396_vm5, %v7381_v43, %v7383_v48  ;;  %v3700_v1 = vsel %vm9621_vm6, %v3464_v52, %v3430_v33  ;;  %v3732_v25 = vsel %vm9622_vm7, %v3532_v34, %v3498_v17  ;;  %v3764_v16 = vsel %vm9614_vm4, %v3600_v15, %v3566_v11  ;;  %vm9626_vm5 = vmmov %vm9616_vm8  ;;  %v2150_v0 = vpop.f32.mrf.mxu2 }
 0x3dc   : > { %v3796_v12 = vsel %vm9623_vm12, %v3668_v8, %v3634_v44  ;;  %v3828_v20 = vsel %vm9616_vm8, %v3732_v25, %v3700_v1  ;;  %v3205_v21 = vsel %vm9625_vm10, %v2469_v2, %v2468_v7  ;;  %vm9628_vm6 = vcmp.gt.f32.partialorder %v9627_v49, 0.0  ;;  %vm9634_vm8 = vmmov %vm9624_vm0  ;;  %v9638_v8 = vld [vmem:[#allocation79_spill] sm:$0xff] }
 0x3dd   : > { %v3860_v50 = vsel %vm9626_vm5, %v3796_v12, %v3764_v16  ;;  %v3269_v31 = vsel %vm9628_vm6, %v3205_v21, %v3173_v23  ;;  %vm9629_vm7 = vcmp.gt.f32.partialorder %v9618_v22, 0.0  ;;  %vm9632_vm4 = vcmp.gt.f32.partialorder %v9631_v55, 0.0  ;;  %vm9635_vm10 = vmmov %vm9624_vm0  ;;  %v9641_v16 = vld [vmem:[#allocation31_spill] sm:$0xff]  ;;  %v9644_v21 = vld [vmem:[#allocation29_spill] sm:$0xff] }
 0x3de   : > { %v3892_v4 = vsel %vm9629_vm7, %v3860_v50, %v3828_v20  ;;  %v3301_v32 = vsel %vm9632_vm4, %v3269_v31, %v9630_v27  ;;  %vm9636_vm5 = vmmov %vm9624_vm0  ;;  %v2481_v35 = vsub.f32 %v1811_v5, %v7328_v60  ;;  %v1927_v15 = vpop.f32.mrf.mxu0  ;;  %v9643_v23 = vld [vmem:[#allocation123_spill] sm:$0xff]  ;;  %v9646_v5 = vld [vmem:[#allocation82_spill] sm:$0xff] }
 0x3df   : > { %v3924_v46 = vmul.f32 %v3892_v4, %v3364_v42  ;;  %v3333_v28 = vand.u32 2147483647, %v3301_v32  ;;  %vm3397_vm12 = vcmp.gt.f32.partialorder %v3301_v32, 0.0  ;;  %v2484_v42 = vsub.f32 %v2150_v0, %v7333_v3  ;;  %vm9637_vm7 = vmmov %vm9628_vm6  ;;  %v2040_v20 = vpop.f32.mrf.mxu1 }
 0x3e0   : > { %v3431_v18 = vsel %vm3397_vm12, %v7340_v59, %v7342_v19  ;;  %v3465_v36 = vsel %vm3397_vm12, %v7344_v58, %v7349_v38  ;;  %v3499_v22 = vsel %vm3397_vm12, %v7351_v6, %v7353_v30  ;;  %v3533_v37 = vsel %vm3397_vm12, %v7355_v29, %v7357_v57 }
 0x3e1   : > { %3956 = vst [vmem:[%s7428_s28 + $0x70] sm:$0xff] %v3924_v46  ;;  %v3365_v56 = vmin.f32 %v9633_v10, %v3333_v28  ;;  %v3567_v7 = vsel %vm3397_vm12, %v7359_v13, %v7366_v54  ;;  %v3601_v39 = vsel %vm3397_vm12, %v7368_v24, %v7372_v41  ;;  %v3635_v63 = vsel %vm3397_vm12, %v7374_v26, %v7376_v61  ;;  %v1814_v50 = vpop.f32.mrf.mxu3 }
 0x3e2   : > { %v3669_v14 = vsel %vm3397_vm12, %v7381_v43, %v7383_v48  ;;  %v3701_v2 = vsel %vm9634_vm8, %v3465_v36, %v3431_v18  ;;  %v3733_v33 = vsel %vm9624_vm0, %v3533_v37, %v3499_v22  ;;  %v3765_v52 = vsel %vm9635_vm10, %v3601_v39, %v3567_v7 }
 0x3e3   : > { %v3797_v17 = vsel %vm9636_vm5, %v3669_v14, %v3635_v63  ;;  %v3829_v34 = vsel %vm9628_vm6, %v3733_v33, %v3701_v2  ;;  %vm9639_vm12 = vcmp.gt.f32.partialorder %v9638_v8, 0.0  ;;  %vm9642_vm0 = vcmp.gt.f32.partialorder %v9641_v16, 0.0  ;;  %v2153_v4 = vpop.f32.mrf.mxu2  ;;  %v9652_v63 = vld [vmem:[#allocation83_spill] sm:$0xff] }
 0x3e4   : > { %v3861_v11 = vsel %vm9637_vm7, %v3797_v17, %v3765_v52  ;;  %v3174_v1 = vsel %vm9639_vm12, %v2482_v45, %v2481_v35  ;;  %vm9640_vm8 = vmmov %vm9639_vm12  ;;  %vm9645_vm10 = vcmp.gt.f32.partialorder %v9644_v21, 0.0  ;;  %v2497_v49 = vsub.f32 %v1927_v15, %v7317_v53  ;;  %v9656_v17 = vld [vmem:[#allocation80_spill] sm:$0xff] }
 0x3e5   : > { %v3893_v44 = vsel %vm9632_vm4, %v3861_v11, %v3829_v34  ;;  %v3206_v40 = vsel %vm9640_vm8, %v2484_v42, %v2483_v62  ;;  %v2498_v31 = vsub.f32 %v2040_v20, %v7323_v51  ;;  %v2496_v55 = vsub.f32 %v1814_v50, %v7328_v60  ;;  %vm9647_vm6 = vmmov %vm9640_vm8  ;;  %v9659_v42 = vld [vmem:[#allocation124_spill] sm:$0xff]  ;;  %v9662_v50 = vld [vmem:[#allocation86_spill] sm:$0xff] }
 0x3e6   : > { %v3925_v25 = vmul.f32 %v3893_v44, %v3365_v56  ;;  %v3270_v12 = vsel %vm9642_vm0, %v3206_v40, %v3174_v1  ;;  %v2499_v32 = vsub.f32 %v2153_v4, %v7333_v3  ;;  %vm9648_vm7 = vmmov %vm9647_vm6  ;;  %v1930_v33 = vpop.f32.mrf.mxu0  ;;  %v9660_v11 = vld [vmem:[#allocation32_spill] sm:$0xff] }
 0x3e7   : > { %v3302_v9 = vsel %vm9645_vm10, %v3270_v12, %v9643_v23  ;;  %vm9649_vm4 = vmmov %vm9647_vm6  ;;  %v2512_v44 = vsub.f32 %v1930_v33, %v7317_v53  ;;  %v2043_v8 = vpop.f32.mrf.mxu1 }
 0x3e8   : > { %3957 = vst [vmem:[%s7428_s28 + $0x78] sm:$0xff] %v3925_v25  ;;  %v3334_v27 = vand.u32 2147483647, %v3302_v9  ;;  %vm3398_vm5 = vcmp.gt.f32.partialorder %v3302_v9, 0.0  ;;  %vm9650_vm12 = vmmov %vm9649_vm4  ;;  %v2513_v16 = vsub.f32 %v2043_v8, %v7323_v51 }
 0x3e9   : > { %v3432_v45 = vsel %vm3398_vm5, %v7340_v59, %v7342_v19  ;;  %v3466_v47 = vsel %vm3398_vm5, %v7344_v58, %v7349_v38  ;;  %v3500_v46 = vsel %vm3398_vm5, %v7351_v6, %v7353_v30  ;;  %v3534_v28 = vsel %vm3398_vm5, %v7355_v29, %v7357_v57  ;;  %vm9651_vm8 = vmmov %vm9642_vm0  ;;  %v1817_v25 = vpop.f32.mrf.mxu3 }
 0x3ea   : > { %v3366_v62 = vmin.f32 %v9646_v5, %v3334_v27  ;;  %v3568_v0 = vsel %vm3398_vm5, %v7359_v13, %v7366_v54  ;;  %v3602_v18 = vsel %vm3398_vm5, %v7368_v24, %v7372_v41  ;;  %v3636_v36 = vsel %vm3398_vm5, %v7374_v26, %v7376_v61 }
 0x3eb   : > { %v3670_v22 = vsel %vm3398_vm5, %v7381_v43, %v7383_v48  ;;  %v3702_v37 = vsel %vm9647_vm6, %v3466_v47, %v3432_v45  ;;  %v3734_v10 = vsel %vm9648_vm7, %v3534_v28, %v3500_v46  ;;  %v3766_v56 = vsel %vm9649_vm4, %v3602_v18, %v3568_v0  ;;  %vm9655_vm5 = vmmov %vm9651_vm8  ;;  %v2156_v12 = vpop.f32.mrf.mxu2 }
 0x3ec   : > { %v3798_v7 = vsel %vm9650_vm12, %v3670_v22, %v3636_v36  ;;  %v3830_v39 = vsel %vm9651_vm8, %v3734_v10, %v3702_v37  ;;  %vm9653_vm0 = vcmp.gt.f32.partialorder %v9652_v63, 0.0  ;;  %vm9657_vm6 = vcmp.gt.f32.partialorder %v9656_v17, 0.0  ;;  %v9667_v22 = vld [vmem:[#allocation87_spill] sm:$0xff] }
 0x3ed   : > { %v3175_v14 = vsel %vm9653_vm0, %v2497_v49, %v2496_v55  ;;  %vm9654_vm10 = vmmov %vm9653_vm0  ;;  %v3862_v52 = vsel %vm9655_vm5, %v3798_v7, %v3766_v56  ;;  %vm9658_vm7 = vcmp.gt.f32.partialorder %v9644_v21, 0.0  ;;  %vm9661_vm4 = vcmp.gt.f32.partialorder %v9660_v11, 0.0  ;;  %v9670_v7 = vld [vmem:[#allocation84_spill] sm:$0xff] }
 0x3ee   : > { %v3207_v2 = vsel %vm9654_vm10, %v2499_v32, %v2498_v31  ;;  %v3894_v35 = vsel %vm9658_vm7, %v3862_v52, %v3830_v39  ;;  %vm9663_vm8 = vmmov %vm9653_vm0  ;;  %v2511_v5 = vsub.f32 %v1817_v25, %v7328_v60  ;;  %v1933_v18 = vpop.f32.mrf.mxu0  ;;  %v9675_v25 = vld [vmem:[#allocation89_spill] sm:$0xff] }
 0x3ef   : > { %v3271_v34 = vsel %vm9657_vm6, %v3207_v2, %v3175_v14  ;;  %v3926_v1 = vmul.f32 %v3894_v35, %v3366_v62  ;;  %vm9664_vm10 = vmmov %vm9653_vm0  ;;  %v2514_v62 = vsub.f32 %v2156_v12, %v7333_v3  ;;  %v2046_v63 = vpop.f32.mrf.mxu1  ;;  %v9672_v14 = vld [vmem:[#allocation125_spill] sm:$0xff]  ;;  %v2527_v17 = vsub.f32 %v1933_v18, %v7317_v53 }
 0x3f0   : > { %v3303_v15 = vsel %vm9661_vm4, %v3271_v34, %v9659_v42  ;;  %vm9665_vm5 = vmmov %vm9653_vm0  ;;  %v9673_v2 = vld [vmem:[#allocation81_spill] sm:$0xff]  ;;  %v2528_v34 = vsub.f32 %v2046_v63, %v7323_v51 }
 0x3f1   : > { %v3335_v40 = vand.u32 2147483647, %v3303_v15  ;;  %vm3399_vm12 = vcmp.gt.f32.partialorder %v3303_v15, 0.0  ;;  %3958 = vst [vmem:[%s7428_s28 + $0x80] sm:$0xff] %v3926_v1  ;;  %vm9666_vm7 = vmmov %vm9657_vm6  ;;  %v1820_v52 = vpop.f32.mrf.mxu3 }
 0x3f2   : > { %v3433_v20 = vsel %vm3399_vm12, %v7340_v59, %v7342_v19  ;;  %v3467_v23 = vsel %vm3399_vm12, %v7344_v58, %v7349_v38  ;;  %v3501_v21 = vsel %vm3399_vm12, %v7351_v6, %v7353_v30  ;;  %v3535_v9 = vsel %vm3399_vm12, %v7355_v29, %v7357_v57 }
 0x3f3   : > { %v3367_v49 = vmin.f32 %v9662_v50, %v3335_v40  ;;  %v3569_v31 = vsel %vm3399_vm12, %v7359_v13, %v7366_v54  ;;  %v3603_v4 = vsel %vm3399_vm12, %v7368_v24, %v7372_v41  ;;  %v3637_v27 = vsel %vm3399_vm12, %v7374_v26, %v7376_v61  ;;  %v2159_v35 = vpop.f32.mrf.mxu2 }
 0x3f4   : > { %v3671_v55 = vsel %vm3399_vm12, %v7381_v43, %v7383_v48  ;;  %v3703_v32 = vsel %vm9663_vm8, %v3467_v23, %v3433_v20  ;;  %v3735_v45 = vsel %vm9653_vm0, %v3535_v9, %v3501_v21  ;;  %v3767_v47 = vsel %vm9664_vm10, %v3603_v4, %v3569_v31 }
 0x3f5   : > { %v3799_v46 = vsel %vm9665_vm5, %v3671_v55, %v3637_v27  ;;  %v3831_v28 = vsel %vm9657_vm6, %v3735_v45, %v3703_v32  ;;  %vm9668_vm12 = vcmp.gt.f32.partialorder %v9667_v22, 0.0  ;;  %vm9671_vm0 = vcmp.gt.f32.partialorder %v9670_v7, 0.0  ;;  %v9681_v27 = vld [vmem:[#allocation90_spill] sm:$0xff] }
 0x3f6   : > { %v3863_v0 = vsel %vm9666_vm7, %v3799_v46, %v3767_v47  ;;  %v3176_v37 = vsel %vm9668_vm12, %v2512_v44, %v2511_v5  ;;  %vm9669_vm8 = vmmov %vm9668_vm12  ;;  %vm9674_vm10 = vcmp.gt.f32.partialorder %v9673_v2, 0.0  ;;  %v2526_v11 = vsub.f32 %v1820_v52, %v7328_v60  ;;  %v1936_v45 = vpop.f32.mrf.mxu0  ;;  %v9685_v46 = vld [vmem:[#allocation88_spill] sm:$0xff] }
 0x3f7   : > { %v3895_v36 = vsel %vm9661_vm4, %v3863_v0, %v3831_v28  ;;  %v3208_v10 = vsel %vm9669_vm8, %v2514_v62, %v2513_v16  ;;  %v2529_v15 = vsub.f32 %v2159_v35, %v7333_v3  ;;  %vm9676_vm6 = vmmov %vm9669_vm8  ;;  %v9688_v62 = vld [vmem:[#allocation126_spill] sm:$0xff]  ;;  %v9689_v0 = vld [vmem:[#allocation85_spill] sm:$0xff] }
 0x3f8   : > { %v3927_v56 = vmul.f32 %v3895_v36, %v3367_v49  ;;  %v3272_v39 = vsel %vm9671_vm0, %v3208_v10, %v3176_v37  ;;  %vm9677_vm7 = vmmov %vm9676_vm6  ;;  %v2542_v10 = vsub.f32 %v1936_v45, %v7317_v53  ;;  %v9702_v45 = vld [vmem:[#allocation43_spill] sm:$0xff] }
 0x3f9   : > { %v3304_v33 = vsel %vm9674_vm10, %v3272_v39, %v9672_v14  ;;  %vm9678_vm4 = vmmov %vm9676_vm6  ;;  %v1823_v37 = vpop.f32.mrf.mxu3 }
 0x3fa   : > { %3959 = vst [vmem:[%s7428_s28 + $0x88] sm:$0xff] %v3927_v56  ;;  %v3336_v42 = vand.u32 2147483647, %v3304_v33  ;;  %vm3400_vm5 = vcmp.gt.f32.partialorder %v3304_v33, 0.0  ;;  %vm9679_vm12 = vmmov %vm9678_vm4  ;;  %v2049_v56 = vpop.f32.mrf.mxu1  ;;  %v9691_v33 = vld [vmem:[#allocation93_spill] sm:$0xff] }
 0x3fb   : > { %v3434_v44 = vsel %vm3400_vm5, %v7340_v59, %v7342_v19  ;;  %v3468_v8 = vsel %vm3400_vm5, %v7344_v58, %v7349_v38  ;;  %v3502_v1 = vsel %vm3400_vm5, %v7351_v6, %v7353_v30  ;;  %v3536_v40 = vsel %vm3400_vm5, %v7355_v29, %v7357_v57  ;;  %vm9680_vm8 = vmmov %vm9671_vm0 }
 0x3fc   : > { %v3368_v16 = vmin.f32 %v9675_v25, %v3336_v42  ;;  %v3570_v12 = vsel %vm3400_vm5, %v7359_v13, %v7366_v54  ;;  %v3604_v20 = vsel %vm3400_vm5, %v7368_v24, %v7372_v41  ;;  %v3638_v23 = vsel %vm3400_vm5, %v7374_v26, %v7376_v61 }
 0x3fd   : > { %v3672_v21 = vsel %vm3400_vm5, %v7381_v43, %v7383_v48  ;;  %v3704_v9 = vsel %vm9676_vm6, %v3468_v8, %v3434_v44  ;;  %v3736_v50 = vsel %vm9677_vm7, %v3536_v40, %v3502_v1  ;;  %v3768_v49 = vsel %vm9678_vm4, %v3604_v20, %v3570_v12  ;;  %vm9684_vm5 = vmmov %vm9680_vm8 }
 0x3fe   : > { %v3800_v31 = vsel %vm9679_vm12, %v3672_v21, %v3638_v23  ;;  %v3832_v4 = vsel %vm9680_vm8, %v3736_v50, %v3704_v9  ;;  %vm9682_vm0 = vcmp.gt.f32.partialorder %v9681_v27, 0.0  ;;  %vm9686_vm6 = vcmp.gt.f32.partialorder %v9685_v46, 0.0  ;;  %v1939_v20 = vpop.f32.mrf.mxu0  ;;  %v9696_v21 = vld [vmem:[#allocation49_spill] sm:$0xff] }
 0x3ff   : > { %v3177_v55 = vsel %vm9682_vm0, %v2527_v17, %v2526_v11  ;;  %vm9683_vm10 = vmmov %vm9682_vm0  ;;  %v3864_v47 = vsel %vm9684_vm5, %v3800_v31, %v3768_v49  ;;  %vm9687_vm7 = vcmp.gt.f32.partialorder %v9673_v2, 0.0  ;;  %vm9690_vm4 = vcmp.gt.f32.partialorder %v9689_v0, 0.0  ;;  %v2162_v2 = vpop.f32.mrf.mxu2  ;;  %v9699_v31 = vld [vmem:[#allocation91_spill] sm:$0xff] }
 0x400   : > { %v3209_v32 = vsel %vm9683_vm10, %v2529_v15, %v2528_v34  ;;  %v3896_v5 = vsel %vm9687_vm7, %v3864_v47, %v3832_v4  ;;  %vm9692_vm8 = vmmov %vm9682_vm0  ;;  %v2541_v40 = vsub.f32 %v1823_v37, %v7328_v60  ;;  %v2543_v25 = vsub.f32 %v2049_v56, %v7323_v51  ;;  %v9704_v56 = vld [vmem:[#allocation96_spill] sm:$0xff] }
 0x401   : > { %v3273_v28 = vsel %vm9686_vm6, %v3209_v32, %v3177_v55  ;;  %v3928_v36 = vmul.f32 %v3896_v5, %v3368_v16  ;;  %vm9693_vm10 = vmmov %vm9682_vm0  ;;  %v2544_v12 = vsub.f32 %v2162_v2, %v7333_v3  ;;  %v1826_v27 = vpop.f32.mrf.mxu3  ;;  %v9701_v32 = vld [vmem:[#allocation127_spill] sm:$0xff] }
 0x402   : > { %v3305_v18 = vsel %vm9690_vm4, %v3273_v28, %v9688_v62  ;;  %vm9694_vm5 = vmmov %vm9682_vm0  ;;  %v2052_v55 = vpop.f32.mrf.mxu1  ;;  %v2556_v46 = vsub.f32 %v1826_v27, %v7328_v60  ;;  %v2557_v28 = vsub.f32 %v1939_v20, %v7317_v53 }
 0x403   : > { %v3337_v22 = vand.u32 2147483647, %v3305_v18  ;;  %vm3401_vm12 = vcmp.gt.f32.partialorder %v3305_v18, 0.0  ;;  %3960 = vst [vmem:[%s7428_s28 + $0x90] sm:$0xff] %v3928_v36  ;;  %vm9695_vm7 = vmmov %vm9686_vm6  ;;  %v2558_v0 = vsub.f32 %v2052_v55, %v7323_v51 }
 0x404   : > { %v3435_v7 = vsel %vm3401_vm12, %v7340_v59, %v7342_v19  ;;  %v3469_v39 = vsel %vm3401_vm12, %v7344_v58, %v7349_v38  ;;  %v3503_v63 = vsel %vm3401_vm12, %v7351_v6, %v7353_v30  ;;  %v3537_v14 = vsel %vm3401_vm12, %v7355_v29, %v7357_v57 }
 0x405   : > { %v3369_v52 = vmin.f32 %v9691_v33, %v3337_v22  ;;  %v3571_v17 = vsel %vm3401_vm12, %v7359_v13, %v7366_v54  ;;  %v3605_v34 = vsel %vm3401_vm12, %v7368_v24, %v7372_v41  ;;  %v3639_v35 = vsel %vm3401_vm12, %v7374_v26, %v7376_v61 }
 0x406   : > { %v3673_v42 = vsel %vm3401_vm12, %v7381_v43, %v7383_v48  ;;  %v3705_v11 = vsel %vm9692_vm8, %v3469_v39, %v3435_v7  ;;  %v3737_v15 = vsel %vm9682_vm0, %v3537_v14, %v3503_v63  ;;  %v3769_v44 = vsel %vm9693_vm10, %v3605_v34, %v3571_v17  ;;  %v1942_v34 = vpop.f32.mrf.mxu0 }
 0x407   : > { %v3801_v8 = vsel %vm9694_vm5, %v3673_v42, %v3639_v35  ;;  %v3833_v1 = vsel %vm9686_vm6, %v3737_v15, %v3705_v11  ;;  %vm9697_vm12 = vcmp.gt.f32.partialorder %v9696_v21, 0.0  ;;  %vm9700_vm0 = vcmp.gt.f32.partialorder %v9699_v31, 0.0  ;;  %v2165_v5 = vpop.f32.mrf.mxu2  ;;  %v9722_v11 = vld [vmem:[#allocation98_spill] sm:$0xff] }
 0x408   : > { %v3865_v16 = vsel %vm9695_vm7, %v3801_v8, %v3769_v44  ;;  %v3178_v9 = vsel %vm9697_vm12, %v2542_v10, %v2541_v40  ;;  %vm9698_vm8 = vmmov %vm9697_vm12  ;;  %vm9703_vm10 = vcmp.gt.f32.partialorder %v9702_v45, 0.0  ;;  %v2559_v18 = vsub.f32 %v2165_v5, %v7333_v3 }
 0x409   : > { %v3897_v23 = vsel %vm9690_vm4, %v3865_v16, %v3833_v1  ;;  %v3210_v49 = vsel %vm9698_vm8, %v2544_v12, %v2543_v25  ;;  %vm9705_vm6 = vmmov %vm9698_vm8  ;;  %v3179_v15 = vsel %vm3083_vm14, %v2557_v28, %v2556_v46  ;;  %v9711_v1 = vld [vmem:[#allocation94_spill] sm:$0xff]  ;;  %v9714_v16 = vld [vmem:[#allocation128_spill] sm:$0xff]  ;;  %v2572_v21 = vsub.f32 %v1942_v34, %v7317_v53 }
 0x40a   : > { %v3929_v50 = vmul.f32 %v3897_v23, %v3369_v52  ;;  %v3274_v4 = vsel %vm9700_vm0, %v3210_v49, %v3178_v9  ;;  %vm9706_vm7 = vmmov %vm9705_vm6  ;;  %v3211_v44 = vsel %vm3083_vm14, %v2559_v18, %v2558_v0  ;;  %v9715_v12 = vld [vmem:[#allocation92_spill] sm:$0xff]  ;;  %v1829_v23 = vpop.f32.mrf.mxu3  ;;  %v2055_v9 = vpop.f32.mrf.mxu1 }
 0x40b   : > { %v3306_v47 = vsel %vm9703_vm10, %v3274_v4, %v9701_v32  ;;  %vm9707_vm4 = vmmov %vm9705_vm6  ;;  %vm9712_vm10 = vcmp.gt.f32.partialorder %v9711_v1, 0.0  ;;  %v2571_v31 = vsub.f32 %v1829_v23, %v7328_v60  ;;  %v9724_v1 = vld [vmem:[#allocation129_spill] sm:$0xff] }
 0x40c   : > { %3961 = vst [vmem:[%s7428_s28 + $0x98] sm:$0xff] %v3929_v50  ;;  %v3338_v62 = vand.u32 2147483647, %v3306_v47  ;;  %vm3402_vm5 = vcmp.gt.f32.partialorder %v3306_v47, 0.0  ;;  %vm9708_vm12 = vmmov %vm9707_vm4  ;;  %v3275_v40 = vsel %vm9712_vm10, %v3211_v44, %v3179_v15  ;;  %v9717_v47 = vld [vmem:[#allocation99_spill] sm:$0xff] }
 0x40d   : > { %v3436_v36 = vsel %vm3402_vm5, %v7340_v59, %v7342_v19  ;;  %v3470_v22 = vsel %vm3402_vm5, %v7344_v58, %v7349_v38  ;;  %v3504_v37 = vsel %vm3402_vm5, %v7351_v6, %v7353_v30  ;;  %v3538_v10 = vsel %vm3402_vm5, %v7355_v29, %v7357_v57  ;;  %vm9709_vm8 = vmmov %vm9700_vm0 }
 0x40e   : > { %v3370_v7 = vmin.f32 %v9704_v56, %v3338_v62  ;;  %v3572_v39 = vsel %vm3402_vm5, %v7359_v13, %v7366_v54  ;;  %v3606_v63 = vsel %vm3402_vm5, %v7368_v24, %v7372_v41  ;;  %v3640_v14 = vsel %vm3402_vm5, %v7374_v26, %v7376_v61 }
 0x40f   : > { %v3674_v2 = vsel %vm3402_vm5, %v7381_v43, %v7383_v48  ;;  %v3706_v33 = vsel %vm9705_vm6, %v3470_v22, %v3436_v36  ;;  %v3738_v52 = vsel %vm9706_vm7, %v3538_v10, %v3504_v37  ;;  %v3770_v17 = vsel %vm9707_vm4, %v3606_v63, %v3572_v39  ;;  %v2168_v4 = vpop.f32.mrf.mxu2  ;;  %vm9718_vm4 = vmmov %vm9712_vm10 }
 0x410   : > { %v3802_v35 = vsel %vm9708_vm12, %v3674_v2, %v3640_v14  ;;  %v3834_v42 = vsel %vm9709_vm8, %v3738_v52, %v3706_v33  ;;  %vm9713_vm5 = vcmp.gt.f32.partialorder %v9702_v45, 0.0  ;;  %vm9716_vm6 = vcmp.gt.f32.partialorder %v9715_v12, 0.0  ;;  %vm9719_vm12 = vmmov %vm9718_vm4 }
 0x411   : > { %v3866_v8 = vsel %vm9700_vm0, %v3802_v35, %v3770_v17  ;;  %v3307_v20 = vsel %vm9716_vm6, %v3275_v40, %v9714_v16  ;;  %v2573_v56 = vsub.f32 %v2055_v9, %v7323_v51  ;;  %v3180_v14 = vsel %vm3084_vm13, %v2572_v21, %v2571_v31  ;;  %vm9721_vm8 = vmmov %vm9716_vm6  ;;  %v9725_v40 = vld [vmem:[#allocation95_spill] sm:$0xff] }
 0x412   : > { %v3898_v25 = vsel %vm9713_vm5, %v3866_v8, %v3834_v42  ;;  %v3339_v49 = vand.u32 2147483647, %v3307_v20  ;;  %vm3403_vm7 = vcmp.gt.f32.partialorder %v3307_v20, 0.0  ;;  %v2574_v2 = vsub.f32 %v2168_v4, %v7333_v3  ;;  %v1832_v35 = vpop.f32.mrf.mxu3  ;;  %v2058_v42 = vpop.f32.mrf.mxu1  ;;  %v9728_v4 = vld [vmem:[#allocation100_spill] sm:$0xff] }
 0x413   : > { %v3930_v50 = vmul.f32 %v3898_v25, %v3370_v7  ;;  %v3437_v27 = vsel %vm3403_vm7, %v7340_v59, %v7342_v19  ;;  %v3471_v55 = vsel %vm3403_vm7, %v7344_v58, %v7349_v38  ;;  %v3505_v32 = vsel %vm3403_vm7, %v7351_v6, %v7353_v30  ;;  %v1945_v7 = vpop.f32.mrf.mxu0 }
 0x414   : > { %v3539_v45 = vsel %vm3403_vm7, %v7355_v29, %v7357_v57  ;;  %v3371_v46 = vmin.f32 %v9717_v47, %v3339_v49  ;;  %v3573_v28 = vsel %vm3403_vm7, %v7359_v13, %v7366_v54  ;;  %v3607_v5 = vsel %vm3403_vm7, %v7368_v24, %v7372_v41 }
 0x415   : > { %3962 = vst [vmem:[%s7428_s28 + $0xa0] sm:$0xff] %v3930_v50  ;;  %v3641_v62 = vsel %vm3403_vm7, %v7374_v26, %v7376_v61  ;;  %v3675_v0 = vsel %vm3403_vm7, %v7381_v43, %v7383_v48  ;;  %v3707_v18 = vsel %vm3083_vm14, %v3471_v55, %v3437_v27  ;;  %v3739_v36 = vsel %vm3083_vm14, %v3539_v45, %v3505_v32 }
 0x416   : > { %v3771_v22 = vsel %vm3083_vm14, %v3607_v5, %v3573_v28  ;;  %v3803_v37 = vsel %vm3083_vm14, %v3675_v0, %v3641_v62  ;;  %v3835_v10 = vsel %vm9718_vm4, %v3739_v36, %v3707_v18  ;;  %v2587_v52 = vsub.f32 %v1945_v7, %v7317_v53 }
 0x417   : > { %v3867_v39 = vsel %vm9719_vm12, %v3803_v37, %v3771_v22  ;;  %v3212_v34 = vsel %vm3084_vm13, %v2574_v2, %v2573_v56  ;;  %vm9723_vm14 = vcmp.gt.f32.partialorder %v9722_v11, 0.0  ;;  %v2586_v44 = vsub.f32 %v1832_v35, %v7328_v60  ;;  %v2171_v8 = vpop.f32.mrf.mxu2  ;;  %v9731_v37 = vld [vmem:[#allocation59_spill] sm:$0xff]  ;;  %v9735_v2 = vld [vmem:[#allocation54_spill] sm:$0xff] }
 0x418   : > { %v3899_v33 = vsel %vm9721_vm8, %v3867_v39, %v3835_v10  ;;  %v3276_v15 = vsel %vm9723_vm14, %v3212_v34, %v3180_v14  ;;  %vm9726_vm0 = vcmp.gt.f32.partialorder %v9725_v40, 0.0  ;;  %v2588_v16 = vsub.f32 %v2058_v42, %v7323_v51  ;;  %vm9729_vm5 = vmmov %vm9723_vm14  ;;  %v9734_v14 = vld [vmem:[#allocation130_spill] sm:$0xff] }
 0x419   : > { %v3931_v17 = vmul.f32 %v3899_v33, %v3371_v46  ;;  %v3308_v25 = vsel %vm9726_vm0, %v3276_v15, %v9724_v1  ;;  %v3181_v23 = vsel %vm3085_vm15, %v2587_v52, %v2586_v44  ;;  %v2589_v21 = vsub.f32 %v2171_v8, %v7333_v3  ;;  %vm9730_vm6 = vmmov %vm9729_vm5  ;;  %v9737_v40 = vld [vmem:[#allocation102_spill] sm:$0xff] }
 0x41a   : > { %v3340_v12 = vand.u32 2147483647, %v3308_v25  ;;  %vm3404_vm10 = vcmp.gt.f32.partialorder %v3308_v25, 0.0  ;;  %vm9732_vm7 = vcmp.gt.f32.partialorder %v9731_v37, 0.0  ;;  %v1835_v56 = vpop.f32.mrf.mxu3  ;;  %v2061_v39 = vpop.f32.mrf.mxu1  ;;  %vm9733_vm4 = vmmov %vm9726_vm0 }
 0x41b   : > { %3963 = vst [vmem:[%s7428_s28 + $0xa8] sm:$0xff] %v3931_v17  ;;  %v3438_v9 = vsel %vm3404_vm10, %v7340_v59, %v7342_v19  ;;  %v3472_v50 = vsel %vm3404_vm10, %v7344_v58, %v7349_v38  ;;  %v3506_v49 = vsel %vm3404_vm10, %v7351_v6, %v7353_v30  ;;  %v3540_v31 = vsel %vm3404_vm10, %v7355_v29, %v7357_v57  ;;  %v1948_v47 = vpop.f32.mrf.mxu0  ;;  %vm9738_vm8 = vmmov %vm9732_vm7 }
 0x41c   : > { %v3372_v27 = vmin.f32 %v9728_v4, %v3340_v12  ;;  %v3574_v55 = vsel %vm3404_vm10, %v7359_v13, %v7366_v54  ;;  %v3608_v32 = vsel %vm3404_vm10, %v7368_v24, %v7372_v41  ;;  %v3642_v45 = vsel %vm3404_vm10, %v7374_v26, %v7376_v61  ;;  %vm9740_vm14 = vmmov %vm9732_vm7 }
 0x41d   : > { %v3676_v46 = vsel %vm3404_vm10, %v7381_v43, %v7383_v48  ;;  %v3708_v28 = vsel %vm3084_vm13, %v3472_v50, %v3438_v9  ;;  %v3740_v5 = vsel %vm3084_vm13, %v3540_v31, %v3506_v49  ;;  %v3772_v62 = vsel %vm3084_vm13, %v3608_v32, %v3574_v55  ;;  %v9752_v55 = vld [vmem:[#allocation36_spill] sm:$0xff] }
 0x41e   : > { %v3804_v0 = vsel %vm3084_vm13, %v3676_v46, %v3642_v45  ;;  %v3836_v18 = vsel %vm9729_vm5, %v3740_v5, %v3708_v28  ;;  %v3213_v36 = vsel %vm3085_vm15, %v2589_v21, %v2588_v16  ;;  %v2602_v7 = vsub.f32 %v1948_v47, %v7317_v53  ;;  %v9741_v46 = vld [vmem:[#allocation33_spill] sm:$0xff]  ;;  %v9744_v5 = vld [vmem:[#allocation131_spill] sm:$0xff] }
 0x41f   : > { %v3868_v22 = vsel %vm9730_vm6, %v3804_v0, %v3772_v62  ;;  %v3277_v10 = vsel %vm9732_vm7, %v3213_v36, %v3181_v23  ;;  %vm9736_vm13 = vcmp.gt.f32.partialorder %v9735_v2, 0.0  ;;  %v2601_v52 = vsub.f32 %v1835_v56, %v7328_v60  ;;  %v2174_v34 = vpop.f32.mrf.mxu2  ;;  %v9745_v62 = vld [vmem:[#allocation30_spill] sm:$0xff] }
 0x420   : > { %v3900_v63 = vsel %vm9733_vm4, %v3868_v22, %v3836_v18  ;;  %v3309_v33 = vsel %vm9736_vm13, %v3277_v10, %v9734_v14  ;;  %v2603_v17 = vsub.f32 %v2061_v39, %v7323_v51  ;;  %v2604_v11 = vsub.f32 %v2174_v34, %v7333_v3  ;;  %vm9743_vm10 = vmmov %vm9736_vm13 }
 0x421   : > { %v3932_v35 = vmul.f32 %v3900_v63, %v3372_v27  ;;  %v3341_v42 = vand.u32 2147483647, %v3309_v33  ;;  %vm3405_vm12 = vcmp.gt.f32.partialorder %v3309_v33, 0.0  ;;  %v3182_v32 = vsel %vm3086_vm11, %v2602_v7, %v2601_v52  ;;  %v9747_v33 = vld [vmem:[#allocation35_spill] sm:$0xff] }
 0x422   : > { %v3439_v15 = vsel %vm3405_vm12, %v7340_v59, %v7342_v19  ;;  %v3473_v44 = vsel %vm3405_vm12, %v7344_v58, %v7349_v38  ;;  %v3507_v8 = vsel %vm3405_vm12, %v7351_v6, %v7353_v30  ;;  %v3541_v1 = vsel %vm3405_vm12, %v7355_v29, %v7357_v57  ;;  %v1838_v18 = vpop.f32.mrf.mxu3  ;;  %v2064_v22 = vpop.f32.mrf.mxu1 }
 0x423   : > { %3964 = vst [vmem:[%s7428_s28 + $0xb0] sm:$0xff] %v3932_v35  ;;  %v3373_v25 = vmin.f32 %v9737_v40, %v3341_v42  ;;  %v3575_v16 = vsel %vm3405_vm12, %v7359_v13, %v7366_v54  ;;  %v3609_v12 = vsel %vm3405_vm12, %v7368_v24, %v7372_v41  ;;  %v3643_v23 = vsel %vm3405_vm12, %v7374_v26, %v7376_v61  ;;  %v1951_v31 = vpop.f32.mrf.mxu0 }
 0x424   : > { %v3677_v21 = vsel %vm3405_vm12, %v7381_v43, %v7383_v48  ;;  %v3709_v9 = vsel %vm3085_vm15, %v3473_v44, %v3439_v15  ;;  %v3741_v50 = vsel %vm3085_vm15, %v3541_v1, %v3507_v8  ;;  %v3773_v49 = vsel %vm3085_vm15, %v3609_v12, %v3575_v16 }
 0x425   : > { %v3805_v4 = vsel %vm3085_vm15, %v3677_v21, %v3643_v23  ;;  %v3837_v27 = vsel %vm9738_vm8, %v3741_v50, %v3709_v9  ;;  %v3214_v45 = vsel %vm3086_vm11, %v2604_v11, %v2603_v17  ;;  %vm9742_vm0 = vcmp.gt.f32.partialorder %v9741_v46, 0.0  ;;  %v9754_v46 = vld [vmem:[#allocation132_spill] sm:$0xff] }
 0x426   : > { %v3869_v47 = vsel %vm9740_vm14, %v3805_v4, %v3773_v49  ;;  %v3278_v28 = vsel %vm9742_vm0, %v3214_v45, %v3182_v32  ;;  %vm9746_vm15 = vcmp.gt.f32.partialorder %v9745_v62, 0.0  ;;  %v2617_v36 = vsub.f32 %v1951_v31, %v7317_v53  ;;  %vm9748_vm6 = vmmov %vm9742_vm0 }
 0x427   : > { %v3901_v20 = vsel %vm9743_vm10, %v3869_v47, %v3837_v27  ;;  %v3310_v0 = vsel %vm9746_vm15, %v3278_v28, %v9744_v5  ;;  %v2616_v37 = vsub.f32 %v1838_v18, %v7328_v60  ;;  %v2177_v7 = vpop.f32.mrf.mxu2  ;;  %v2618_v40 = vsub.f32 %v2064_v22, %v7323_v51  ;;  %vm9749_vm7 = vmmov %vm9742_vm0  ;;  %v9755_v28 = vld [vmem:[#allocation34_spill] sm:$0xff] }
 0x428   : > { %v3933_v10 = vmul.f32 %v3901_v20, %v3373_v25  ;;  %v3342_v56 = vand.u32 2147483647, %v3310_v0  ;;  %vm3406_vm5 = vcmp.gt.f32.partialorder %v3310_v0, 0.0  ;;  %v2619_v21 = vsub.f32 %v2177_v7, %v7333_v3  ;;  %vm9751_vm4 = vmmov %vm9746_vm15  ;;  %v9758_v7 = vld [vmem:[#allocation38_spill] sm:$0xff] }
 0x429   : > { %v3440_v39 = vsel %vm3406_vm5, %v7340_v59, %v7342_v19  ;;  %v3474_v63 = vsel %vm3406_vm5, %v7344_v58, %v7349_v38  ;;  %v3508_v14 = vsel %vm3406_vm5, %v7351_v6, %v7353_v30  ;;  %v3542_v2 = vsel %vm3406_vm5, %v7355_v29, %v7357_v57 }
 0x42a   : > { %3965 = vst [vmem:[%s7428_s28 + $0xb8] sm:$0xff] %v3933_v10  ;;  %v3374_v52 = vmin.f32 %v9747_v33, %v3342_v56  ;;  %v3576_v17 = vsel %vm3406_vm5, %v7359_v13, %v7366_v54  ;;  %v3610_v34 = vsel %vm3406_vm5, %v7368_v24, %v7372_v41  ;;  %v3644_v35 = vsel %vm3406_vm5, %v7374_v26, %v7376_v61  ;;  %v1841_v4 = vpop.f32.mrf.mxu3  ;;  %v2067_v27 = vpop.f32.mrf.mxu1 }
 0x42b   : > { %v3678_v42 = vsel %vm3406_vm5, %v7381_v43, %v7383_v48  ;;  %v3710_v11 = vsel %vm3086_vm11, %v3474_v63, %v3440_v39  ;;  %v3742_v15 = vsel %vm3086_vm11, %v3542_v2, %v3508_v14  ;;  %v3774_v44 = vsel %vm3086_vm11, %v3610_v34, %v3576_v17  ;;  %v1954_v25 = vpop.f32.mrf.mxu0 }
 0x42c   : > { %v3806_v8 = vsel %vm3086_vm11, %v3678_v42, %v3644_v35  ;;  %v3838_v1 = vsel %vm9748_vm6, %v3742_v15, %v3710_v11  ;;  %v3183_v23 = vsel %vm3087_vm9, %v2617_v36, %v2616_v37  ;;  %v2632_v50 = vsub.f32 %v1954_v25, %v7317_v53 }
 0x42d   : > { %v3870_v16 = vsel %vm9749_vm7, %v3806_v8, %v3774_v44  ;;  %v3215_v31 = vsel %vm3087_vm9, %v2619_v21, %v2618_v40  ;;  %vm9753_vm11 = vcmp.gt.f32.partialorder %v9752_v55, 0.0  ;;  %v2631_v45 = vsub.f32 %v1841_v4, %v7328_v60  ;;  %v9761_v8 = vld [vmem:[#allocation39_spill] sm:$0xff]  ;;  %v9765_v21 = vld [vmem:[#allocation37_spill] sm:$0xff] }
 0x42e   : > { %v3902_v9 = vsel %vm9751_vm4, %v3870_v16, %v3838_v1  ;;  %v3279_v32 = vsel %vm9753_vm11, %v3215_v31, %v3183_v23  ;;  %vm9756_vm13 = vcmp.gt.f32.partialorder %v9755_v28, 0.0  ;;  %v2633_v5 = vsub.f32 %v2067_v27, %v7323_v51  ;;  %vm9759_vm8 = vmmov %vm9753_vm11  ;;  %v9764_v23 = vld [vmem:[#allocation133_spill] sm:$0xff] }
 0x42f   : > { %v3934_v49 = vmul.f32 %v3902_v9, %v3374_v52  ;;  %v2180_v47 = vpop.f32.mrf.mxu2  ;;  %v3311_v20 = vsel %vm9756_vm13, %v3279_v32, %v9754_v46  ;;  %v3184_v18 = vsel %vm3088_vm1, %v2632_v50, %v2631_v45  ;;  %vm9760_vm14 = vmmov %vm9759_vm8  ;;  %vm9762_vm0 = vcmp.gt.f32.partialorder %v9761_v8, 0.0  ;;  %v9767_v28 = vld [vmem:[#allocation41_spill] sm:$0xff] }
 0x430   : > { %v3343_v62 = vand.u32 2147483647, %v3311_v20  ;;  %vm3407_vm12 = vcmp.gt.f32.partialorder %v3311_v20, 0.0  ;;  %v2634_v36 = vsub.f32 %v2180_v47, %v7333_v3  ;;  %vm9763_vm10 = vmmov %vm9756_vm13 }
 0x431   : > { %3966 = vst [vmem:[%s7428_s28 + $0xc0] sm:$0xff] %v3934_v49  ;;  %v3441_v22 = vsel %vm3407_vm12, %v7340_v59, %v7342_v19  ;;  %v3475_v10 = vsel %vm3407_vm12, %v7344_v58, %v7349_v38  ;;  %v3509_v56 = vsel %vm3407_vm12, %v7351_v6, %v7353_v30  ;;  %v3543_v37 = vsel %vm3407_vm12, %v7355_v29, %v7357_v57  ;;  %vm9768_vm5 = vmmov %vm9762_vm0 }
 0x432   : > { %v3375_v39 = vmin.f32 %v9758_v7, %v3343_v62  ;;  %v3577_v63 = vsel %vm3407_vm12, %v7359_v13, %v7366_v54  ;;  %v3611_v14 = vsel %vm3407_vm12, %v7368_v24, %v7372_v41  ;;  %v3645_v2 = vsel %vm3407_vm12, %v7374_v26, %v7376_v61  ;;  %v1844_v40 = vpop.f32.mrf.mxu3  ;;  %v2070_v16 = vpop.f32.mrf.mxu1  ;;  %vm9770_vm6 = vmmov %vm9762_vm0 }
 0x433   : > { %v1957_v33 = vpop.f32.mrf.mxu0  ;;  %v3679_v52 = vsel %vm3407_vm12, %v7381_v43, %v7383_v48  ;;  %v3711_v17 = vsel %vm3087_vm9, %v3475_v10, %v3441_v22  ;;  %v3743_v34 = vsel %vm3087_vm9, %v3543_v37, %v3509_v56  ;;  %v3775_v35 = vsel %vm3087_vm9, %v3611_v14, %v3577_v63  ;;  %v9782_v63 = vld [vmem:[#allocation46_spill] sm:$0xff] }
 0x434   : > { %v3807_v42 = vsel %vm3087_vm9, %v3679_v52, %v3645_v2  ;;  %v3839_v11 = vsel %vm9759_vm8, %v3743_v34, %v3711_v17  ;;  %v3216_v15 = vsel %vm3088_vm1, %v2634_v36, %v2633_v5  ;;  %v2647_v25 = vsub.f32 %v1957_v33, %v7317_v53  ;;  %v9771_v52 = vld [vmem:[#allocation42_spill] sm:$0xff] }
 0x435   : > { %v3871_v44 = vsel %vm9760_vm14, %v3807_v42, %v3775_v35  ;;  %v3280_v1 = vsel %vm9762_vm0, %v3216_v15, %v3184_v18  ;;  %vm9766_vm9 = vcmp.gt.f32.partialorder %v9765_v21, 0.0  ;;  %v2646_v50 = vsub.f32 %v1844_v40, %v7328_v60  ;;  %v9774_v34 = vld [vmem:[#allocation134_spill] sm:$0xff]  ;;  %v9775_v35 = vld [vmem:[#allocation40_spill] sm:$0xff] }
 0x436   : > { %v3903_v12 = vsel %vm9763_vm10, %v3871_v44, %v3839_v11  ;;  %v3312_v9 = vsel %vm9766_vm9, %v3280_v1, %v9764_v23  ;;  %v2648_v49 = vsub.f32 %v2070_v16, %v7323_v51  ;;  %vm9772_vm7 = vcmp.gt.f32.partialorder %v9771_v52, 0.0  ;;  %vm9773_vm4 = vmmov %vm9766_vm9  ;;  %v9784_v52 = vld [vmem:[#allocation135_spill] sm:$0xff] }
 0x437   : > { %v2183_v31 = vpop.f32.mrf.mxu2  ;;  %v3935_v4 = vmul.f32 %v3903_v12, %v3375_v39  ;;  %v3344_v27 = vand.u32 2147483647, %v3312_v9  ;;  %vm3408_vm15 = vcmp.gt.f32.partialorder %v3312_v9, 0.0  ;;  %v3185_v14 = vsel %vm3089_vm2, %v2647_v25, %v2646_v50  ;;  %v9777_v9 = vld [vmem:[#allocation45_spill] sm:$0xff]  ;;  %vm9778_vm13 = vmmov %vm9772_vm7 }
 0x438   : > { %v2649_v55 = vsub.f32 %v2183_v31, %v7333_v3  ;;  %v3442_v32 = vsel %vm3408_vm15, %v7340_v59, %v7342_v19  ;;  %v3476_v45 = vsel %vm3408_vm15, %v7344_v58, %v7349_v38  ;;  %v3510_v47 = vsel %vm3408_vm15, %v7351_v6, %v7353_v30  ;;  %vm9779_vm12 = vmmov %vm9772_vm7 }
 0x439   : > { %v3544_v46 = vsel %vm3408_vm15, %v7355_v29, %v7357_v57  ;;  %3967 = vst [vmem:[%s7428_s28 + $0xc8] sm:$0xff] %v3935_v4  ;;  %v3376_v20 = vmin.f32 %v9767_v28, %v3344_v27  ;;  %v3578_v5 = vsel %vm3408_vm15, %v7359_v13, %v7366_v54  ;;  %v3612_v62 = vsel %vm3408_vm15, %v7368_v24, %v7372_v41 }
 0x43a   : > { %v3646_v18 = vsel %vm3408_vm15, %v7374_v26, %v7376_v61  ;;  %v3680_v36 = vsel %vm3408_vm15, %v7381_v43, %v7383_v48  ;;  %v3712_v22 = vsel %vm3088_vm1, %v3476_v45, %v3442_v32  ;;  %v3744_v10 = vsel %vm3088_vm1, %v3544_v46, %v3510_v47  ;;  %v1847_v11 = vpop.f32.mrf.mxu3  ;;  %v2073_v44 = vpop.f32.mrf.mxu1 }
 0x43b   : > { %v3776_v56 = vsel %vm3088_vm1, %v3612_v62, %v3578_v5  ;;  %v1960_v37 = vpop.f32.mrf.mxu0  ;;  %v3808_v7 = vsel %vm3088_vm1, %v3680_v36, %v3646_v18  ;;  %v3840_v39 = vsel %vm9768_vm5, %v3744_v10, %v3712_v22  ;;  %v3217_v2 = vsel %vm3089_vm2, %v2649_v55, %v2648_v49 }
 0x43c   : > { %v3872_v33 = vsel %vm9770_vm6, %v3808_v7, %v3776_v56  ;;  %v3281_v17 = vsel %vm9772_vm7, %v3217_v2, %v3185_v14  ;;  %vm9776_vm1 = vcmp.gt.f32.partialorder %v9775_v35, 0.0  ;;  %v2662_v15 = vsub.f32 %v1960_v37, %v7317_v53 }
 0x43d   : > { %v3904_v0 = vsel %vm9773_vm4, %v3872_v33, %v3840_v39  ;;  %v3313_v42 = vsel %vm9776_vm1, %v3281_v17, %v9774_v34  ;;  %v2661_v8 = vsub.f32 %v1847_v11, %v7328_v60  ;;  %v2663_v28 = vsub.f32 %v2073_v44, %v7323_v51  ;;  %vm9781_vm8 = vmmov %vm9776_vm1  ;;  %v9785_v17 = vld [vmem:[#allocation44_spill] sm:$0xff] }
 0x43e   : > { %v3936_v1 = vmul.f32 %v3904_v0, %v3376_v20  ;;  %v3345_v40 = vand.u32 2147483647, %v3313_v42  ;;  %vm3409_vm11 = vcmp.gt.f32.partialorder %v3313_v42, 0.0  ;;  %vm9786_vm14 = vcmp.gt.f32.partialorder %v9785_v17, 0.0  ;;  %v9787_v42 = vld [vmem:[#allocation108_spill] sm:$0xff] }
 0x43f   : > { %v2186_v25 = vpop.f32.mrf.mxu2  ;;  %v3443_v16 = vsel %vm3409_vm11, %v7340_v59, %v7342_v19  ;;  %v3477_v12 = vsel %vm3409_vm11, %v7344_v58, %v7349_v38  ;;  %v3511_v23 = vsel %vm3409_vm11, %v7351_v6, %v7353_v30  ;;  %v3545_v21 = vsel %vm3409_vm11, %v7355_v29, %v7357_v57  ;;  %vm9795_vm7 = vmmov %vm9786_vm14  ;;  %v9799_v17 = vld [vmem:[#allocation52_spill] sm:$0xff] }
 0x440   : > { %3968 = vst [vmem:[%s7428_s28 + $0xd0] sm:$0xff] %v3936_v1  ;;  %v3377_v50 = vmin.f32 %v9777_v9, %v3345_v40  ;;  %v3579_v49 = vsel %vm3409_vm11, %v7359_v13, %v7366_v54  ;;  %v3613_v31 = vsel %vm3409_vm11, %v7368_v24, %v7372_v41  ;;  %v3647_v4 = vsel %vm3409_vm11, %v7374_v26, %v7376_v61 }
 0x441   : > { %v3681_v27 = vsel %vm3409_vm11, %v7381_v43, %v7383_v48  ;;  %v3713_v55 = vsel %vm3089_vm2, %v3477_v12, %v3443_v16  ;;  %v3745_v32 = vsel %vm3089_vm2, %v3545_v21, %v3511_v23  ;;  %v3777_v45 = vsel %vm3089_vm2, %v3613_v31, %v3579_v49 }
 0x442   : > { %v3809_v47 = vsel %vm3089_vm2, %v3681_v27, %v3647_v4  ;;  %v3841_v46 = vsel %vm9778_vm13, %v3745_v32, %v3713_v55  ;;  %v3186_v18 = vsel %vm3090_vm3, %v2662_v15, %v2661_v8  ;;  %v2664_v36 = vsub.f32 %v2186_v25, %v7333_v3  ;;  %v2076_v39 = vpop.f32.mrf.mxu1  ;;  %v9789_v25 = vld [vmem:[#allocation48_spill] sm:$0xff] }
 0x443   : > { %v1963_v20 = vpop.f32.mrf.mxu0  ;;  %v3873_v5 = vsel %vm9779_vm12, %v3809_v47, %v3777_v45  ;;  %v1850_v7 = vpop.f32.mrf.mxu3  ;;  %vm9783_vm2 = vcmp.gt.f32.partialorder %v9782_v63, 0.0  ;;  %v2678_v34 = vsub.f32 %v2076_v39, %v7323_v51  ;;  %vm9788_vm10 = vcmp.gt.f32.partialorder %v9787_v42, 0.0  ;;  %v9793_v47 = vld [vmem:[#allocation50_spill] sm:$0xff] }
 0x444   : > { %v3905_v22 = vsel %vm9781_vm8, %v3873_v5, %v3841_v46  ;;  %v2677_v10 = vsub.f32 %v1963_v20, %v7317_v53  ;;  %v3218_v37 = vsel %vm3090_vm3, %v2664_v36, %v2663_v28  ;;  %v2676_v2 = vsub.f32 %v1850_v7, %v7328_v60  ;;  %vm9790_vm9 = vmmov %vm9783_vm2  ;;  %v9797_v36 = vld [vmem:[#allocation47_spill] sm:$0xff] }
 0x445   : > { %v3937_v56 = vmul.f32 %v3905_v22, %v3377_v50  ;;  %v3282_v14 = vsel %vm9783_vm2, %v3218_v37, %v3186_v18  ;;  %vm9791_vm15 = vmmov %vm9788_vm10  ;;  %vm9794_vm6 = vcmp.gt.f32.partialorder %v9793_v47, 0.0  ;;  %v9796_v18 = vld [vmem:[#allocation136_spill] sm:$0xff] }
 0x446   : > { %v3314_v0 = vsel %vm9786_vm14, %v3282_v14, %v9784_v52  ;;  %v3187_v11 = vsel %vm9788_vm10, %v2677_v10, %v2676_v2  ;;  %vm9792_vm5 = vmmov %vm9783_vm2 }
 0x447   : > { %v2189_v33 = vpop.f32.mrf.mxu2  ;;  %3969 = vst [vmem:[%s7428_s28 + $0xd8] sm:$0xff] %v3937_v56  ;;  %v3346_v35 = vand.u32 2147483647, %v3314_v0  ;;  %vm3410_vm0 = vcmp.gt.f32.partialorder %v3314_v0, 0.0  ;;  %vm9800_vm1 = vmmov %vm9788_vm10 }
 0x448   : > { %v2679_v15 = vsub.f32 %v2189_v33, %v7333_v3  ;;  %v3444_v44 = vsel %vm3410_vm0, %v7340_v59, %v7342_v19  ;;  %v3478_v1 = vsel %vm3410_vm0, %v7344_v58, %v7349_v38  ;;  %v3512_v40 = vsel %vm3410_vm0, %v7351_v6, %v7353_v30  ;;  %vm9801_vm11 = vmmov %vm9800_vm1 }
 0x449   : > { %v3546_v8 = vsel %vm3410_vm0, %v7355_v29, %v7357_v57  ;;  %v3378_v16 = vmin.f32 %v9789_v25, %v3346_v35  ;;  %v3580_v12 = vsel %vm3410_vm0, %v7359_v13, %v7366_v54  ;;  %v3614_v23 = vsel %vm3410_vm0, %v7368_v24, %v7372_v41  ;;  %vm9802_vm13 = vmmov %vm9800_vm1 }
 0x44a   : > { %v3648_v21 = vsel %vm3410_vm0, %v7374_v26, %v7376_v61  ;;  %v3682_v50 = vsel %vm3410_vm0, %v7381_v43, %v7383_v48  ;;  %v3714_v49 = vsel %vm3090_vm3, %v3478_v1, %v3444_v44  ;;  %v3746_v31 = vsel %vm3090_vm3, %v3546_v8, %v3512_v40  ;;  %v2079_v5 = vpop.f32.mrf.mxu1  ;;  %vm9803_vm12 = vmmov %vm9800_vm1 }
 0x44b   : > { %v1966_v9 = vpop.f32.mrf.mxu0  ;;  %v3778_v4 = vsel %vm3090_vm3, %v3614_v23, %v3580_v12  ;;  %v3810_v27 = vsel %vm3090_vm3, %v3682_v50, %v3648_v21  ;;  %v3842_v55 = vsel %vm9790_vm9, %v3746_v31, %v3714_v49  ;;  %v3219_v32 = vsel %vm9791_vm15, %v2679_v15, %v2678_v34  ;;  %v1853_v28 = vpop.f32.mrf.mxu3  ;;  %vm9804_vm8 = vmmov %vm9794_vm6  ;;  %v9805_v12 = vld [vmem:[#allocation109_spill] sm:$0xff] }
 0x44c   : > { %v3874_v45 = vsel %vm9792_vm5, %v3810_v27, %v3778_v4  ;;  %v3283_v46 = vsel %vm9794_vm6, %v3219_v32, %v3187_v11  ;;  %v2692_v20 = vsub.f32 %v1966_v9, %v7317_v53  ;;  %vm9798_vm3 = vcmp.gt.f32.partialorder %v9797_v36, 0.0  ;;  %vm9808_vm0 = vmmov %vm9794_vm6  ;;  %v9809_v50 = vld [vmem:[#allocation53_spill] sm:$0xff]  ;;  %v9813_v4 = vld [vmem:[#allocation51_spill] sm:$0xff] }
 0x44d   : > { %v3906_v62 = vsel %vm9795_vm7, %v3874_v45, %v3842_v55  ;;  %v3315_v22 = vsel %vm9798_vm3, %v3283_v46, %v9796_v18  ;;  %v2691_v10 = vsub.f32 %v1853_v28, %v7328_v60  ;;  %v2693_v56 = vsub.f32 %v2079_v5, %v7323_v51  ;;  %vm9811_vm9 = vmmov %vm9798_vm3  ;;  %v9812_v31 = vld [vmem:[#allocation137_spill] sm:$0xff] }
 0x44e   : > { %v3938_v7 = vmul.f32 %v3906_v62, %v3378_v16  ;;  %v3347_v39 = vand.u32 2147483647, %v3315_v22  ;;  %vm3411_vm4 = vcmp.gt.f32.partialorder %v3315_v22, 0.0  ;;  %vm9806_vm2 = vcmp.gt.f32.partialorder %v9805_v12, 0.0 }
 0x44f   : > { %v2192_v37 = vpop.f32.mrf.mxu2  ;;  %v3445_v14 = vsel %vm3411_vm4, %v7340_v59, %v7342_v19  ;;  %v3479_v2 = vsel %vm3411_vm4, %v7344_v58, %v7349_v38  ;;  %v3513_v33 = vsel %vm3411_vm4, %v7351_v6, %v7353_v30  ;;  %v3547_v52 = vsel %vm3411_vm4, %v7355_v29, %v7357_v57  ;;  %vm9807_vm14 = vmmov %vm9806_vm2 }
 0x450   : > { %v2694_v63 = vsub.f32 %v2192_v37, %v7333_v3  ;;  %3970 = vst [vmem:[%s7428_s28 + $0xe0] sm:$0xff] %v3938_v7  ;;  %v3379_v0 = vmin.f32 %v9799_v17, %v3347_v39  ;;  %v3581_v34 = vsel %vm3411_vm4, %v7359_v13, %v7366_v54  ;;  %v3615_v35 = vsel %vm3411_vm4, %v7368_v24, %v7372_v41  ;;  %vm9816_vm6 = vmmov %vm9806_vm2  ;;  %v9822_v17 = vld [vmem:[#allocation110_spill] sm:$0xff] }
 0x451   : > { %v3649_v11 = vsel %vm3411_vm4, %v7374_v26, %v7376_v61  ;;  %v3683_v15 = vsel %vm3411_vm4, %v7381_v43, %v7383_v48  ;;  %v3715_v44 = vsel %vm9800_vm1, %v3479_v2, %v3445_v14  ;;  %v3747_v1 = vsel %vm9801_vm11, %v3547_v52, %v3513_v33  ;;  %vm9817_vm7 = vmmov %vm9806_vm2 }
 0x452   : > { %v3779_v40 = vsel %vm9802_vm13, %v3615_v35, %v3581_v34  ;;  %v3811_v25 = vsel %vm9803_vm12, %v3683_v15, %v3649_v11  ;;  %v3843_v16 = vsel %vm9804_vm8, %v3747_v1, %v3715_v44  ;;  %v3188_v23 = vsel %vm9806_vm2, %v2692_v20, %v2691_v10  ;;  %v2082_v18 = vpop.f32.mrf.mxu1  ;;  %vm9818_vm3 = vmmov %vm9806_vm2  ;;  %v9826_v44 = vld [vmem:[#allocation60_spill] sm:$0xff] }
 0x453   : > { %v1969_v8 = vpop.f32.mrf.mxu0  ;;  %v3220_v21 = vsel %vm9807_vm14, %v2694_v63, %v2693_v56  ;;  %v3875_v9 = vsel %vm9808_vm0, %v3811_v25, %v3779_v40  ;;  %vm9810_vm10 = vcmp.gt.f32.partialorder %v9809_v50, 0.0  ;;  %vm9814_vm15 = vcmp.gt.f32.partialorder %v9813_v4, 0.0  ;;  %vm9819_vm4 = vmmov %vm9806_vm2  ;;  %v9829_v40 = vld [vmem:[#allocation55_spill] sm:$0xff] }
 0x454   : > { %v3284_v49 = vsel %vm9810_vm10, %v3220_v21, %v3188_v23  ;;  %v3907_v42 = vsel %vm9811_vm9, %v3875_v9, %v3843_v16  ;;  %v1856_v55 = vpop.f32.mrf.mxu3  ;;  %v2707_v32 = vsub.f32 %v1969_v8, %v7317_v53  ;;  %v9815_v53 = vld [vmem:[#allocation56_spill] sm:$0xff]  ;;  %vm9820_vm1 = vmmov %vm9810_vm10  ;;  %v2708_v33 = vsub.f32 %v2082_v18, %v7323_v51  ;;  %v9828_v51 = vld [vmem:[#allocation138_spill] sm:$0xff] }
 0x455   : > { %v3316_v27 = vsel %vm9814_vm15, %v3284_v49, %v9812_v31  ;;  %v3939_v45 = vmul.f32 %v3907_v42, %v3379_v0  ;;  %v2706_v47 = vsub.f32 %v1856_v55, %v7328_v60  ;;  %vm9821_vm11 = vmmov %vm9820_vm1  ;;  %vm9823_vm13 = vcmp.gt.f32.partialorder %v9822_v17, 0.0  ;;  %v9831_v21 = vld [vmem:[#allocation111_spill] sm:$0xff] }
 0x456   : > { %v3348_v46 = vand.u32 2147483647, %v3316_v27  ;;  %vm3412_vm5 = vcmp.gt.f32.partialorder %v3316_v27, 0.0  ;;  %vm9824_vm12 = vmmov %vm9814_vm15  ;;  %vm9827_vm2 = vcmp.gt.f32.partialorder %v9826_v44, 0.0  ;;  %vm9830_vm14 = vcmp.gt.f32.partialorder %v9829_v40, 0.0 }
 0x457   : > { %v3446_v28 = vsel %vm3412_vm5, %v7340_v59, %v7342_v19  ;;  %v3480_v20 = vsel %vm3412_vm5, %v7344_v58, %v7349_v38  ;;  %v3514_v5 = vsel %vm3412_vm5, %v7351_v6, %v7353_v30  ;;  %v3548_v62 = vsel %vm3412_vm5, %v7355_v29, %v7357_v57  ;;  %3971 = vst [vmem:[%s7428_s28 + $0xe8] sm:$0xff] %v3939_v45  ;;  %v2195_v56 = vpop.f32.mrf.mxu2  ;;  %vm9825_vm8 = vmmov %vm9823_vm13 }
 0x458   : > { %v3380_v36 = vmin.f32 %v9815_v53, %v3348_v46  ;;  %v3582_v22 = vsel %vm3412_vm5, %v7359_v13, %v7366_v54  ;;  %v3616_v60 = vsel %vm3412_vm5, %v7368_v24, %v7372_v41  ;;  %v3650_v10 = vsel %vm3412_vm5, %v7374_v26, %v7376_v61  ;;  %vm9832_vm10 = vmmov %vm9825_vm8 }
 0x459   : > { %v3684_v37 = vsel %vm3412_vm5, %v7381_v43, %v7383_v48  ;;  %v3716_v7 = vsel %vm9816_vm6, %v3480_v20, %v3446_v28  ;;  %v3748_v39 = vsel %vm9817_vm7, %v3548_v62, %v3514_v5  ;;  %v3780_v63 = vsel %vm9818_vm3, %v3616_v60, %v3582_v22  ;;  %vm9833_vm9 = vmmov %vm9825_vm8 }
 0x45a   : > { %v3812_v14 = vsel %vm9819_vm4, %v3684_v37, %v3650_v10  ;;  %v3844_v2 = vsel %vm9820_vm1, %v3748_v39, %v3716_v7  ;;  %v3189_v0 = vsel %vm9823_vm13, %v2707_v32, %v2706_v47  ;;  %v2709_v34 = vsub.f32 %v2195_v56, %v7333_v3  ;;  %vm9834_vm15 = vmmov %vm9825_vm8 }
 0x45b   : > { %v3876_v52 = vsel %vm9821_vm11, %v3812_v14, %v3780_v63  ;;  %vm9835_vm5 = vmmov %vm9825_vm8 }
 0x45c   : > { %v3908_v35 = vsel %vm9824_vm12, %v3876_v52, %v3844_v2  ;;  %v3221_v15 = vsel %vm9825_vm8, %v2709_v34, %v2708_v33  ;;  %vm9836_vm6 = vmmov %vm9827_vm2 }
 0x45d   : > { %v3940_v11 = vmul.f32 %v3908_v35, %v3380_v36  ;;  %v3285_v1 = vsel %vm9827_vm2, %v3221_v15, %v3189_v0  ;;  %vm9837_vm7 = vmmov %vm9827_vm2 }
 0x45e   : > { %v3317_v8 = vsel %vm9830_vm14, %v3285_v1, %v9828_v51  ;;  %vm9838_vm3 = vmmov %vm9830_vm14 }
 0x45f   : > { %3972 = vst [vmem:[%s7428_s28 + $0xf0] sm:$0xff] %v3940_v11  ;;  %v3349_v25 = vand.u32 2147483647, %v3317_v8  ;;  %vm3413_vm0 = vcmp.gt.f32.partialorder %v3317_v8, 0.0 }
 0x460   : > { %v3447_v3 = vsel %vm3413_vm0, %v7340_v59, %v7342_v19  ;;  %v3481_v16 = vsel %vm3413_vm0, %v7344_v58, %v7349_v38  ;;  %v3515_v12 = vsel %vm3413_vm0, %v7351_v6, %v7353_v30  ;;  %v3549_v23 = vsel %vm3413_vm0, %v7355_v29, %v7357_v57 }
 0x461   : > { %v3381_v9 = vmin.f32 %v9831_v21, %v3349_v25  ;;  %v3583_v50 = vsel %vm3413_vm0, %v7359_v13, %v7366_v54  ;;  %v3617_v49 = vsel %vm3413_vm0, %v7368_v24, %v7372_v41  ;;  %v3651_v19 = vsel %vm3413_vm0, %v7374_v26, %v7376_v61 }
 0x462   : > { %v3685_v38 = vsel %vm3413_vm0, %v7381_v43, %v7383_v48  ;;  %v3717_v30 = vsel %vm9832_vm10, %v3481_v16, %v3447_v3  ;;  %v3749_v6 = vsel %vm9833_vm9, %v3549_v23, %v3515_v12  ;;  %v3781_v57 = vsel %vm9834_vm15, %v3617_v49, %v3583_v50 }
 0x463   : > { %v3813_v54 = vsel %vm9835_vm5, %v3685_v38, %v3651_v19  ;;  %v3845_v41 = vsel %vm9836_vm6, %v3749_v6, %v3717_v30 }
 0x464   : > { %v3877_v61 = vsel %vm9837_vm7, %v3813_v54, %v3781_v57 }
 0x465   : > { %v3909_v24 = vsel %vm9838_vm3, %v3877_v61, %v3845_v41 }
 0x466   : > { %v3941_v13 = vmul.f32 %v3909_v24, %v3381_v9 }
 0x468   : > { %3973 = vst [vmem:[%s7428_s28 + $0xf8] sm:$0xff] %v3941_v13 }
 0x469 PF: > { %s14_s17 = sadd.s32 1, %s4724_s17   ;;  %s9839_s15 = smov %s4720_s16 }
 0x46a   : > { %p11_p5 = scmp.ge.s32.totalorder %s14_s17, 4   ;;  %s9840_s16 = smov %s9842_s18 }
 0x46c   :  { %13 = sbr.rel (!%p11_p5) target bundleno = 2 (0x2), region = 75 }

</bundles_post_ra>
